<compile_context>
chip_gen: v7x
topology: tpu7x:2x2x1
jax: 0.10.0
libtpu: 0.0.40
codegen_flags: <defaults>
</compile_context>

<pallas_src>
import math
import jax
import jax.numpy as jnp
from jax.experimental import pallas as pl
from jax.experimental.pallas import tpu as pltpu

D = 32                 # d_model
H = 4                  # n_heads
DH = D // H            # head dim
DFF = 2 * D            # ffn hidden (Linear(d, 2d))
N_ENC_LAYERS = 2
N_DEC_LAYERS = 2       # only the last one matters (PyTorch stack bug)
EPS = 1e-5
NEG = -1e9
SCALE = 1.0 / math.sqrt(D)   # PyTorch divides by sqrt(d_model)


# ------------------------------ Pallas kernel ------------------------------ #
def _transformer_kernel(src_ref, tgt_ref, spad_ref, tpad_ref,
                        ew_qkv_ref, eb_qkv_ref, ew_o_ref, eb_o_ref,
                        ew_f1_ref, eb_f1_ref, ew_f2_ref, eb_f2_ref,
                        e_g_ref, e_b_ref,
                        dw_sqkv_ref, db_sqkv_ref, dw_so_ref, db_so_ref,
                        dw_cq_ref, db_cq_ref, dw_ckv_ref, db_ckv_ref,
                        dw_co_ref, db_co_ref,
                        dw_f1_ref, db_f1_ref, dw_f2_ref, db_f2_ref,
                        d_g_ref, d_b_ref,
                        out_ref):
    Ss = src_ref.shape[1]
    St = tgt_ref.shape[1]

    src = src_ref[0]          # (Ss, D)
    tgt = tgt_ref[0]          # (St, D)
    spad = spad_ref[0]        # (1, Ss) additive 0 / -1e9
    tpad = tpad_ref[0]        # (1, St) additive 0 / -1e9

    def layernorm(y, g, b):
        m = jnp.mean(y, axis=-1, keepdims=True)
        var = jnp.mean((y - m) ** 2, axis=-1, keepdims=True)
        return (y - m) * jax.lax.rsqrt(var + EPS) * g + b

    def attend(qm, q_off, kvm, k_off, v_off, w_o, b_o, mask):
        # qm: (Sq, *) holding q at column offset q_off; kvm: (Sk, *) holding
        # k / v at offsets k_off / v_off.  mask broadcasts over (Sq, Sk).
        heads = []
        for h in range(H):                      # static head loop
            lo = h * DH
            qs = qm[:, q_off + lo:q_off + lo + DH]
            ks = kvm[:, k_off + lo:k_off + lo + DH]
            vs = kvm[:, v_off + lo:v_off + lo + DH]
            s = jnp.dot(qs, ks.T, preferred_element_type=jnp.float32) * SCALE + mask
            p = jnp.exp(s)                      # fp32: -1e9 entries underflow to 0
            p = p * pl.reciprocal(jnp.sum(p, axis=-1, keepdims=True), approx=True)
            heads.append(jnp.dot(p, vs, preferred_element_type=jnp.float32))
        ctx = jnp.concatenate(heads, axis=-1)   # (Sq, D)
        return jnp.dot(ctx, w_o, preferred_element_type=jnp.float32) + b_o

    # ---- masks built in-kernel (only O(B*S) padding vectors come from HBM) ----
    rows = jax.lax.broadcasted_iota(jnp.int32, (St, St), 0)
    cols = jax.lax.broadcasted_iota(jnp.int32, (St, St), 1)
    causal = jnp.where(cols <= rows, 0.0, NEG).astype(jnp.float32)
    self_mask = causal + tpad       # (St, St)
    enc_mask = spad                 # (1, Ss) -> broadcast over (Ss, Ss)
    cross_mask = spad               # (1, Ss) -> broadcast over (St, Ss)

    # ------------------------------ encoder stack ------------------------------
    mem = src
    for l in range(N_ENC_LAYERS):
        qkv = jnp.dot(mem, ew_qkv_ref[l],
                      preferred_element_type=jnp.float32) + eb_qkv_ref[l]
        sa = attend(qkv, 0, qkv, D, 2 * D, ew_o_ref[l], eb_o_ref[l], enc_mask)
        g = e_g_ref[l]
        bt = e_b_ref[l]
        x = layernorm(mem + sa, g[0:1], bt[0:1])
        h1 = jnp.maximum(
            jnp.dot(x, ew_f1_ref[l], preferred_element_type=jnp.float32) + eb_f1_ref[l],
            0.0)
        ff = jnp.dot(h1, ew_f2_ref[l], preferred_element_type=jnp.float32) + eb_f2_ref[l]
        mem = layernorm(x + ff, g[1:2], bt[1:2])

    # --------- decoder: only the LAST layer contributes (stack bug) ---------
    dg = d_g_ref[...]
    db = d_b_ref[...]

    qkv = jnp.dot(tgt, dw_sqkv_ref[...],
                  preferred_element_type=jnp.float32) + db_sqkv_ref[...]
    sa = attend(qkv, 0, qkv, D, 2 * D, dw_so_ref[...], db_so_ref[...], self_mask)
    x = layernorm(tgt + sa, dg[0:1], db[0:1])

    q = jnp.dot(x, dw_cq_ref[...], preferred_element_type=jnp.float32) + db_cq_ref[...]
    kv = jnp.dot(mem, dw_ckv_ref[...], preferred_element_type=jnp.float32) + db_ckv_ref[...]
    ca = attend(q, 0, kv, 0, D, dw_co_ref[...], db_co_ref[...], cross_mask)
    x = layernorm(x + ca, dg[1:2], db[1:2])

    h1 = jnp.maximum(
        jnp.dot(x, dw_f1_ref[...], preferred_element_type=jnp.float32) + db_f1_ref[...],
        0.0)
    ff = jnp.dot(h1, dw_f2_ref[...], preferred_element_type=jnp.float32) + db_f2_ref[...]
    out_ref[0] = layernorm(x + ff, dg[2:3], db[2:3])


# --------------------------------- wrapper --------------------------------- #
def _fuse_attn(p):
    w_qkv = jnp.concatenate([p['wq'], p['wk'], p['wv']], axis=1)       # (D, 3D)
    b_qkv = jnp.concatenate([p['bq'], p['bk'], p['bv']])[None, :]      # (1, 3D)
    return w_qkv, b_qkv, p['wo'], p['bo'][None, :]


@jax.jit
def custom_transformer_pallas(src, tgt, src_pad, tgt_pad, enc_params, dec_params):
    B, Ss, _ = src.shape
    St = tgt.shape[1]

    # additive padding vectors (O(B*S)); the O(S^2) masks are built in-kernel
    spad = jnp.where(src_pad, NEG, 0.0).astype(jnp.float32)[:, None, :]   # (B,1,Ss)
    tpad = jnp.where(tgt_pad, NEG, 0.0).astype(jnp.float32)[:, None, :]   # (B,1,St)

    # ---- encoder params: fuse QKV, stack over layers (all layers are used) ----
    ef = [_fuse_attn(p['attn']) for p in enc_params]
    ew_qkv = jnp.stack([f[0] for f in ef])
    eb_qkv = jnp.stack([f[1] for f in ef])
    ew_o = jnp.stack([f[2] for f in ef])
    eb_o = jnp.stack([f[3] for f in ef])
    ew_f1 = jnp.stack([p['w_ff1'] for p in enc_params])
    eb_f1 = jnp.stack([p['b_ff1'][None, :] for p in enc_params])
    ew_f2 = jnp.stack([p['w_ff2'] for p in enc_params])
    eb_f2 = jnp.stack([p['b_ff2'][None, :] for p in enc_params])
    e_g = jnp.stack([jnp.stack([p['ln1_g'], p['ln2_g']]) for p in enc_params])
    e_b = jnp.stack([jnp.stack([p['ln1_b'], p['ln2_b']]) for p in enc_params])

    # ---- decoder: only the last layer's params (dead layers dropped) ----
    dp = dec_params[-1]
    dw_sqkv, db_sqkv, dw_so, db_so = _fuse_attn(dp['self_attn'])
    ca = dp['cross_attn']
    dw_cq, db_cq = ca['wq'], ca['bq'][None, :]
    dw_ckv = jnp.concatenate([ca['wk'], ca['wv']], axis=1)             # (D, 2D)
    db_ckv = jnp.concatenate([ca['bk'], ca['bv']])[None, :]            # (1, 2D)
    dw_co, db_co = ca['wo'], ca['bo'][None, :]
    dw_f1, db_f1 = dp['w_ff1'], dp['b_ff1'][None, :]
    dw_f2, db_f2 = dp['w_ff2'], dp['b_ff2'][None, :]
    d_g = jnp.stack([dp['ln1_g'], dp['ln2_g'], dp['ln3_g']])
    d_b = jnp.stack([dp['ln1_b'], dp['ln2_b'], dp['ln3_b']])

    params = (ew_qkv, eb_qkv, ew_o, eb_o, ew_f1, eb_f1, ew_f2, eb_f2, e_g, e_b,
              dw_sqkv, db_sqkv, dw_so, db_so,
              dw_cq, db_cq, dw_ckv, db_ckv, dw_co, db_co,
              dw_f1, db_f1, dw_f2, db_f2, d_g, d_b)

    def batch_spec(shape):
        n = len(shape) - 1
        return pl.BlockSpec((1,) + tuple(shape[1:]), lambda b, _n=n: (b,) + (0,) * _n)

    def const_spec(arr):
        nz = (0,) * arr.ndim
        return pl.BlockSpec(arr.shape, lambda b, _z=nz: _z)

    return pl.pallas_call(
        _transformer_kernel,
        out_shape=jax.ShapeDtypeStruct((B, St, D), jnp.float32),
        grid=(B,),
        in_specs=[batch_spec(src.shape), batch_spec(tgt.shape),
                  batch_spec(spad.shape), batch_spec(tpad.shape)]
                 + [const_spec(p) for p in params],
        out_specs=pl.BlockSpec((1, St, D), lambda b: (b, 0, 0)),
        # B=2 -> one batch per TensorCore on v7x; negligible serial overhead on
        # single-TC v5e/v6e since one grid step is the whole forward.
        compiler_params=pltpu.CompilerParams(dimension_semantics=("parallel",)),
    )(src, tgt, spad, tpad, *params)


# ------------------------------ param init --------------------------------- #
def _xavier(key, shape):
    limit = math.sqrt(6.0 / (shape[0] + shape[1]))
    return jax.random.uniform(key, shape, jnp.float32, -limit, limit)


def init_attn(key):
    ks = jax.random.split(key, 8)
    return dict(
        wq=_xavier(ks[0], (D, D)), bq=0.02 * jax.random.normal(ks[1], (D,), jnp.float32),
        wk=_xavier(ks[2], (D, D)), bk=0.02 * jax.random.normal(ks[3], (D,), jnp.float32),
        wv=_xavier(ks[4], (D, D)), bv=0.02 * jax.random.normal(ks[5], (D,), jnp.float32),
        wo=_xavier(ks[6], (D, D)), bo=0.02 * jax.random.normal(ks[7], (D,), jnp.float32))


def init_encoder_layer(key):
    ks = jax.random.split(key, 5)
    return dict(
        attn=init_attn(ks[0]),
        w_ff1=_xavier(ks[1], (D, DFF)),
        b_ff1=0.02 * jax.random.normal(ks[2], (DFF,), jnp.float32),
        w_ff2=_xavier(ks[3], (DFF, D)),
        b_ff2=0.02 * jax.random.normal(ks[4], (D,), jnp.float32),
        ln1_g=jnp.ones((D,), jnp.float32), ln1_b=jnp.zeros((D,), jnp.float32),
        ln2_g=jnp.ones((D,), jnp.float32), ln2_b=jnp.zeros((D,), jnp.float32))


def init_decoder_layer(key):
    ks = jax.random.split(key, 6)
    return dict(
        self_attn=init_attn(ks[0]),
        cross_attn=init_attn(ks[1]),
        w_ff1=_xavier(ks[2], (D, DFF)),
        b_ff1=0.02 * jax.random.normal(ks[3], (DFF,), jnp.float32),
        w_ff2=_xavier(ks[4], (DFF, D)),
        b_ff2=0.02 * jax.random.normal(ks[5], (D,), jnp.float32),
        ln1_g=jnp.ones((D,), jnp.float32), ln1_b=jnp.zeros((D,), jnp.float32),
        ln2_g=jnp.ones((D,), jnp.float32), ln2_b=jnp.zeros((D,), jnp.float32),
        ln3_g=jnp.ones((D,), jnp.float32), ln3_b=jnp.zeros((D,), jnp.float32))


# --------------------------- pure-JAX reference ----------------------------- #
def _attn_ref(qf, kf, p, dep_add, kpad):
    q = qf @ p['wq'] + p['bq']
    k = kf @ p['wk'] + p['bk']
    v = kf @ p['wv'] + p['bv']
    Bn, Sq, _ = q.shape
    Sk = k.shape[1]
    qh = q.reshape(Bn, Sq, H, DH)
    kh = k.reshape(Bn, Sk, H, DH)
    vh = v.reshape(Bn, Sk, H, DH)
    s = jnp.einsum('bqhe,bkhe->bhqk', qh, kh) / math.sqrt(D)
    s = s + jnp.where(kpad, NEG, 0.0)[:, None, None, :] + dep_add
    a = jax.nn.softmax(s, axis=-1)
    o = jnp.einsum('bhqk,bkhe->bqhe', a, vh).reshape(Bn, Sq, D)
    return o @ p['wo'] + p['bo']


def _ln_ref(y, g, b):
    m = y.mean(-1, keepdims=True)
    v = ((y - m) ** 2).mean(-1, keepdims=True)
    return (y - m) * jax.lax.rsqrt(v + EPS) * g + b


def _encoder_layer_ref(x, p, pad):
    sa = _attn_ref(x, x, p['attn'], 0.0, pad)
    x = _ln_ref(x + sa, p['ln1_g'], p['ln1_b'])
    ff = jax.nn.relu(x @ p['w_ff1'] + p['b_ff1']) @ p['w_ff2'] + p['b_ff2']
    return _ln_ref(x + ff, p['ln2_g'], p['ln2_b'])


def _decoder_layer_ref(x, mem, p, causal_add, src_pad, tgt_pad):
    sa = _attn_ref(x, x, p['self_attn'], causal_add, tgt_pad)
    x = _ln_ref(x + sa, p['ln1_g'], p['ln1_b'])
    ca = _attn_ref(x, mem, p['cross_attn'], 0.0, src_pad)
    x = _ln_ref(x + ca, p['ln2_g'], p['ln2_b'])
    ff = jax.nn.relu(x @ p['w_ff1'] + p['b_ff1']) @ p['w_ff2'] + p['b_ff2']
    return _ln_ref(x + ff, p['ln3_g'], p['ln3_b'])


def transformer_ref(src, tgt, src_pad, tgt_pad, enc_params, dec_params):
    St = tgt.shape[1]
    causal = jnp.where(jnp.tril(jnp.ones((St, St), bool)), 0.0, NEG).astype(jnp.float32)
    mem = src
    for p in enc_params:                       # encoder stack: every layer counts
        mem = _encoder_layer_ref(mem, p, src_pad)
    out = tgt
    for p in dec_params:                       # PyTorch bug: each layer sees ORIGINAL tgt
        out = _decoder_layer_ref(tgt, mem, p, causal, src_pad, tgt_pad)
    return out


# ----------------------------------- main ----------------------------------- #
if __name__ == "__main__":
    key = jax.random.PRNGKey(0)
    B, Ss, St = 2, 10, 8

    k_src, k_tgt, k_enc, k_dec = jax.random.split(key, 4)
    src_embs = jax.random.normal(k_src, (B, Ss, D), jnp.float32)
    tgt_embs = jax.random.normal(k_tgt, (B, St, D), jnp.float32)

    # PyTorch convention: padding masks are boolean, True == padded position.
    src_padding_mask = jnp.zeros((B, Ss), bool).at[:, -2:].set(True)
    tgt_padding_mask = jnp.zeros((B, St), bool).at[1, -1].set(True)

    enc_params = [init_encoder_layer(k) for k in jax.random.split(k_enc, N_ENC_LAYERS)]
    dec_params = [init_decoder_layer(k) for k in jax.random.split(k_dec, N_DEC_LAYERS)]

    out = custom_transformer_pallas(src_embs, tgt_embs, src_padding_mask,
                                    tgt_padding_mask, enc_params, dec_params)
    out = jax.block_until_ready(out)

    ref = transformer_ref(src_embs, tgt_embs, src_padding_mask, tgt_padding_mask,
                          enc_params, dec_params)
    assert out.shape == (B, St, D)
    # slightly loosened tolerance for the approximate (EUP) softmax reciprocal
    assert jnp.allclose(out, ref, atol=5e-3, rtol=5e-3), \
        "Pallas output mismatch vs JAX reference"

    print("KERNEL_OK")
</pallas_src>

<mosaic_0001>
module attributes {stable_mosaic.version = 11 : i64} {
  func.func @_transformer_kernel(%arg0: i32, %arg1: memref<1x10x32xf32, #tpu.memory_space<vmem>>, %arg2: memref<1x8x32xf32, #tpu.memory_space<vmem>>, %arg3: memref<1x1x10xf32, #tpu.memory_space<vmem>>, %arg4: memref<1x1x8xf32, #tpu.memory_space<vmem>>, %arg5: memref<2x32x96xf32, #tpu.memory_space<vmem>>, %arg6: memref<2x1x96xf32, #tpu.memory_space<vmem>>, %arg7: memref<2x32x32xf32, #tpu.memory_space<vmem>>, %arg8: memref<2x1x32xf32, #tpu.memory_space<vmem>>, %arg9: memref<2x32x64xf32, #tpu.memory_space<vmem>>, %arg10: memref<2x1x64xf32, #tpu.memory_space<vmem>>, %arg11: memref<2x64x32xf32, #tpu.memory_space<vmem>>, %arg12: memref<2x1x32xf32, #tpu.memory_space<vmem>>, %arg13: memref<2x2x32xf32, #tpu.memory_space<vmem>>, %arg14: memref<2x2x32xf32, #tpu.memory_space<vmem>>, %arg15: memref<32x96xf32, #tpu.memory_space<vmem>>, %arg16: memref<1x96xf32, #tpu.memory_space<vmem>>, %arg17: memref<32x32xf32, #tpu.memory_space<vmem>>, %arg18: memref<1x32xf32, #tpu.memory_space<vmem>>, %arg19: memref<32x32xf32, #tpu.memory_space<vmem>>, %arg20: memref<1x32xf32, #tpu.memory_space<vmem>>, %arg21: memref<32x64xf32, #tpu.memory_space<vmem>>, %arg22: memref<1x64xf32, #tpu.memory_space<vmem>>, %arg23: memref<32x32xf32, #tpu.memory_space<vmem>>, %arg24: memref<1x32xf32, #tpu.memory_space<vmem>>, %arg25: memref<32x64xf32, #tpu.memory_space<vmem>>, %arg26: memref<1x64xf32, #tpu.memory_space<vmem>>, %arg27: memref<64x32xf32, #tpu.memory_space<vmem>>, %arg28: memref<1x32xf32, #tpu.memory_space<vmem>>, %arg29: memref<3x32xf32, #tpu.memory_space<vmem>>, %arg30: memref<3x32xf32, #tpu.memory_space<vmem>>, %arg31: memref<1x8x32xf32, #tpu.memory_space<vmem>>) attributes {dimension_semantics = [#tpu.dimension_semantics<parallel>], iteration_bounds = array<i64: 2>, scalar_prefetch = 0 : i64, scratch_operands = 0 : i64, tpu.core_type = #tpu.core_type<tc>, window_params = [{transform_indices = @transform_0, window_bounds = array<i64: 1, 10, 32>}, {transform_indices = @transform_1, window_bounds = array<i64: 1, 8, 32>}, {transform_indices = @transform_2, window_bounds = array<i64: 1, 1, 10>}, {transform_indices = @transform_3, window_bounds = array<i64: 1, 1, 8>}, {pipeline_mode = #tpu.pipeline_mode<synchronous>, transform_indices = @transform_4, window_bounds = array<i64: 2, 32, 96>}, {pipeline_mode = #tpu.pipeline_mode<synchronous>, transform_indices = @transform_5, window_bounds = array<i64: 2, 1, 96>}, {pipeline_mode = #tpu.pipeline_mode<synchronous>, transform_indices = @transform_6, window_bounds = array<i64: 2, 32, 32>}, {pipeline_mode = #tpu.pipeline_mode<synchronous>, transform_indices = @transform_7, window_bounds = array<i64: 2, 1, 32>}, {pipeline_mode = #tpu.pipeline_mode<synchronous>, transform_indices = @transform_8, window_bounds = array<i64: 2, 32, 64>}, {pipeline_mode = #tpu.pipeline_mode<synchronous>, transform_indices = @transform_9, window_bounds = array<i64: 2, 1, 64>}, {pipeline_mode = #tpu.pipeline_mode<synchronous>, transform_indices = @transform_10, window_bounds = array<i64: 2, 64, 32>}, {pipeline_mode = #tpu.pipeline_mode<synchronous>, transform_indices = @transform_11, window_bounds = array<i64: 2, 1, 32>}, {pipeline_mode = #tpu.pipeline_mode<synchronous>, transform_indices = @transform_12, window_bounds = array<i64: 2, 2, 32>}, {pipeline_mode = #tpu.pipeline_mode<synchronous>, transform_indices = @transform_13, window_bounds = array<i64: 2, 2, 32>}, {pipeline_mode = #tpu.pipeline_mode<synchronous>, transform_indices = @transform_14, window_bounds = array<i64: 32, 96>}, {pipeline_mode = #tpu.pipeline_mode<synchronous>, transform_indices = @transform_15, window_bounds = array<i64: 1, 96>}, {pipeline_mode = #tpu.pipeline_mode<synchronous>, transform_indices = @transform_16, window_bounds = array<i64: 32, 32>}, {pipeline_mode = #tpu.pipeline_mode<synchronous>, transform_indices = @transform_17, window_bounds = array<i64: 1, 32>}, {pipeline_mode = #tpu.pipeline_mode<synchronous>, transform_indices = @transform_18, window_bounds = array<i64: 32, 32>}, {pipeline_mode = #tpu.pipeline_mode<synchronous>, transform_indices = @transform_19, window_bounds = array<i64: 1, 32>}, {pipeline_mode = #tpu.pipeline_mode<synchronous>, transform_indices = @transform_20, window_bounds = array<i64: 32, 64>}, {pipeline_mode = #tpu.pipeline_mode<synchronous>, transform_indices = @transform_21, window_bounds = array<i64: 1, 64>}, {pipeline_mode = #tpu.pipeline_mode<synchronous>, transform_indices = @transform_22, window_bounds = array<i64: 32, 32>}, {pipeline_mode = #tpu.pipeline_mode<synchronous>, transform_indices = @transform_23, window_bounds = array<i64: 1, 32>}, {pipeline_mode = #tpu.pipeline_mode<synchronous>, transform_indices = @transform_24, window_bounds = array<i64: 32, 64>}, {pipeline_mode = #tpu.pipeline_mode<synchronous>, transform_indices = @transform_25, window_bounds = array<i64: 1, 64>}, {pipeline_mode = #tpu.pipeline_mode<synchronous>, transform_indices = @transform_26, window_bounds = array<i64: 64, 32>}, {pipeline_mode = #tpu.pipeline_mode<synchronous>, transform_indices = @transform_27, window_bounds = array<i64: 1, 32>}, {pipeline_mode = #tpu.pipeline_mode<synchronous>, transform_indices = @transform_28, window_bounds = array<i64: 3, 32>}, {pipeline_mode = #tpu.pipeline_mode<synchronous>, transform_indices = @transform_29, window_bounds = array<i64: 3, 32>}, {transform_indices = @transform_30, window_bounds = array<i64: 1, 8, 32>}]} {
    %c0 = arith.constant 0 : index
    %c0_0 = arith.constant 0 : index
    %c0_1 = arith.constant 0 : index
    %0 = vector.load %arg1[%c0, %c0_0, %c0_1] : memref<1x10x32xf32, #tpu.memory_space<vmem>>, vector<1x10x32xf32>
    %1 = vector.shape_cast %0 : vector<1x10x32xf32> to vector<10x32xf32>
    %c0_2 = arith.constant 0 : index
    %c0_3 = arith.constant 0 : index
    %c0_4 = arith.constant 0 : index
    %2 = vector.load %arg2[%c0_2, %c0_3, %c0_4] : memref<1x8x32xf32, #tpu.memory_space<vmem>>, vector<1x8x32xf32>
    %3 = vector.shape_cast %2 : vector<1x8x32xf32> to vector<8x32xf32>
    %c0_5 = arith.constant 0 : index
    %c0_6 = arith.constant 0 : index
    %c0_7 = arith.constant 0 : index
    %4 = vector.load %arg3[%c0_5, %c0_6, %c0_7] : memref<1x1x10xf32, #tpu.memory_space<vmem>>, vector<1x1x10xf32>
    %5 = vector.shape_cast %4 : vector<1x1x10xf32> to vector<1x10xf32>
    %c0_8 = arith.constant 0 : index
    %c0_9 = arith.constant 0 : index
    %c0_10 = arith.constant 0 : index
    %6 = vector.load %arg4[%c0_8, %c0_9, %c0_10] : memref<1x1x8xf32, #tpu.memory_space<vmem>>, vector<1x1x8xf32>
    %7 = vector.shape_cast %6 : vector<1x1x8xf32> to vector<1x8xf32>
    %8 = tpu.iota {dimensions = array<i32: 0>} : vector<8x8xi32>
    %9 = tpu.iota {dimensions = array<i32: 1>} : vector<8x8xi32>
    %10 = arith.cmpi sle, %9, %8 : vector<8x8xi32>
    %cst = arith.constant 0.000000e+00 : f32
    %cst_11 = arith.constant -1.000000e+09 : f32
    %11 = vector.broadcast %cst : f32 to vector<8x8xf32>
    %12 = vector.broadcast %cst_11 : f32 to vector<8x8xf32>
    %13 = arith.select %10, %11, %12 : vector<8x8xi1>, vector<8x8xf32>
    %14 = vector.broadcast %7 : vector<1x8xf32> to vector<8x8xf32>
    %15 = arith.addf %13, %14 : vector<8x8xf32>
    %c0_12 = arith.constant 0 : index
    %c0_13 = arith.constant 0 : index
    %c0_14 = arith.constant 0 : index
    %16 = vector.load %arg5[%c0_12, %c0_13, %c0_14] : memref<2x32x96xf32, #tpu.memory_space<vmem>>, vector<1x32x96xf32>
    %17 = vector.shape_cast %16 : vector<1x32x96xf32> to vector<32x96xf32>
    %cst_15 = arith.constant dense<0.000000e+00> : vector<10x96xf32>
    %18 = tpu.matmul %1, %17, %cst_15 {dimension_numbers = #tpu.dot_dimension_numbers<[1], [0], [0], [1], [0, 0, 1, 1], [], []>} : vector<10x32xf32>, vector<32x96xf32>, vector<10x96xf32> -> vector<10x96xf32>
    %c0_16 = arith.constant 0 : index
    %c0_17 = arith.constant 0 : index
    %c0_18 = arith.constant 0 : index
    %19 = vector.load %arg6[%c0_16, %c0_17, %c0_18] : memref<2x1x96xf32, #tpu.memory_space<vmem>>, vector<1x1x96xf32>
    %20 = vector.shape_cast %19 : vector<1x1x96xf32> to vector<1x96xf32>
    %21 = vector.broadcast %20 : vector<1x96xf32> to vector<10x96xf32>
    %22 = arith.addf %18, %21 : vector<10x96xf32>
    %c0_19 = arith.constant 0 : index
    %c0_20 = arith.constant 0 : index
    %c0_21 = arith.constant 0 : index
    %23 = vector.load %arg7[%c0_19, %c0_20, %c0_21] : memref<2x32x32xf32, #tpu.memory_space<vmem>>, vector<1x32x32xf32>
    %24 = vector.shape_cast %23 : vector<1x32x32xf32> to vector<32x32xf32>
    %c0_22 = arith.constant 0 : index
    %c0_23 = arith.constant 0 : index
    %c0_24 = arith.constant 0 : index
    %25 = vector.load %arg8[%c0_22, %c0_23, %c0_24] : memref<2x1x32xf32, #tpu.memory_space<vmem>>, vector<1x1x32xf32>
    %26 = vector.shape_cast %25 : vector<1x1x32xf32> to vector<1x32xf32>
    %27 = vector.extract_strided_slice %22 {offsets = [0, 0], sizes = [10, 8], strides = [1, 1]} : vector<10x96xf32> to vector<10x8xf32>
    %28 = vector.extract_strided_slice %22 {offsets = [0, 32], sizes = [10, 8], strides = [1, 1]} : vector<10x96xf32> to vector<10x8xf32>
    %29 = vector.extract_strided_slice %22 {offsets = [0, 64], sizes = [10, 8], strides = [1, 1]} : vector<10x96xf32> to vector<10x8xf32>
    %30 = tpu.transpose %28, [1, 0] : vector<10x8xf32> -> vector<8x10xf32>
    %cst_25 = arith.constant dense<0.000000e+00> : vector<10x10xf32>
    %31 = tpu.matmul %27, %30, %cst_25 {dimension_numbers = #tpu.dot_dimension_numbers<[1], [0], [0], [1], [0, 0, 1, 1], [], []>} : vector<10x8xf32>, vector<8x10xf32>, vector<10x10xf32> -> vector<10x10xf32>
    %cst_26 = arith.constant 0.176776692 : f32
    %32 = vector.broadcast %cst_26 : f32 to vector<10x10xf32>
    %33 = arith.mulf %31, %32 : vector<10x10xf32>
    %34 = vector.broadcast %5 : vector<1x10xf32> to vector<10x10xf32>
    %35 = arith.addf %33, %34 : vector<10x10xf32>
    %36 = math.exp %35 : vector<10x10xf32>
    %cst_27 = arith.constant dense<0.000000e+00> : vector<10xf32>
    %37 = vector.multi_reduction <add>, %36, %cst_27 [1] : vector<10x10xf32> to vector<10xf32>
    %38 = vector.shape_cast %37 : vector<10xf32> to vector<10x1xf32>
    %39 = tpu.reciprocal %38 {approx = true} : vector<10x1xf32> -> vector<10x1xf32>
    %40 = vector.broadcast %39 : vector<10x1xf32> to vector<10x10xf32>
    %41 = arith.mulf %36, %40 : vector<10x10xf32>
    %cst_28 = arith.constant dense<0.000000e+00> : vector<10x8xf32>
    %42 = tpu.matmul %41, %29, %cst_28 {dimension_numbers = #tpu.dot_dimension_numbers<[1], [0], [0], [1], [0, 0, 1, 1], [], []>} : vector<10x10xf32>, vector<10x8xf32>, vector<10x8xf32> -> vector<10x8xf32>
    %43 = vector.extract_strided_slice %22 {offsets = [0, 8], sizes = [10, 8], strides = [1, 1]} : vector<10x96xf32> to vector<10x8xf32>
    %44 = vector.extract_strided_slice %22 {offsets = [0, 40], sizes = [10, 8], strides = [1, 1]} : vector<10x96xf32> to vector<10x8xf32>
    %45 = vector.extract_strided_slice %22 {offsets = [0, 72], sizes = [10, 8], strides = [1, 1]} : vector<10x96xf32> to vector<10x8xf32>
    %46 = tpu.transpose %44, [1, 0] : vector<10x8xf32> -> vector<8x10xf32>
    %cst_29 = arith.constant dense<0.000000e+00> : vector<10x10xf32>
    %47 = tpu.matmul %43, %46, %cst_29 {dimension_numbers = #tpu.dot_dimension_numbers<[1], [0], [0], [1], [0, 0, 1, 1], [], []>} : vector<10x8xf32>, vector<8x10xf32>, vector<10x10xf32> -> vector<10x10xf32>
    %cst_30 = arith.constant 0.176776692 : f32
    %48 = vector.broadcast %cst_30 : f32 to vector<10x10xf32>
    %49 = arith.mulf %47, %48 : vector<10x10xf32>
    %50 = vector.broadcast %5 : vector<1x10xf32> to vector<10x10xf32>
    %51 = arith.addf %49, %50 : vector<10x10xf32>
    %52 = math.exp %51 : vector<10x10xf32>
    %cst_31 = arith.constant dense<0.000000e+00> : vector<10xf32>
    %53 = vector.multi_reduction <add>, %52, %cst_31 [1] : vector<10x10xf32> to vector<10xf32>
    %54 = vector.shape_cast %53 : vector<10xf32> to vector<10x1xf32>
    %55 = tpu.reciprocal %54 {approx = true} : vector<10x1xf32> -> vector<10x1xf32>
    %56 = vector.broadcast %55 : vector<10x1xf32> to vector<10x10xf32>
    %57 = arith.mulf %52, %56 : vector<10x10xf32>
    %cst_32 = arith.constant dense<0.000000e+00> : vector<10x8xf32>
    %58 = tpu.matmul %57, %45, %cst_32 {dimension_numbers = #tpu.dot_dimension_numbers<[1], [0], [0], [1], [0, 0, 1, 1], [], []>} : vector<10x10xf32>, vector<10x8xf32>, vector<10x8xf32> -> vector<10x8xf32>
    %59 = vector.extract_strided_slice %22 {offsets = [0, 16], sizes = [10, 8], strides = [1, 1]} : vector<10x96xf32> to vector<10x8xf32>
    %60 = vector.extract_strided_slice %22 {offsets = [0, 48], sizes = [10, 8], strides = [1, 1]} : vector<10x96xf32> to vector<10x8xf32>
    %61 = vector.extract_strided_slice %22 {offsets = [0, 80], sizes = [10, 8], strides = [1, 1]} : vector<10x96xf32> to vector<10x8xf32>
    %62 = tpu.transpose %60, [1, 0] : vector<10x8xf32> -> vector<8x10xf32>
    %cst_33 = arith.constant dense<0.000000e+00> : vector<10x10xf32>
    %63 = tpu.matmul %59, %62, %cst_33 {dimension_numbers = #tpu.dot_dimension_numbers<[1], [0], [0], [1], [0, 0, 1, 1], [], []>} : vector<10x8xf32>, vector<8x10xf32>, vector<10x10xf32> -> vector<10x10xf32>
    %cst_34 = arith.constant 0.176776692 : f32
    %64 = vector.broadcast %cst_34 : f32 to vector<10x10xf32>
    %65 = arith.mulf %63, %64 : vector<10x10xf32>
    %66 = vector.broadcast %5 : vector<1x10xf32> to vector<10x10xf32>
    %67 = arith.addf %65, %66 : vector<10x10xf32>
    %68 = math.exp %67 : vector<10x10xf32>
    %cst_35 = arith.constant dense<0.000000e+00> : vector<10xf32>
    %69 = vector.multi_reduction <add>, %68, %cst_35 [1] : vector<10x10xf32> to vector<10xf32>
    %70 = vector.shape_cast %69 : vector<10xf32> to vector<10x1xf32>
    %71 = tpu.reciprocal %70 {approx = true} : vector<10x1xf32> -> vector<10x1xf32>
    %72 = vector.broadcast %71 : vector<10x1xf32> to vector<10x10xf32>
    %73 = arith.mulf %68, %72 : vector<10x10xf32>
    %cst_36 = arith.constant dense<0.000000e+00> : vector<10x8xf32>
    %74 = tpu.matmul %73, %61, %cst_36 {dimension_numbers = #tpu.dot_dimension_numbers<[1], [0], [0], [1], [0, 0, 1, 1], [], []>} : vector<10x10xf32>, vector<10x8xf32>, vector<10x8xf32> -> vector<10x8xf32>
    %75 = vector.extract_strided_slice %22 {offsets = [0, 24], sizes = [10, 8], strides = [1, 1]} : vector<10x96xf32> to vector<10x8xf32>
    %76 = vector.extract_strided_slice %22 {offsets = [0, 56], sizes = [10, 8], strides = [1, 1]} : vector<10x96xf32> to vector<10x8xf32>
    %77 = vector.extract_strided_slice %22 {offsets = [0, 88], sizes = [10, 8], strides = [1, 1]} : vector<10x96xf32> to vector<10x8xf32>
    %78 = tpu.transpose %76, [1, 0] : vector<10x8xf32> -> vector<8x10xf32>
    %cst_37 = arith.constant dense<0.000000e+00> : vector<10x10xf32>
    %79 = tpu.matmul %75, %78, %cst_37 {dimension_numbers = #tpu.dot_dimension_numbers<[1], [0], [0], [1], [0, 0, 1, 1], [], []>} : vector<10x8xf32>, vector<8x10xf32>, vector<10x10xf32> -> vector<10x10xf32>
    %cst_38 = arith.constant 0.176776692 : f32
    %80 = vector.broadcast %cst_38 : f32 to vector<10x10xf32>
    %81 = arith.mulf %79, %80 : vector<10x10xf32>
    %82 = vector.broadcast %5 : vector<1x10xf32> to vector<10x10xf32>
    %83 = arith.addf %81, %82 : vector<10x10xf32>
    %84 = math.exp %83 : vector<10x10xf32>
    %cst_39 = arith.constant dense<0.000000e+00> : vector<10xf32>
    %85 = vector.multi_reduction <add>, %84, %cst_39 [1] : vector<10x10xf32> to vector<10xf32>
    %86 = vector.shape_cast %85 : vector<10xf32> to vector<10x1xf32>
    %87 = tpu.reciprocal %86 {approx = true} : vector<10x1xf32> -> vector<10x1xf32>
    %88 = vector.broadcast %87 : vector<10x1xf32> to vector<10x10xf32>
    %89 = arith.mulf %84, %88 : vector<10x10xf32>
    %cst_40 = arith.constant dense<0.000000e+00> : vector<10x8xf32>
    %90 = tpu.matmul %89, %77, %cst_40 {dimension_numbers = #tpu.dot_dimension_numbers<[1], [0], [0], [1], [0, 0, 1, 1], [], []>} : vector<10x10xf32>, vector<10x8xf32>, vector<10x8xf32> -> vector<10x8xf32>
    %91 = tpu.concatenate %42, %58, %74, %90 in 1 : vector<10x8xf32>, vector<10x8xf32>, vector<10x8xf32>, vector<10x8xf32> -> vector<10x32xf32>
    %cst_41 = arith.constant dense<0.000000e+00> : vector<10x32xf32>
    %92 = tpu.matmul %91, %24, %cst_41 {dimension_numbers = #tpu.dot_dimension_numbers<[1], [0], [0], [1], [0, 0, 1, 1], [], []>} : vector<10x32xf32>, vector<32x32xf32>, vector<10x32xf32> -> vector<10x32xf32>
    %93 = vector.broadcast %26 : vector<1x32xf32> to vector<10x32xf32>
    %94 = arith.addf %92, %93 : vector<10x32xf32>
    %c0_42 = arith.constant 0 : index
    %c0_43 = arith.constant 0 : index
    %c0_44 = arith.constant 0 : index
    %95 = vector.load %arg13[%c0_42, %c0_43, %c0_44] : memref<2x2x32xf32, #tpu.memory_space<vmem>>, vector<1x2x32xf32>
    %96 = vector.shape_cast %95 : vector<1x2x32xf32> to vector<2x32xf32>
    %c0_45 = arith.constant 0 : index
    %c0_46 = arith.constant 0 : index
    %c0_47 = arith.constant 0 : index
    %97 = vector.load %arg14[%c0_45, %c0_46, %c0_47] : memref<2x2x32xf32, #tpu.memory_space<vmem>>, vector<1x2x32xf32>
    %98 = vector.shape_cast %97 : vector<1x2x32xf32> to vector<2x32xf32>
    %99 = arith.addf %1, %94 : vector<10x32xf32>
    %100 = vector.extract_strided_slice %96 {offsets = [0, 0], sizes = [1, 32], strides = [1, 1]} : vector<2x32xf32> to vector<1x32xf32>
    %101 = vector.extract_strided_slice %98 {offsets = [0, 0], sizes = [1, 32], strides = [1, 1]} : vector<2x32xf32> to vector<1x32xf32>
    %cst_48 = arith.constant dense<0.000000e+00> : vector<10xf32>
    %102 = vector.multi_reduction <add>, %99, %cst_48 [1] : vector<10x32xf32> to vector<10xf32>
    %103 = vector.shape_cast %102 : vector<10xf32> to vector<10x1xf32>
    %cst_49 = arith.constant 3.200000e+01 : f32
    %104 = vector.broadcast %cst_49 : f32 to vector<10x1xf32>
    %105 = arith.divf %103, %104 : vector<10x1xf32>
    %106 = vector.broadcast %105 : vector<10x1xf32> to vector<10x32xf32>
    %107 = arith.subf %99, %106 : vector<10x32xf32>
    %108 = arith.mulf %107, %107 : vector<10x32xf32>
    %cst_50 = arith.constant dense<0.000000e+00> : vector<10xf32>
    %109 = vector.multi_reduction <add>, %108, %cst_50 [1] : vector<10x32xf32> to vector<10xf32>
    %110 = vector.shape_cast %109 : vector<10xf32> to vector<10x1xf32>
    %cst_51 = arith.constant 3.200000e+01 : f32
    %111 = vector.broadcast %cst_51 : f32 to vector<10x1xf32>
    %112 = arith.divf %110, %111 : vector<10x1xf32>
    %113 = vector.broadcast %105 : vector<10x1xf32> to vector<10x32xf32>
    %114 = arith.subf %99, %113 : vector<10x32xf32>
    %cst_52 = arith.constant 9.99999974E-6 : f32
    %115 = vector.broadcast %cst_52 : f32 to vector<10x1xf32>
    %116 = arith.addf %112, %115 : vector<10x1xf32>
    %117 = math.rsqrt %116 : vector<10x1xf32>
    %118 = vector.broadcast %117 : vector<10x1xf32> to vector<10x32xf32>
    %119 = arith.mulf %114, %118 : vector<10x32xf32>
    %120 = vector.broadcast %100 : vector<1x32xf32> to vector<10x32xf32>
    %121 = arith.mulf %119, %120 : vector<10x32xf32>
    %122 = vector.broadcast %101 : vector<1x32xf32> to vector<10x32xf32>
    %123 = arith.addf %121, %122 : vector<10x32xf32>
    %c0_53 = arith.constant 0 : index
    %c0_54 = arith.constant 0 : index
    %c0_55 = arith.constant 0 : index
    %124 = vector.load %arg9[%c0_53, %c0_54, %c0_55] : memref<2x32x64xf32, #tpu.memory_space<vmem>>, vector<1x32x64xf32>
    %125 = vector.shape_cast %124 : vector<1x32x64xf32> to vector<32x64xf32>
    %cst_56 = arith.constant dense<0.000000e+00> : vector<10x64xf32>
    %126 = tpu.matmul %123, %125, %cst_56 {dimension_numbers = #tpu.dot_dimension_numbers<[1], [0], [0], [1], [0, 0, 1, 1], [], []>} : vector<10x32xf32>, vector<32x64xf32>, vector<10x64xf32> -> vector<10x64xf32>
    %c0_57 = arith.constant 0 : index
    %c0_58 = arith.constant 0 : index
    %c0_59 = arith.constant 0 : index
    %127 = vector.load %arg10[%c0_57, %c0_58, %c0_59] : memref<2x1x64xf32, #tpu.memory_space<vmem>>, vector<1x1x64xf32>
    %128 = vector.shape_cast %127 : vector<1x1x64xf32> to vector<1x64xf32>
    %129 = vector.broadcast %128 : vector<1x64xf32> to vector<10x64xf32>
    %130 = arith.addf %126, %129 : vector<10x64xf32>
    %cst_60 = arith.constant 0.000000e+00 : f32
    %131 = vector.broadcast %cst_60 : f32 to vector<10x64xf32>
    %132 = arith.maximumf %130, %131 : vector<10x64xf32>
    %c0_61 = arith.constant 0 : index
    %c0_62 = arith.constant 0 : index
    %c0_63 = arith.constant 0 : index
    %133 = vector.load %arg11[%c0_61, %c0_62, %c0_63] : memref<2x64x32xf32, #tpu.memory_space<vmem>>, vector<1x64x32xf32>
    %134 = vector.shape_cast %133 : vector<1x64x32xf32> to vector<64x32xf32>
    %cst_64 = arith.constant dense<0.000000e+00> : vector<10x32xf32>
    %135 = tpu.matmul %132, %134, %cst_64 {dimension_numbers = #tpu.dot_dimension_numbers<[1], [0], [0], [1], [0, 0, 1, 1], [], []>} : vector<10x64xf32>, vector<64x32xf32>, vector<10x32xf32> -> vector<10x32xf32>
    %c0_65 = arith.constant 0 : index
    %c0_66 = arith.constant 0 : index
    %c0_67 = arith.constant 0 : index
    %136 = vector.load %arg12[%c0_65, %c0_66, %c0_67] : memref<2x1x32xf32, #tpu.memory_space<vmem>>, vector<1x1x32xf32>
    %137 = vector.shape_cast %136 : vector<1x1x32xf32> to vector<1x32xf32>
    %138 = vector.broadcast %137 : vector<1x32xf32> to vector<10x32xf32>
    %139 = arith.addf %135, %138 : vector<10x32xf32>
    %140 = arith.addf %123, %139 : vector<10x32xf32>
    %141 = vector.extract_strided_slice %96 {offsets = [1, 0], sizes = [1, 32], strides = [1, 1]} : vector<2x32xf32> to vector<1x32xf32>
    %142 = vector.extract_strided_slice %98 {offsets = [1, 0], sizes = [1, 32], strides = [1, 1]} : vector<2x32xf32> to vector<1x32xf32>
    %cst_68 = arith.constant dense<0.000000e+00> : vector<10xf32>
    %143 = vector.multi_reduction <add>, %140, %cst_68 [1] : vector<10x32xf32> to vector<10xf32>
    %144 = vector.shape_cast %143 : vector<10xf32> to vector<10x1xf32>
    %cst_69 = arith.constant 3.200000e+01 : f32
    %145 = vector.broadcast %cst_69 : f32 to vector<10x1xf32>
    %146 = arith.divf %144, %145 : vector<10x1xf32>
    %147 = vector.broadcast %146 : vector<10x1xf32> to vector<10x32xf32>
    %148 = arith.subf %140, %147 : vector<10x32xf32>
    %149 = arith.mulf %148, %148 : vector<10x32xf32>
    %cst_70 = arith.constant dense<0.000000e+00> : vector<10xf32>
    %150 = vector.multi_reduction <add>, %149, %cst_70 [1] : vector<10x32xf32> to vector<10xf32>
    %151 = vector.shape_cast %150 : vector<10xf32> to vector<10x1xf32>
    %cst_71 = arith.constant 3.200000e+01 : f32
    %152 = vector.broadcast %cst_71 : f32 to vector<10x1xf32>
    %153 = arith.divf %151, %152 : vector<10x1xf32>
    %154 = vector.broadcast %146 : vector<10x1xf32> to vector<10x32xf32>
    %155 = arith.subf %140, %154 : vector<10x32xf32>
    %cst_72 = arith.constant 9.99999974E-6 : f32
    %156 = vector.broadcast %cst_72 : f32 to vector<10x1xf32>
    %157 = arith.addf %153, %156 : vector<10x1xf32>
    %158 = math.rsqrt %157 : vector<10x1xf32>
    %159 = vector.broadcast %158 : vector<10x1xf32> to vector<10x32xf32>
    %160 = arith.mulf %155, %159 : vector<10x32xf32>
    %161 = vector.broadcast %141 : vector<1x32xf32> to vector<10x32xf32>
    %162 = arith.mulf %160, %161 : vector<10x32xf32>
    %163 = vector.broadcast %142 : vector<1x32xf32> to vector<10x32xf32>
    %164 = arith.addf %162, %163 : vector<10x32xf32>
    %c1 = arith.constant 1 : index
    %c0_73 = arith.constant 0 : index
    %c0_74 = arith.constant 0 : index
    %165 = vector.load %arg5[%c1, %c0_73, %c0_74] : memref<2x32x96xf32, #tpu.memory_space<vmem>>, vector<1x32x96xf32>
    %166 = vector.shape_cast %165 : vector<1x32x96xf32> to vector<32x96xf32>
    %cst_75 = arith.constant dense<0.000000e+00> : vector<10x96xf32>
    %167 = tpu.matmul %164, %166, %cst_75 {dimension_numbers = #tpu.dot_dimension_numbers<[1], [0], [0], [1], [0, 0, 1, 1], [], []>} : vector<10x32xf32>, vector<32x96xf32>, vector<10x96xf32> -> vector<10x96xf32>
    %c1_76 = arith.constant 1 : index
    %c0_77 = arith.constant 0 : index
    %c0_78 = arith.constant 0 : index
    %168 = vector.load %arg6[%c1_76, %c0_77, %c0_78] : memref<2x1x96xf32, #tpu.memory_space<vmem>>, vector<1x1x96xf32>
    %169 = vector.shape_cast %168 : vector<1x1x96xf32> to vector<1x96xf32>
    %170 = vector.broadcast %169 : vector<1x96xf32> to vector<10x96xf32>
    %171 = arith.addf %167, %170 : vector<10x96xf32>
    %c1_79 = arith.constant 1 : index
    %c0_80 = arith.constant 0 : index
    %c0_81 = arith.constant 0 : index
    %172 = vector.load %arg7[%c1_79, %c0_80, %c0_81] : memref<2x32x32xf32, #tpu.memory_space<vmem>>, vector<1x32x32xf32>
    %173 = vector.shape_cast %172 : vector<1x32x32xf32> to vector<32x32xf32>
    %c1_82 = arith.constant 1 : index
    %c0_83 = arith.constant 0 : index
    %c0_84 = arith.constant 0 : index
    %174 = vector.load %arg8[%c1_82, %c0_83, %c0_84] : memref<2x1x32xf32, #tpu.memory_space<vmem>>, vector<1x1x32xf32>
    %175 = vector.shape_cast %174 : vector<1x1x32xf32> to vector<1x32xf32>
    %176 = vector.extract_strided_slice %171 {offsets = [0, 0], sizes = [10, 8], strides = [1, 1]} : vector<10x96xf32> to vector<10x8xf32>
    %177 = vector.extract_strided_slice %171 {offsets = [0, 32], sizes = [10, 8], strides = [1, 1]} : vector<10x96xf32> to vector<10x8xf32>
    %178 = vector.extract_strided_slice %171 {offsets = [0, 64], sizes = [10, 8], strides = [1, 1]} : vector<10x96xf32> to vector<10x8xf32>
    %179 = tpu.transpose %177, [1, 0] : vector<10x8xf32> -> vector<8x10xf32>
    %cst_85 = arith.constant dense<0.000000e+00> : vector<10x10xf32>
    %180 = tpu.matmul %176, %179, %cst_85 {dimension_numbers = #tpu.dot_dimension_numbers<[1], [0], [0], [1], [0, 0, 1, 1], [], []>} : vector<10x8xf32>, vector<8x10xf32>, vector<10x10xf32> -> vector<10x10xf32>
    %cst_86 = arith.constant 0.176776692 : f32
    %181 = vector.broadcast %cst_86 : f32 to vector<10x10xf32>
    %182 = arith.mulf %180, %181 : vector<10x10xf32>
    %183 = vector.broadcast %5 : vector<1x10xf32> to vector<10x10xf32>
    %184 = arith.addf %182, %183 : vector<10x10xf32>
    %185 = math.exp %184 : vector<10x10xf32>
    %cst_87 = arith.constant dense<0.000000e+00> : vector<10xf32>
    %186 = vector.multi_reduction <add>, %185, %cst_87 [1] : vector<10x10xf32> to vector<10xf32>
    %187 = vector.shape_cast %186 : vector<10xf32> to vector<10x1xf32>
    %188 = tpu.reciprocal %187 {approx = true} : vector<10x1xf32> -> vector<10x1xf32>
    %189 = vector.broadcast %188 : vector<10x1xf32> to vector<10x10xf32>
    %190 = arith.mulf %185, %189 : vector<10x10xf32>
    %cst_88 = arith.constant dense<0.000000e+00> : vector<10x8xf32>
    %191 = tpu.matmul %190, %178, %cst_88 {dimension_numbers = #tpu.dot_dimension_numbers<[1], [0], [0], [1], [0, 0, 1, 1], [], []>} : vector<10x10xf32>, vector<10x8xf32>, vector<10x8xf32> -> vector<10x8xf32>
    %192 = vector.extract_strided_slice %171 {offsets = [0, 8], sizes = [10, 8], strides = [1, 1]} : vector<10x96xf32> to vector<10x8xf32>
    %193 = vector.extract_strided_slice %171 {offsets = [0, 40], sizes = [10, 8], strides = [1, 1]} : vector<10x96xf32> to vector<10x8xf32>
    %194 = vector.extract_strided_slice %171 {offsets = [0, 72], sizes = [10, 8], strides = [1, 1]} : vector<10x96xf32> to vector<10x8xf32>
    %195 = tpu.transpose %193, [1, 0] : vector<10x8xf32> -> vector<8x10xf32>
    %cst_89 = arith.constant dense<0.000000e+00> : vector<10x10xf32>
    %196 = tpu.matmul %192, %195, %cst_89 {dimension_numbers = #tpu.dot_dimension_numbers<[1], [0], [0], [1], [0, 0, 1, 1], [], []>} : vector<10x8xf32>, vector<8x10xf32>, vector<10x10xf32> -> vector<10x10xf32>
    %cst_90 = arith.constant 0.176776692 : f32
    %197 = vector.broadcast %cst_90 : f32 to vector<10x10xf32>
    %198 = arith.mulf %196, %197 : vector<10x10xf32>
    %199 = vector.broadcast %5 : vector<1x10xf32> to vector<10x10xf32>
    %200 = arith.addf %198, %199 : vector<10x10xf32>
    %201 = math.exp %200 : vector<10x10xf32>
    %cst_91 = arith.constant dense<0.000000e+00> : vector<10xf32>
    %202 = vector.multi_reduction <add>, %201, %cst_91 [1] : vector<10x10xf32> to vector<10xf32>
    %203 = vector.shape_cast %202 : vector<10xf32> to vector<10x1xf32>
    %204 = tpu.reciprocal %203 {approx = true} : vector<10x1xf32> -> vector<10x1xf32>
    %205 = vector.broadcast %204 : vector<10x1xf32> to vector<10x10xf32>
    %206 = arith.mulf %201, %205 : vector<10x10xf32>
    %cst_92 = arith.constant dense<0.000000e+00> : vector<10x8xf32>
    %207 = tpu.matmul %206, %194, %cst_92 {dimension_numbers = #tpu.dot_dimension_numbers<[1], [0], [0], [1], [0, 0, 1, 1], [], []>} : vector<10x10xf32>, vector<10x8xf32>, vector<10x8xf32> -> vector<10x8xf32>
    %208 = vector.extract_strided_slice %171 {offsets = [0, 16], sizes = [10, 8], strides = [1, 1]} : vector<10x96xf32> to vector<10x8xf32>
    %209 = vector.extract_strided_slice %171 {offsets = [0, 48], sizes = [10, 8], strides = [1, 1]} : vector<10x96xf32> to vector<10x8xf32>
    %210 = vector.extract_strided_slice %171 {offsets = [0, 80], sizes = [10, 8], strides = [1, 1]} : vector<10x96xf32> to vector<10x8xf32>
    %211 = tpu.transpose %209, [1, 0] : vector<10x8xf32> -> vector<8x10xf32>
    %cst_93 = arith.constant dense<0.000000e+00> : vector<10x10xf32>
    %212 = tpu.matmul %208, %211, %cst_93 {dimension_numbers = #tpu.dot_dimension_numbers<[1], [0], [0], [1], [0, 0, 1, 1], [], []>} : vector<10x8xf32>, vector<8x10xf32>, vector<10x10xf32> -> vector<10x10xf32>
    %cst_94 = arith.constant 0.176776692 : f32
    %213 = vector.broadcast %cst_94 : f32 to vector<10x10xf32>
    %214 = arith.mulf %212, %213 : vector<10x10xf32>
    %215 = vector.broadcast %5 : vector<1x10xf32> to vector<10x10xf32>
    %216 = arith.addf %214, %215 : vector<10x10xf32>
    %217 = math.exp %216 : vector<10x10xf32>
    %cst_95 = arith.constant dense<0.000000e+00> : vector<10xf32>
    %218 = vector.multi_reduction <add>, %217, %cst_95 [1] : vector<10x10xf32> to vector<10xf32>
    %219 = vector.shape_cast %218 : vector<10xf32> to vector<10x1xf32>
    %220 = tpu.reciprocal %219 {approx = true} : vector<10x1xf32> -> vector<10x1xf32>
    %221 = vector.broadcast %220 : vector<10x1xf32> to vector<10x10xf32>
    %222 = arith.mulf %217, %221 : vector<10x10xf32>
    %cst_96 = arith.constant dense<0.000000e+00> : vector<10x8xf32>
    %223 = tpu.matmul %222, %210, %cst_96 {dimension_numbers = #tpu.dot_dimension_numbers<[1], [0], [0], [1], [0, 0, 1, 1], [], []>} : vector<10x10xf32>, vector<10x8xf32>, vector<10x8xf32> -> vector<10x8xf32>
    %224 = vector.extract_strided_slice %171 {offsets = [0, 24], sizes = [10, 8], strides = [1, 1]} : vector<10x96xf32> to vector<10x8xf32>
    %225 = vector.extract_strided_slice %171 {offsets = [0, 56], sizes = [10, 8], strides = [1, 1]} : vector<10x96xf32> to vector<10x8xf32>
    %226 = vector.extract_strided_slice %171 {offsets = [0, 88], sizes = [10, 8], strides = [1, 1]} : vector<10x96xf32> to vector<10x8xf32>
    %227 = tpu.transpose %225, [1, 0] : vector<10x8xf32> -> vector<8x10xf32>
    %cst_97 = arith.constant dense<0.000000e+00> : vector<10x10xf32>
    %228 = tpu.matmul %224, %227, %cst_97 {dimension_numbers = #tpu.dot_dimension_numbers<[1], [0], [0], [1], [0, 0, 1, 1], [], []>} : vector<10x8xf32>, vector<8x10xf32>, vector<10x10xf32> -> vector<10x10xf32>
    %cst_98 = arith.constant 0.176776692 : f32
    %229 = vector.broadcast %cst_98 : f32 to vector<10x10xf32>
    %230 = arith.mulf %228, %229 : vector<10x10xf32>
    %231 = vector.broadcast %5 : vector<1x10xf32> to vector<10x10xf32>
    %232 = arith.addf %230, %231 : vector<10x10xf32>
    %233 = math.exp %232 : vector<10x10xf32>
    %cst_99 = arith.constant dense<0.000000e+00> : vector<10xf32>
    %234 = vector.multi_reduction <add>, %233, %cst_99 [1] : vector<10x10xf32> to vector<10xf32>
    %235 = vector.shape_cast %234 : vector<10xf32> to vector<10x1xf32>
    %236 = tpu.reciprocal %235 {approx = true} : vector<10x1xf32> -> vector<10x1xf32>
    %237 = vector.broadcast %236 : vector<10x1xf32> to vector<10x10xf32>
    %238 = arith.mulf %233, %237 : vector<10x10xf32>
    %cst_100 = arith.constant dense<0.000000e+00> : vector<10x8xf32>
    %239 = tpu.matmul %238, %226, %cst_100 {dimension_numbers = #tpu.dot_dimension_numbers<[1], [0], [0], [1], [0, 0, 1, 1], [], []>} : vector<10x10xf32>, vector<10x8xf32>, vector<10x8xf32> -> vector<10x8xf32>
    %240 = tpu.concatenate %191, %207, %223, %239 in 1 : vector<10x8xf32>, vector<10x8xf32>, vector<10x8xf32>, vector<10x8xf32> -> vector<10x32xf32>
    %cst_101 = arith.constant dense<0.000000e+00> : vector<10x32xf32>
    %241 = tpu.matmul %240, %173, %cst_101 {dimension_numbers = #tpu.dot_dimension_numbers<[1], [0], [0], [1], [0, 0, 1, 1], [], []>} : vector<10x32xf32>, vector<32x32xf32>, vector<10x32xf32> -> vector<10x32xf32>
    %242 = vector.broadcast %175 : vector<1x32xf32> to vector<10x32xf32>
    %243 = arith.addf %241, %242 : vector<10x32xf32>
    %c1_102 = arith.constant 1 : index
    %c0_103 = arith.constant 0 : index
    %c0_104 = arith.constant 0 : index
    %244 = vector.load %arg13[%c1_102, %c0_103, %c0_104] : memref<2x2x32xf32, #tpu.memory_space<vmem>>, vector<1x2x32xf32>
    %245 = vector.shape_cast %244 : vector<1x2x32xf32> to vector<2x32xf32>
    %c1_105 = arith.constant 1 : index
    %c0_106 = arith.constant 0 : index
    %c0_107 = arith.constant 0 : index
    %246 = vector.load %arg14[%c1_105, %c0_106, %c0_107] : memref<2x2x32xf32, #tpu.memory_space<vmem>>, vector<1x2x32xf32>
    %247 = vector.shape_cast %246 : vector<1x2x32xf32> to vector<2x32xf32>
    %248 = arith.addf %164, %243 : vector<10x32xf32>
    %249 = vector.extract_strided_slice %245 {offsets = [0, 0], sizes = [1, 32], strides = [1, 1]} : vector<2x32xf32> to vector<1x32xf32>
    %250 = vector.extract_strided_slice %247 {offsets = [0, 0], sizes = [1, 32], strides = [1, 1]} : vector<2x32xf32> to vector<1x32xf32>
    %cst_108 = arith.constant dense<0.000000e+00> : vector<10xf32>
    %251 = vector.multi_reduction <add>, %248, %cst_108 [1] : vector<10x32xf32> to vector<10xf32>
    %252 = vector.shape_cast %251 : vector<10xf32> to vector<10x1xf32>
    %cst_109 = arith.constant 3.200000e+01 : f32
    %253 = vector.broadcast %cst_109 : f32 to vector<10x1xf32>
    %254 = arith.divf %252, %253 : vector<10x1xf32>
    %255 = vector.broadcast %254 : vector<10x1xf32> to vector<10x32xf32>
    %256 = arith.subf %248, %255 : vector<10x32xf32>
    %257 = arith.mulf %256, %256 : vector<10x32xf32>
    %cst_110 = arith.constant dense<0.000000e+00> : vector<10xf32>
    %258 = vector.multi_reduction <add>, %257, %cst_110 [1] : vector<10x32xf32> to vector<10xf32>
    %259 = vector.shape_cast %258 : vector<10xf32> to vector<10x1xf32>
    %cst_111 = arith.constant 3.200000e+01 : f32
    %260 = vector.broadcast %cst_111 : f32 to vector<10x1xf32>
    %261 = arith.divf %259, %260 : vector<10x1xf32>
    %262 = vector.broadcast %254 : vector<10x1xf32> to vector<10x32xf32>
    %263 = arith.subf %248, %262 : vector<10x32xf32>
    %cst_112 = arith.constant 9.99999974E-6 : f32
    %264 = vector.broadcast %cst_112 : f32 to vector<10x1xf32>
    %265 = arith.addf %261, %264 : vector<10x1xf32>
    %266 = math.rsqrt %265 : vector<10x1xf32>
    %267 = vector.broadcast %266 : vector<10x1xf32> to vector<10x32xf32>
    %268 = arith.mulf %263, %267 : vector<10x32xf32>
    %269 = vector.broadcast %249 : vector<1x32xf32> to vector<10x32xf32>
    %270 = arith.mulf %268, %269 : vector<10x32xf32>
    %271 = vector.broadcast %250 : vector<1x32xf32> to vector<10x32xf32>
    %272 = arith.addf %270, %271 : vector<10x32xf32>
    %c1_113 = arith.constant 1 : index
    %c0_114 = arith.constant 0 : index
    %c0_115 = arith.constant 0 : index
    %273 = vector.load %arg9[%c1_113, %c0_114, %c0_115] : memref<2x32x64xf32, #tpu.memory_space<vmem>>, vector<1x32x64xf32>
    %274 = vector.shape_cast %273 : vector<1x32x64xf32> to vector<32x64xf32>
    %cst_116 = arith.constant dense<0.000000e+00> : vector<10x64xf32>
    %275 = tpu.matmul %272, %274, %cst_116 {dimension_numbers = #tpu.dot_dimension_numbers<[1], [0], [0], [1], [0, 0, 1, 1], [], []>} : vector<10x32xf32>, vector<32x64xf32>, vector<10x64xf32> -> vector<10x64xf32>
    %c1_117 = arith.constant 1 : index
    %c0_118 = arith.constant 0 : index
    %c0_119 = arith.constant 0 : index
    %276 = vector.load %arg10[%c1_117, %c0_118, %c0_119] : memref<2x1x64xf32, #tpu.memory_space<vmem>>, vector<1x1x64xf32>
    %277 = vector.shape_cast %276 : vector<1x1x64xf32> to vector<1x64xf32>
    %278 = vector.broadcast %277 : vector<1x64xf32> to vector<10x64xf32>
    %279 = arith.addf %275, %278 : vector<10x64xf32>
    %cst_120 = arith.constant 0.000000e+00 : f32
    %280 = vector.broadcast %cst_120 : f32 to vector<10x64xf32>
    %281 = arith.maximumf %279, %280 : vector<10x64xf32>
    %c1_121 = arith.constant 1 : index
    %c0_122 = arith.constant 0 : index
    %c0_123 = arith.constant 0 : index
    %282 = vector.load %arg11[%c1_121, %c0_122, %c0_123] : memref<2x64x32xf32, #tpu.memory_space<vmem>>, vector<1x64x32xf32>
    %283 = vector.shape_cast %282 : vector<1x64x32xf32> to vector<64x32xf32>
    %cst_124 = arith.constant dense<0.000000e+00> : vector<10x32xf32>
    %284 = tpu.matmul %281, %283, %cst_124 {dimension_numbers = #tpu.dot_dimension_numbers<[1], [0], [0], [1], [0, 0, 1, 1], [], []>} : vector<10x64xf32>, vector<64x32xf32>, vector<10x32xf32> -> vector<10x32xf32>
    %c1_125 = arith.constant 1 : index
    %c0_126 = arith.constant 0 : index
    %c0_127 = arith.constant 0 : index
    %285 = vector.load %arg12[%c1_125, %c0_126, %c0_127] : memref<2x1x32xf32, #tpu.memory_space<vmem>>, vector<1x1x32xf32>
    %286 = vector.shape_cast %285 : vector<1x1x32xf32> to vector<1x32xf32>
    %287 = vector.broadcast %286 : vector<1x32xf32> to vector<10x32xf32>
    %288 = arith.addf %284, %287 : vector<10x32xf32>
    %289 = arith.addf %272, %288 : vector<10x32xf32>
    %290 = vector.extract_strided_slice %245 {offsets = [1, 0], sizes = [1, 32], strides = [1, 1]} : vector<2x32xf32> to vector<1x32xf32>
    %291 = vector.extract_strided_slice %247 {offsets = [1, 0], sizes = [1, 32], strides = [1, 1]} : vector<2x32xf32> to vector<1x32xf32>
    %cst_128 = arith.constant dense<0.000000e+00> : vector<10xf32>
    %292 = vector.multi_reduction <add>, %289, %cst_128 [1] : vector<10x32xf32> to vector<10xf32>
    %293 = vector.shape_cast %292 : vector<10xf32> to vector<10x1xf32>
    %cst_129 = arith.constant 3.200000e+01 : f32
    %294 = vector.broadcast %cst_129 : f32 to vector<10x1xf32>
    %295 = arith.divf %293, %294 : vector<10x1xf32>
    %296 = vector.broadcast %295 : vector<10x1xf32> to vector<10x32xf32>
    %297 = arith.subf %289, %296 : vector<10x32xf32>
    %298 = arith.mulf %297, %297 : vector<10x32xf32>
    %cst_130 = arith.constant dense<0.000000e+00> : vector<10xf32>
    %299 = vector.multi_reduction <add>, %298, %cst_130 [1] : vector<10x32xf32> to vector<10xf32>
    %300 = vector.shape_cast %299 : vector<10xf32> to vector<10x1xf32>
    %cst_131 = arith.constant 3.200000e+01 : f32
    %301 = vector.broadcast %cst_131 : f32 to vector<10x1xf32>
    %302 = arith.divf %300, %301 : vector<10x1xf32>
    %303 = vector.broadcast %295 : vector<10x1xf32> to vector<10x32xf32>
    %304 = arith.subf %289, %303 : vector<10x32xf32>
    %cst_132 = arith.constant 9.99999974E-6 : f32
    %305 = vector.broadcast %cst_132 : f32 to vector<10x1xf32>
    %306 = arith.addf %302, %305 : vector<10x1xf32>
    %307 = math.rsqrt %306 : vector<10x1xf32>
    %308 = vector.broadcast %307 : vector<10x1xf32> to vector<10x32xf32>
    %309 = arith.mulf %304, %308 : vector<10x32xf32>
    %310 = vector.broadcast %290 : vector<1x32xf32> to vector<10x32xf32>
    %311 = arith.mulf %309, %310 : vector<10x32xf32>
    %312 = vector.broadcast %291 : vector<1x32xf32> to vector<10x32xf32>
    %313 = arith.addf %311, %312 : vector<10x32xf32>
    %c0_133 = arith.constant 0 : index
    %c0_134 = arith.constant 0 : index
    %314 = vector.load %arg29[%c0_133, %c0_134] : memref<3x32xf32, #tpu.memory_space<vmem>>, vector<3x32xf32>
    %c0_135 = arith.constant 0 : index
    %c0_136 = arith.constant 0 : index
    %315 = vector.load %arg30[%c0_135, %c0_136] : memref<3x32xf32, #tpu.memory_space<vmem>>, vector<3x32xf32>
    %c0_137 = arith.constant 0 : index
    %c0_138 = arith.constant 0 : index
    %316 = vector.load %arg15[%c0_137, %c0_138] : memref<32x96xf32, #tpu.memory_space<vmem>>, vector<32x96xf32>
    %cst_139 = arith.constant dense<0.000000e+00> : vector<8x96xf32>
    %317 = tpu.matmul %3, %316, %cst_139 {dimension_numbers = #tpu.dot_dimension_numbers<[1], [0], [0], [1], [0, 0, 1, 1], [], []>} : vector<8x32xf32>, vector<32x96xf32>, vector<8x96xf32> -> vector<8x96xf32>
    %c0_140 = arith.constant 0 : index
    %c0_141 = arith.constant 0 : index
    %318 = vector.load %arg16[%c0_140, %c0_141] : memref<1x96xf32, #tpu.memory_space<vmem>>, vector<1x96xf32>
    %319 = vector.broadcast %318 : vector<1x96xf32> to vector<8x96xf32>
    %320 = arith.addf %317, %319 : vector<8x96xf32>
    %c0_142 = arith.constant 0 : index
    %c0_143 = arith.constant 0 : index
    %321 = vector.load %arg17[%c0_142, %c0_143] : memref<32x32xf32, #tpu.memory_space<vmem>>, vector<32x32xf32>
    %c0_144 = arith.constant 0 : index
    %c0_145 = arith.constant 0 : index
    %322 = vector.load %arg18[%c0_144, %c0_145] : memref<1x32xf32, #tpu.memory_space<vmem>>, vector<1x32xf32>
    %323 = vector.extract_strided_slice %320 {offsets = [0, 0], sizes = [8, 8], strides = [1, 1]} : vector<8x96xf32> to vector<8x8xf32>
    %324 = vector.extract_strided_slice %320 {offsets = [0, 32], sizes = [8, 8], strides = [1, 1]} : vector<8x96xf32> to vector<8x8xf32>
    %325 = vector.extract_strided_slice %320 {offsets = [0, 64], sizes = [8, 8], strides = [1, 1]} : vector<8x96xf32> to vector<8x8xf32>
    %326 = tpu.transpose %324, [1, 0] : vector<8x8xf32> -> vector<8x8xf32>
    %cst_146 = arith.constant dense<0.000000e+00> : vector<8x8xf32>
    %327 = tpu.matmul %323, %326, %cst_146 {dimension_numbers = #tpu.dot_dimension_numbers<[1], [0], [0], [1], [0, 0, 1, 1], [], []>} : vector<8x8xf32>, vector<8x8xf32>, vector<8x8xf32> -> vector<8x8xf32>
    %cst_147 = arith.constant 0.176776692 : f32
    %328 = vector.broadcast %cst_147 : f32 to vector<8x8xf32>
    %329 = arith.mulf %327, %328 : vector<8x8xf32>
    %330 = arith.addf %329, %15 : vector<8x8xf32>
    %331 = math.exp %330 : vector<8x8xf32>
    %cst_148 = arith.constant dense<0.000000e+00> : vector<8xf32>
    %332 = vector.multi_reduction <add>, %331, %cst_148 [1] : vector<8x8xf32> to vector<8xf32>
    %333 = vector.shape_cast %332 : vector<8xf32> to vector<8x1xf32>
    %334 = tpu.reciprocal %333 {approx = true} : vector<8x1xf32> -> vector<8x1xf32>
    %335 = vector.broadcast %334 : vector<8x1xf32> to vector<8x8xf32>
    %336 = arith.mulf %331, %335 : vector<8x8xf32>
    %cst_149 = arith.constant dense<0.000000e+00> : vector<8x8xf32>
    %337 = tpu.matmul %336, %325, %cst_149 {dimension_numbers = #tpu.dot_dimension_numbers<[1], [0], [0], [1], [0, 0, 1, 1], [], []>} : vector<8x8xf32>, vector<8x8xf32>, vector<8x8xf32> -> vector<8x8xf32>
    %338 = vector.extract_strided_slice %320 {offsets = [0, 8], sizes = [8, 8], strides = [1, 1]} : vector<8x96xf32> to vector<8x8xf32>
    %339 = vector.extract_strided_slice %320 {offsets = [0, 40], sizes = [8, 8], strides = [1, 1]} : vector<8x96xf32> to vector<8x8xf32>
    %340 = vector.extract_strided_slice %320 {offsets = [0, 72], sizes = [8, 8], strides = [1, 1]} : vector<8x96xf32> to vector<8x8xf32>
    %341 = tpu.transpose %339, [1, 0] : vector<8x8xf32> -> vector<8x8xf32>
    %cst_150 = arith.constant dense<0.000000e+00> : vector<8x8xf32>
    %342 = tpu.matmul %338, %341, %cst_150 {dimension_numbers = #tpu.dot_dimension_numbers<[1], [0], [0], [1], [0, 0, 1, 1], [], []>} : vector<8x8xf32>, vector<8x8xf32>, vector<8x8xf32> -> vector<8x8xf32>
    %cst_151 = arith.constant 0.176776692 : f32
    %343 = vector.broadcast %cst_151 : f32 to vector<8x8xf32>
    %344 = arith.mulf %342, %343 : vector<8x8xf32>
    %345 = arith.addf %344, %15 : vector<8x8xf32>
    %346 = math.exp %345 : vector<8x8xf32>
    %cst_152 = arith.constant dense<0.000000e+00> : vector<8xf32>
    %347 = vector.multi_reduction <add>, %346, %cst_152 [1] : vector<8x8xf32> to vector<8xf32>
    %348 = vector.shape_cast %347 : vector<8xf32> to vector<8x1xf32>
    %349 = tpu.reciprocal %348 {approx = true} : vector<8x1xf32> -> vector<8x1xf32>
    %350 = vector.broadcast %349 : vector<8x1xf32> to vector<8x8xf32>
    %351 = arith.mulf %346, %350 : vector<8x8xf32>
    %cst_153 = arith.constant dense<0.000000e+00> : vector<8x8xf32>
    %352 = tpu.matmul %351, %340, %cst_153 {dimension_numbers = #tpu.dot_dimension_numbers<[1], [0], [0], [1], [0, 0, 1, 1], [], []>} : vector<8x8xf32>, vector<8x8xf32>, vector<8x8xf32> -> vector<8x8xf32>
    %353 = vector.extract_strided_slice %320 {offsets = [0, 16], sizes = [8, 8], strides = [1, 1]} : vector<8x96xf32> to vector<8x8xf32>
    %354 = vector.extract_strided_slice %320 {offsets = [0, 48], sizes = [8, 8], strides = [1, 1]} : vector<8x96xf32> to vector<8x8xf32>
    %355 = vector.extract_strided_slice %320 {offsets = [0, 80], sizes = [8, 8], strides = [1, 1]} : vector<8x96xf32> to vector<8x8xf32>
    %356 = tpu.transpose %354, [1, 0] : vector<8x8xf32> -> vector<8x8xf32>
    %cst_154 = arith.constant dense<0.000000e+00> : vector<8x8xf32>
    %357 = tpu.matmul %353, %356, %cst_154 {dimension_numbers = #tpu.dot_dimension_numbers<[1], [0], [0], [1], [0, 0, 1, 1], [], []>} : vector<8x8xf32>, vector<8x8xf32>, vector<8x8xf32> -> vector<8x8xf32>
    %cst_155 = arith.constant 0.176776692 : f32
    %358 = vector.broadcast %cst_155 : f32 to vector<8x8xf32>
    %359 = arith.mulf %357, %358 : vector<8x8xf32>
    %360 = arith.addf %359, %15 : vector<8x8xf32>
    %361 = math.exp %360 : vector<8x8xf32>
    %cst_156 = arith.constant dense<0.000000e+00> : vector<8xf32>
    %362 = vector.multi_reduction <add>, %361, %cst_156 [1] : vector<8x8xf32> to vector<8xf32>
    %363 = vector.shape_cast %362 : vector<8xf32> to vector<8x1xf32>
    %364 = tpu.reciprocal %363 {approx = true} : vector<8x1xf32> -> vector<8x1xf32>
    %365 = vector.broadcast %364 : vector<8x1xf32> to vector<8x8xf32>
    %366 = arith.mulf %361, %365 : vector<8x8xf32>
    %cst_157 = arith.constant dense<0.000000e+00> : vector<8x8xf32>
    %367 = tpu.matmul %366, %355, %cst_157 {dimension_numbers = #tpu.dot_dimension_numbers<[1], [0], [0], [1], [0, 0, 1, 1], [], []>} : vector<8x8xf32>, vector<8x8xf32>, vector<8x8xf32> -> vector<8x8xf32>
    %368 = vector.extract_strided_slice %320 {offsets = [0, 24], sizes = [8, 8], strides = [1, 1]} : vector<8x96xf32> to vector<8x8xf32>
    %369 = vector.extract_strided_slice %320 {offsets = [0, 56], sizes = [8, 8], strides = [1, 1]} : vector<8x96xf32> to vector<8x8xf32>
    %370 = vector.extract_strided_slice %320 {offsets = [0, 88], sizes = [8, 8], strides = [1, 1]} : vector<8x96xf32> to vector<8x8xf32>
    %371 = tpu.transpose %369, [1, 0] : vector<8x8xf32> -> vector<8x8xf32>
    %cst_158 = arith.constant dense<0.000000e+00> : vector<8x8xf32>
    %372 = tpu.matmul %368, %371, %cst_158 {dimension_numbers = #tpu.dot_dimension_numbers<[1], [0], [0], [1], [0, 0, 1, 1], [], []>} : vector<8x8xf32>, vector<8x8xf32>, vector<8x8xf32> -> vector<8x8xf32>
    %cst_159 = arith.constant 0.176776692 : f32
    %373 = vector.broadcast %cst_159 : f32 to vector<8x8xf32>
    %374 = arith.mulf %372, %373 : vector<8x8xf32>
    %375 = arith.addf %374, %15 : vector<8x8xf32>
    %376 = math.exp %375 : vector<8x8xf32>
    %cst_160 = arith.constant dense<0.000000e+00> : vector<8xf32>
    %377 = vector.multi_reduction <add>, %376, %cst_160 [1] : vector<8x8xf32> to vector<8xf32>
    %378 = vector.shape_cast %377 : vector<8xf32> to vector<8x1xf32>
    %379 = tpu.reciprocal %378 {approx = true} : vector<8x1xf32> -> vector<8x1xf32>
    %380 = vector.broadcast %379 : vector<8x1xf32> to vector<8x8xf32>
    %381 = arith.mulf %376, %380 : vector<8x8xf32>
    %cst_161 = arith.constant dense<0.000000e+00> : vector<8x8xf32>
    %382 = tpu.matmul %381, %370, %cst_161 {dimension_numbers = #tpu.dot_dimension_numbers<[1], [0], [0], [1], [0, 0, 1, 1], [], []>} : vector<8x8xf32>, vector<8x8xf32>, vector<8x8xf32> -> vector<8x8xf32>
    %383 = tpu.concatenate %337, %352, %367, %382 in 1 : vector<8x8xf32>, vector<8x8xf32>, vector<8x8xf32>, vector<8x8xf32> -> vector<8x32xf32>
    %cst_162 = arith.constant dense<0.000000e+00> : vector<8x32xf32>
    %384 = tpu.matmul %383, %321, %cst_162 {dimension_numbers = #tpu.dot_dimension_numbers<[1], [0], [0], [1], [0, 0, 1, 1], [], []>} : vector<8x32xf32>, vector<32x32xf32>, vector<8x32xf32> -> vector<8x32xf32>
    %385 = vector.broadcast %322 : vector<1x32xf32> to vector<8x32xf32>
    %386 = arith.addf %384, %385 : vector<8x32xf32>
    %387 = arith.addf %3, %386 : vector<8x32xf32>
    %388 = vector.extract_strided_slice %314 {offsets = [0, 0], sizes = [1, 32], strides = [1, 1]} : vector<3x32xf32> to vector<1x32xf32>
    %389 = vector.extract_strided_slice %315 {offsets = [0, 0], sizes = [1, 32], strides = [1, 1]} : vector<3x32xf32> to vector<1x32xf32>
    %cst_163 = arith.constant dense<0.000000e+00> : vector<8xf32>
    %390 = vector.multi_reduction <add>, %387, %cst_163 [1] : vector<8x32xf32> to vector<8xf32>
    %391 = vector.shape_cast %390 : vector<8xf32> to vector<8x1xf32>
    %cst_164 = arith.constant 3.200000e+01 : f32
    %392 = vector.broadcast %cst_164 : f32 to vector<8x1xf32>
    %393 = arith.divf %391, %392 : vector<8x1xf32>
    %394 = vector.broadcast %393 : vector<8x1xf32> to vector<8x32xf32>
    %395 = arith.subf %387, %394 : vector<8x32xf32>
    %396 = arith.mulf %395, %395 : vector<8x32xf32>
    %cst_165 = arith.constant dense<0.000000e+00> : vector<8xf32>
    %397 = vector.multi_reduction <add>, %396, %cst_165 [1] : vector<8x32xf32> to vector<8xf32>
    %398 = vector.shape_cast %397 : vector<8xf32> to vector<8x1xf32>
    %cst_166 = arith.constant 3.200000e+01 : f32
    %399 = vector.broadcast %cst_166 : f32 to vector<8x1xf32>
    %400 = arith.divf %398, %399 : vector<8x1xf32>
    %401 = vector.broadcast %393 : vector<8x1xf32> to vector<8x32xf32>
    %402 = arith.subf %387, %401 : vector<8x32xf32>
    %cst_167 = arith.constant 9.99999974E-6 : f32
    %403 = vector.broadcast %cst_167 : f32 to vector<8x1xf32>
    %404 = arith.addf %400, %403 : vector<8x1xf32>
    %405 = math.rsqrt %404 : vector<8x1xf32>
    %406 = vector.broadcast %405 : vector<8x1xf32> to vector<8x32xf32>
    %407 = arith.mulf %402, %406 : vector<8x32xf32>
    %408 = vector.broadcast %388 : vector<1x32xf32> to vector<8x32xf32>
    %409 = arith.mulf %407, %408 : vector<8x32xf32>
    %410 = vector.broadcast %389 : vector<1x32xf32> to vector<8x32xf32>
    %411 = arith.addf %409, %410 : vector<8x32xf32>
    %c0_168 = arith.constant 0 : index
    %c0_169 = arith.constant 0 : index
    %412 = vector.load %arg19[%c0_168, %c0_169] : memref<32x32xf32, #tpu.memory_space<vmem>>, vector<32x32xf32>
    %cst_170 = arith.constant dense<0.000000e+00> : vector<8x32xf32>
    %413 = tpu.matmul %411, %412, %cst_170 {dimension_numbers = #tpu.dot_dimension_numbers<[1], [0], [0], [1], [0, 0, 1, 1], [], []>} : vector<8x32xf32>, vector<32x32xf32>, vector<8x32xf32> -> vector<8x32xf32>
    %c0_171 = arith.constant 0 : index
    %c0_172 = arith.constant 0 : index
    %414 = vector.load %arg20[%c0_171, %c0_172] : memref<1x32xf32, #tpu.memory_space<vmem>>, vector<1x32xf32>
    %415 = vector.broadcast %414 : vector<1x32xf32> to vector<8x32xf32>
    %416 = arith.addf %413, %415 : vector<8x32xf32>
    %c0_173 = arith.constant 0 : index
    %c0_174 = arith.constant 0 : index
    %417 = vector.load %arg21[%c0_173, %c0_174] : memref<32x64xf32, #tpu.memory_space<vmem>>, vector<32x64xf32>
    %cst_175 = arith.constant dense<0.000000e+00> : vector<10x64xf32>
    %418 = tpu.matmul %313, %417, %cst_175 {dimension_numbers = #tpu.dot_dimension_numbers<[1], [0], [0], [1], [0, 0, 1, 1], [], []>} : vector<10x32xf32>, vector<32x64xf32>, vector<10x64xf32> -> vector<10x64xf32>
    %c0_176 = arith.constant 0 : index
    %c0_177 = arith.constant 0 : index
    %419 = vector.load %arg22[%c0_176, %c0_177] : memref<1x64xf32, #tpu.memory_space<vmem>>, vector<1x64xf32>
    %420 = vector.broadcast %419 : vector<1x64xf32> to vector<10x64xf32>
    %421 = arith.addf %418, %420 : vector<10x64xf32>
    %c0_178 = arith.constant 0 : index
    %c0_179 = arith.constant 0 : index
    %422 = vector.load %arg23[%c0_178, %c0_179] : memref<32x32xf32, #tpu.memory_space<vmem>>, vector<32x32xf32>
    %c0_180 = arith.constant 0 : index
    %c0_181 = arith.constant 0 : index
    %423 = vector.load %arg24[%c0_180, %c0_181] : memref<1x32xf32, #tpu.memory_space<vmem>>, vector<1x32xf32>
    %424 = vector.extract_strided_slice %416 {offsets = [0, 0], sizes = [8, 8], strides = [1, 1]} : vector<8x32xf32> to vector<8x8xf32>
    %425 = vector.extract_strided_slice %421 {offsets = [0, 0], sizes = [10, 8], strides = [1, 1]} : vector<10x64xf32> to vector<10x8xf32>
    %426 = vector.extract_strided_slice %421 {offsets = [0, 32], sizes = [10, 8], strides = [1, 1]} : vector<10x64xf32> to vector<10x8xf32>
    %427 = tpu.transpose %425, [1, 0] : vector<10x8xf32> -> vector<8x10xf32>
    %cst_182 = arith.constant dense<0.000000e+00> : vector<8x10xf32>
    %428 = tpu.matmul %424, %427, %cst_182 {dimension_numbers = #tpu.dot_dimension_numbers<[1], [0], [0], [1], [0, 0, 1, 1], [], []>} : vector<8x8xf32>, vector<8x10xf32>, vector<8x10xf32> -> vector<8x10xf32>
    %cst_183 = arith.constant 0.176776692 : f32
    %429 = vector.broadcast %cst_183 : f32 to vector<8x10xf32>
    %430 = arith.mulf %428, %429 : vector<8x10xf32>
    %431 = vector.broadcast %5 : vector<1x10xf32> to vector<8x10xf32>
    %432 = arith.addf %430, %431 : vector<8x10xf32>
    %433 = math.exp %432 : vector<8x10xf32>
    %cst_184 = arith.constant dense<0.000000e+00> : vector<8xf32>
    %434 = vector.multi_reduction <add>, %433, %cst_184 [1] : vector<8x10xf32> to vector<8xf32>
    %435 = vector.shape_cast %434 : vector<8xf32> to vector<8x1xf32>
    %436 = tpu.reciprocal %435 {approx = true} : vector<8x1xf32> -> vector<8x1xf32>
    %437 = vector.broadcast %436 : vector<8x1xf32> to vector<8x10xf32>
    %438 = arith.mulf %433, %437 : vector<8x10xf32>
    %cst_185 = arith.constant dense<0.000000e+00> : vector<8x8xf32>
    %439 = tpu.matmul %438, %426, %cst_185 {dimension_numbers = #tpu.dot_dimension_numbers<[1], [0], [0], [1], [0, 0, 1, 1], [], []>} : vector<8x10xf32>, vector<10x8xf32>, vector<8x8xf32> -> vector<8x8xf32>
    %440 = vector.extract_strided_slice %416 {offsets = [0, 8], sizes = [8, 8], strides = [1, 1]} : vector<8x32xf32> to vector<8x8xf32>
    %441 = vector.extract_strided_slice %421 {offsets = [0, 8], sizes = [10, 8], strides = [1, 1]} : vector<10x64xf32> to vector<10x8xf32>
    %442 = vector.extract_strided_slice %421 {offsets = [0, 40], sizes = [10, 8], strides = [1, 1]} : vector<10x64xf32> to vector<10x8xf32>
    %443 = tpu.transpose %441, [1, 0] : vector<10x8xf32> -> vector<8x10xf32>
    %cst_186 = arith.constant dense<0.000000e+00> : vector<8x10xf32>
    %444 = tpu.matmul %440, %443, %cst_186 {dimension_numbers = #tpu.dot_dimension_numbers<[1], [0], [0], [1], [0, 0, 1, 1], [], []>} : vector<8x8xf32>, vector<8x10xf32>, vector<8x10xf32> -> vector<8x10xf32>
    %cst_187 = arith.constant 0.176776692 : f32
    %445 = vector.broadcast %cst_187 : f32 to vector<8x10xf32>
    %446 = arith.mulf %444, %445 : vector<8x10xf32>
    %447 = vector.broadcast %5 : vector<1x10xf32> to vector<8x10xf32>
    %448 = arith.addf %446, %447 : vector<8x10xf32>
    %449 = math.exp %448 : vector<8x10xf32>
    %cst_188 = arith.constant dense<0.000000e+00> : vector<8xf32>
    %450 = vector.multi_reduction <add>, %449, %cst_188 [1] : vector<8x10xf32> to vector<8xf32>
    %451 = vector.shape_cast %450 : vector<8xf32> to vector<8x1xf32>
    %452 = tpu.reciprocal %451 {approx = true} : vector<8x1xf32> -> vector<8x1xf32>
    %453 = vector.broadcast %452 : vector<8x1xf32> to vector<8x10xf32>
    %454 = arith.mulf %449, %453 : vector<8x10xf32>
    %cst_189 = arith.constant dense<0.000000e+00> : vector<8x8xf32>
    %455 = tpu.matmul %454, %442, %cst_189 {dimension_numbers = #tpu.dot_dimension_numbers<[1], [0], [0], [1], [0, 0, 1, 1], [], []>} : vector<8x10xf32>, vector<10x8xf32>, vector<8x8xf32> -> vector<8x8xf32>
    %456 = vector.extract_strided_slice %416 {offsets = [0, 16], sizes = [8, 8], strides = [1, 1]} : vector<8x32xf32> to vector<8x8xf32>
    %457 = vector.extract_strided_slice %421 {offsets = [0, 16], sizes = [10, 8], strides = [1, 1]} : vector<10x64xf32> to vector<10x8xf32>
    %458 = vector.extract_strided_slice %421 {offsets = [0, 48], sizes = [10, 8], strides = [1, 1]} : vector<10x64xf32> to vector<10x8xf32>
    %459 = tpu.transpose %457, [1, 0] : vector<10x8xf32> -> vector<8x10xf32>
    %cst_190 = arith.constant dense<0.000000e+00> : vector<8x10xf32>
    %460 = tpu.matmul %456, %459, %cst_190 {dimension_numbers = #tpu.dot_dimension_numbers<[1], [0], [0], [1], [0, 0, 1, 1], [], []>} : vector<8x8xf32>, vector<8x10xf32>, vector<8x10xf32> -> vector<8x10xf32>
    %cst_191 = arith.constant 0.176776692 : f32
    %461 = vector.broadcast %cst_191 : f32 to vector<8x10xf32>
    %462 = arith.mulf %460, %461 : vector<8x10xf32>
    %463 = vector.broadcast %5 : vector<1x10xf32> to vector<8x10xf32>
    %464 = arith.addf %462, %463 : vector<8x10xf32>
    %465 = math.exp %464 : vector<8x10xf32>
    %cst_192 = arith.constant dense<0.000000e+00> : vector<8xf32>
    %466 = vector.multi_reduction <add>, %465, %cst_192 [1] : vector<8x10xf32> to vector<8xf32>
    %467 = vector.shape_cast %466 : vector<8xf32> to vector<8x1xf32>
    %468 = tpu.reciprocal %467 {approx = true} : vector<8x1xf32> -> vector<8x1xf32>
    %469 = vector.broadcast %468 : vector<8x1xf32> to vector<8x10xf32>
    %470 = arith.mulf %465, %469 : vector<8x10xf32>
    %cst_193 = arith.constant dense<0.000000e+00> : vector<8x8xf32>
    %471 = tpu.matmul %470, %458, %cst_193 {dimension_numbers = #tpu.dot_dimension_numbers<[1], [0], [0], [1], [0, 0, 1, 1], [], []>} : vector<8x10xf32>, vector<10x8xf32>, vector<8x8xf32> -> vector<8x8xf32>
    %472 = vector.extract_strided_slice %416 {offsets = [0, 24], sizes = [8, 8], strides = [1, 1]} : vector<8x32xf32> to vector<8x8xf32>
    %473 = vector.extract_strided_slice %421 {offsets = [0, 24], sizes = [10, 8], strides = [1, 1]} : vector<10x64xf32> to vector<10x8xf32>
    %474 = vector.extract_strided_slice %421 {offsets = [0, 56], sizes = [10, 8], strides = [1, 1]} : vector<10x64xf32> to vector<10x8xf32>
    %475 = tpu.transpose %473, [1, 0] : vector<10x8xf32> -> vector<8x10xf32>
    %cst_194 = arith.constant dense<0.000000e+00> : vector<8x10xf32>
    %476 = tpu.matmul %472, %475, %cst_194 {dimension_numbers = #tpu.dot_dimension_numbers<[1], [0], [0], [1], [0, 0, 1, 1], [], []>} : vector<8x8xf32>, vector<8x10xf32>, vector<8x10xf32> -> vector<8x10xf32>
    %cst_195 = arith.constant 0.176776692 : f32
    %477 = vector.broadcast %cst_195 : f32 to vector<8x10xf32>
    %478 = arith.mulf %476, %477 : vector<8x10xf32>
    %479 = vector.broadcast %5 : vector<1x10xf32> to vector<8x10xf32>
    %480 = arith.addf %478, %479 : vector<8x10xf32>
    %481 = math.exp %480 : vector<8x10xf32>
    %cst_196 = arith.constant dense<0.000000e+00> : vector<8xf32>
    %482 = vector.multi_reduction <add>, %481, %cst_196 [1] : vector<8x10xf32> to vector<8xf32>
    %483 = vector.shape_cast %482 : vector<8xf32> to vector<8x1xf32>
    %484 = tpu.reciprocal %483 {approx = true} : vector<8x1xf32> -> vector<8x1xf32>
    %485 = vector.broadcast %484 : vector<8x1xf32> to vector<8x10xf32>
    %486 = arith.mulf %481, %485 : vector<8x10xf32>
    %cst_197 = arith.constant dense<0.000000e+00> : vector<8x8xf32>
    %487 = tpu.matmul %486, %474, %cst_197 {dimension_numbers = #tpu.dot_dimension_numbers<[1], [0], [0], [1], [0, 0, 1, 1], [], []>} : vector<8x10xf32>, vector<10x8xf32>, vector<8x8xf32> -> vector<8x8xf32>
    %488 = tpu.concatenate %439, %455, %471, %487 in 1 : vector<8x8xf32>, vector<8x8xf32>, vector<8x8xf32>, vector<8x8xf32> -> vector<8x32xf32>
    %cst_198 = arith.constant dense<0.000000e+00> : vector<8x32xf32>
    %489 = tpu.matmul %488, %422, %cst_198 {dimension_numbers = #tpu.dot_dimension_numbers<[1], [0], [0], [1], [0, 0, 1, 1], [], []>} : vector<8x32xf32>, vector<32x32xf32>, vector<8x32xf32> -> vector<8x32xf32>
    %490 = vector.broadcast %423 : vector<1x32xf32> to vector<8x32xf32>
    %491 = arith.addf %489, %490 : vector<8x32xf32>
    %492 = arith.addf %411, %491 : vector<8x32xf32>
    %493 = vector.extract_strided_slice %314 {offsets = [1, 0], sizes = [1, 32], strides = [1, 1]} : vector<3x32xf32> to vector<1x32xf32>
    %494 = vector.extract_strided_slice %315 {offsets = [1, 0], sizes = [1, 32], strides = [1, 1]} : vector<3x32xf32> to vector<1x32xf32>
    %cst_199 = arith.constant dense<0.000000e+00> : vector<8xf32>
    %495 = vector.multi_reduction <add>, %492, %cst_199 [1] : vector<8x32xf32> to vector<8xf32>
    %496 = vector.shape_cast %495 : vector<8xf32> to vector<8x1xf32>
    %cst_200 = arith.constant 3.200000e+01 : f32
    %497 = vector.broadcast %cst_200 : f32 to vector<8x1xf32>
    %498 = arith.divf %496, %497 : vector<8x1xf32>
    %499 = vector.broadcast %498 : vector<8x1xf32> to vector<8x32xf32>
    %500 = arith.subf %492, %499 : vector<8x32xf32>
    %501 = arith.mulf %500, %500 : vector<8x32xf32>
    %cst_201 = arith.constant dense<0.000000e+00> : vector<8xf32>
    %502 = vector.multi_reduction <add>, %501, %cst_201 [1] : vector<8x32xf32> to vector<8xf32>
    %503 = vector.shape_cast %502 : vector<8xf32> to vector<8x1xf32>
    %cst_202 = arith.constant 3.200000e+01 : f32
    %504 = vector.broadcast %cst_202 : f32 to vector<8x1xf32>
    %505 = arith.divf %503, %504 : vector<8x1xf32>
    %506 = vector.broadcast %498 : vector<8x1xf32> to vector<8x32xf32>
    %507 = arith.subf %492, %506 : vector<8x32xf32>
    %cst_203 = arith.constant 9.99999974E-6 : f32
    %508 = vector.broadcast %cst_203 : f32 to vector<8x1xf32>
    %509 = arith.addf %505, %508 : vector<8x1xf32>
    %510 = math.rsqrt %509 : vector<8x1xf32>
    %511 = vector.broadcast %510 : vector<8x1xf32> to vector<8x32xf32>
    %512 = arith.mulf %507, %511 : vector<8x32xf32>
    %513 = vector.broadcast %493 : vector<1x32xf32> to vector<8x32xf32>
    %514 = arith.mulf %512, %513 : vector<8x32xf32>
    %515 = vector.broadcast %494 : vector<1x32xf32> to vector<8x32xf32>
    %516 = arith.addf %514, %515 : vector<8x32xf32>
    %c0_204 = arith.constant 0 : index
    %c0_205 = arith.constant 0 : index
    %517 = vector.load %arg25[%c0_204, %c0_205] : memref<32x64xf32, #tpu.memory_space<vmem>>, vector<32x64xf32>
    %cst_206 = arith.constant dense<0.000000e+00> : vector<8x64xf32>
    %518 = tpu.matmul %516, %517, %cst_206 {dimension_numbers = #tpu.dot_dimension_numbers<[1], [0], [0], [1], [0, 0, 1, 1], [], []>} : vector<8x32xf32>, vector<32x64xf32>, vector<8x64xf32> -> vector<8x64xf32>
    %c0_207 = arith.constant 0 : index
    %c0_208 = arith.constant 0 : index
    %519 = vector.load %arg26[%c0_207, %c0_208] : memref<1x64xf32, #tpu.memory_space<vmem>>, vector<1x64xf32>
    %520 = vector.broadcast %519 : vector<1x64xf32> to vector<8x64xf32>
    %521 = arith.addf %518, %520 : vector<8x64xf32>
    %cst_209 = arith.constant 0.000000e+00 : f32
    %522 = vector.broadcast %cst_209 : f32 to vector<8x64xf32>
    %523 = arith.maximumf %521, %522 : vector<8x64xf32>
    %c0_210 = arith.constant 0 : index
    %c0_211 = arith.constant 0 : index
    %524 = vector.load %arg27[%c0_210, %c0_211] : memref<64x32xf32, #tpu.memory_space<vmem>>, vector<64x32xf32>
    %cst_212 = arith.constant dense<0.000000e+00> : vector<8x32xf32>
    %525 = tpu.matmul %523, %524, %cst_212 {dimension_numbers = #tpu.dot_dimension_numbers<[1], [0], [0], [1], [0, 0, 1, 1], [], []>} : vector<8x64xf32>, vector<64x32xf32>, vector<8x32xf32> -> vector<8x32xf32>
    %c0_213 = arith.constant 0 : index
    %c0_214 = arith.constant 0 : index
    %526 = vector.load %arg28[%c0_213, %c0_214] : memref<1x32xf32, #tpu.memory_space<vmem>>, vector<1x32xf32>
    %527 = vector.broadcast %526 : vector<1x32xf32> to vector<8x32xf32>
    %528 = arith.addf %525, %527 : vector<8x32xf32>
    %529 = arith.addf %516, %528 : vector<8x32xf32>
    %530 = vector.extract_strided_slice %314 {offsets = [2, 0], sizes = [1, 32], strides = [1, 1]} : vector<3x32xf32> to vector<1x32xf32>
    %531 = vector.extract_strided_slice %315 {offsets = [2, 0], sizes = [1, 32], strides = [1, 1]} : vector<3x32xf32> to vector<1x32xf32>
    %cst_215 = arith.constant dense<0.000000e+00> : vector<8xf32>
    %532 = vector.multi_reduction <add>, %529, %cst_215 [1] : vector<8x32xf32> to vector<8xf32>
    %533 = vector.shape_cast %532 : vector<8xf32> to vector<8x1xf32>
    %cst_216 = arith.constant 3.200000e+01 : f32
    %534 = vector.broadcast %cst_216 : f32 to vector<8x1xf32>
    %535 = arith.divf %533, %534 : vector<8x1xf32>
    %536 = vector.broadcast %535 : vector<8x1xf32> to vector<8x32xf32>
    %537 = arith.subf %529, %536 : vector<8x32xf32>
    %538 = arith.mulf %537, %537 : vector<8x32xf32>
    %cst_217 = arith.constant dense<0.000000e+00> : vector<8xf32>
    %539 = vector.multi_reduction <add>, %538, %cst_217 [1] : vector<8x32xf32> to vector<8xf32>
    %540 = vector.shape_cast %539 : vector<8xf32> to vector<8x1xf32>
    %cst_218 = arith.constant 3.200000e+01 : f32
    %541 = vector.broadcast %cst_218 : f32 to vector<8x1xf32>
    %542 = arith.divf %540, %541 : vector<8x1xf32>
    %543 = vector.broadcast %535 : vector<8x1xf32> to vector<8x32xf32>
    %544 = arith.subf %529, %543 : vector<8x32xf32>
    %cst_219 = arith.constant 9.99999974E-6 : f32
    %545 = vector.broadcast %cst_219 : f32 to vector<8x1xf32>
    %546 = arith.addf %542, %545 : vector<8x1xf32>
    %547 = math.rsqrt %546 : vector<8x1xf32>
    %548 = vector.broadcast %547 : vector<8x1xf32> to vector<8x32xf32>
    %549 = arith.mulf %544, %548 : vector<8x32xf32>
    %550 = vector.broadcast %530 : vector<1x32xf32> to vector<8x32xf32>
    %551 = arith.mulf %549, %550 : vector<8x32xf32>
    %552 = vector.broadcast %531 : vector<1x32xf32> to vector<8x32xf32>
    %553 = arith.addf %551, %552 : vector<8x32xf32>
    %c0_220 = arith.constant 0 : index
    %c0_221 = arith.constant 0 : index
    %c0_222 = arith.constant 0 : index
    %554 = vector.load %arg31[%c0_220, %c0_221, %c0_222] : memref<1x8x32xf32, #tpu.memory_space<vmem>>, vector<1x8x32xf32>
    %555 = vector.shape_cast %554 : vector<1x8x32xf32> to vector<8x32xf32>
    %556 = vector.shape_cast %553 : vector<8x32xf32> to vector<1x8x32xf32>
    tpu.vector_store %arg31[%c0_220, %c0_221, %c0_222], %556 {strides = array<i32>} : memref<1x8x32xf32, #tpu.memory_space<vmem>>, vector<1x8x32xf32>,
    return
  }
  func.func @transform_0(%arg0: i32) -> (i32, i32, i32) {
    %c0_i32 = arith.constant 0 : i32
    %c0_i32_0 = arith.constant 0 : i32
    %c0_i32_1 = arith.constant 0 : i32
    return %arg0, %c0_i32, %c0_i32_0 : i32, i32, i32
  }
  func.func @transform_1(%arg0: i32) -> (i32, i32, i32) {
    %c0_i32 = arith.constant 0 : i32
    %c0_i32_0 = arith.constant 0 : i32
    %c0_i32_1 = arith.constant 0 : i32
    return %arg0, %c0_i32, %c0_i32_0 : i32, i32, i32
  }
  func.func @transform_2(%arg0: i32) -> (i32, i32, i32) {
    %c0_i32 = arith.constant 0 : i32
    %c0_i32_0 = arith.constant 0 : i32
    %c0_i32_1 = arith.constant 0 : i32
    return %arg0, %c0_i32, %c0_i32_0 : i32, i32, i32
  }
  func.func @transform_3(%arg0: i32) -> (i32, i32, i32) {
    %c0_i32 = arith.constant 0 : i32
    %c0_i32_0 = arith.constant 0 : i32
    %c0_i32_1 = arith.constant 0 : i32
    return %arg0, %c0_i32, %c0_i32_0 : i32, i32, i32
  }
  func.func @transform_4(%arg0: i32) -> (i32, i32, i32) {
    %c0_i32 = arith.constant 0 : i32
    %c0_i32_0 = arith.constant 0 : i32
    %c0_i32_1 = arith.constant 0 : i32
    %c0_i32_2 = arith.constant 0 : i32
    return %c0_i32, %c0_i32_0, %c0_i32_1 : i32, i32, i32
  }
  func.func @transform_5(%arg0: i32) -> (i32, i32, i32) {
    %c0_i32 = arith.constant 0 : i32
    %c0_i32_0 = arith.constant 0 : i32
    %c0_i32_1 = arith.constant 0 : i32
    %c0_i32_2 = arith.constant 0 : i32
    return %c0_i32, %c0_i32_0, %c0_i32_1 : i32, i32, i32
  }
  func.func @transform_6(%arg0: i32) -> (i32, i32, i32) {
    %c0_i32 = arith.constant 0 : i32
    %c0_i32_0 = arith.constant 0 : i32
    %c0_i32_1 = arith.constant 0 : i32
    %c0_i32_2 = arith.constant 0 : i32
    return %c0_i32, %c0_i32_0, %c0_i32_1 : i32, i32, i32
  }
  func.func @transform_7(%arg0: i32) -> (i32, i32, i32) {
    %c0_i32 = arith.constant 0 : i32
    %c0_i32_0 = arith.constant 0 : i32
    %c0_i32_1 = arith.constant 0 : i32
    %c0_i32_2 = arith.constant 0 : i32
    return %c0_i32, %c0_i32_0, %c0_i32_1 : i32, i32, i32
  }
  func.func @transform_8(%arg0: i32) -> (i32, i32, i32) {
    %c0_i32 = arith.constant 0 : i32
    %c0_i32_0 = arith.constant 0 : i32
    %c0_i32_1 = arith.constant 0 : i32
    %c0_i32_2 = arith.constant 0 : i32
    return %c0_i32, %c0_i32_0, %c0_i32_1 : i32, i32, i32
  }
  func.func @transform_9(%arg0: i32) -> (i32, i32, i32) {
    %c0_i32 = arith.constant 0 : i32
    %c0_i32_0 = arith.constant 0 : i32
    %c0_i32_1 = arith.constant 0 : i32
    %c0_i32_2 = arith.constant 0 : i32
    return %c0_i32, %c0_i32_0, %c0_i32_1 : i32, i32, i32
  }
  func.func @transform_10(%arg0: i32) -> (i32, i32, i32) {
    %c0_i32 = arith.constant 0 : i32
    %c0_i32_0 = arith.constant 0 : i32
    %c0_i32_1 = arith.constant 0 : i32
    %c0_i32_2 = arith.constant 0 : i32
    return %c0_i32, %c0_i32_0, %c0_i32_1 : i32, i32, i32
  }
  func.func @transform_11(%arg0: i32) -> (i32, i32, i32) {
    %c0_i32 = arith.constant 0 : i32
    %c0_i32_0 = arith.constant 0 : i32
    %c0_i32_1 = arith.constant 0 : i32
    %c0_i32_2 = arith.constant 0 : i32
    return %c0_i32, %c0_i32_0, %c0_i32_1 : i32, i32, i32
  }
  func.func @transform_12(%arg0: i32) -> (i32, i32, i32) {
    %c0_i32 = arith.constant 0 : i32
    %c0_i32_0 = arith.constant 0 : i32
    %c0_i32_1 = arith.constant 0 : i32
    %c0_i32_2 = arith.constant 0 : i32
    return %c0_i32, %c0_i32_0, %c0_i32_1 : i32, i32, i32
  }
  func.func @transform_13(%arg0: i32) -> (i32, i32, i32) {
    %c0_i32 = arith.constant 0 : i32
    %c0_i32_0 = arith.constant 0 : i32
    %c0_i32_1 = arith.constant 0 : i32
    %c0_i32_2 = arith.constant 0 : i32
    return %c0_i32, %c0_i32_0, %c0_i32_1 : i32, i32, i32
  }
  func.func @transform_14(%arg0: i32) -> (i32, i32) {
    %c0_i32 = arith.constant 0 : i32
    %c0_i32_0 = arith.constant 0 : i32
    %c0_i32_1 = arith.constant 0 : i32
    return %c0_i32, %c0_i32_0 : i32, i32
  }
  func.func @transform_15(%arg0: i32) -> (i32, i32) {
    %c0_i32 = arith.constant 0 : i32
    %c0_i32_0 = arith.constant 0 : i32
    %c0_i32_1 = arith.constant 0 : i32
    return %c0_i32, %c0_i32_0 : i32, i32
  }
  func.func @transform_16(%arg0: i32) -> (i32, i32) {
    %c0_i32 = arith.constant 0 : i32
    %c0_i32_0 = arith.constant 0 : i32
    %c0_i32_1 = arith.constant 0 : i32
    return %c0_i32, %c0_i32_0 : i32, i32
  }
  func.func @transform_17(%arg0: i32) -> (i32, i32) {
    %c0_i32 = arith.constant 0 : i32
    %c0_i32_0 = arith.constant 0 : i32
    %c0_i32_1 = arith.constant 0 : i32
    return %c0_i32, %c0_i32_0 : i32, i32
  }
  func.func @transform_18(%arg0: i32) -> (i32, i32) {
    %c0_i32 = arith.constant 0 : i32
    %c0_i32_0 = arith.constant 0 : i32
    %c0_i32_1 = arith.constant 0 : i32
    return %c0_i32, %c0_i32_0 : i32, i32
  }
  func.func @transform_19(%arg0: i32) -> (i32, i32) {
    %c0_i32 = arith.constant 0 : i32
    %c0_i32_0 = arith.constant 0 : i32
    %c0_i32_1 = arith.constant 0 : i32
    return %c0_i32, %c0_i32_0 : i32, i32
  }
  func.func @transform_20(%arg0: i32) -> (i32, i32) {
    %c0_i32 = arith.constant 0 : i32
    %c0_i32_0 = arith.constant 0 : i32
    %c0_i32_1 = arith.constant 0 : i32
    return %c0_i32, %c0_i32_0 : i32, i32
  }
  func.func @transform_21(%arg0: i32) -> (i32, i32) {
    %c0_i32 = arith.constant 0 : i32
    %c0_i32_0 = arith.constant 0 : i32
    %c0_i32_1 = arith.constant 0 : i32
    return %c0_i32, %c0_i32_0 : i32, i32
  }
  func.func @transform_22(%arg0: i32) -> (i32, i32) {
    %c0_i32 = arith.constant 0 : i32
    %c0_i32_0 = arith.constant 0 : i32
    %c0_i32_1 = arith.constant 0 : i32
    return %c0_i32, %c0_i32_0 : i32, i32
  }
  func.func @transform_23(%arg0: i32) -> (i32, i32) {
    %c0_i32 = arith.constant 0 : i32
    %c0_i32_0 = arith.constant 0 : i32
    %c0_i32_1 = arith.constant 0 : i32
    return %c0_i32, %c0_i32_0 : i32, i32
  }
  func.func @transform_24(%arg0: i32) -> (i32, i32) {
    %c0_i32 = arith.constant 0 : i32
    %c0_i32_0 = arith.constant 0 : i32
    %c0_i32_1 = arith.constant 0 : i32
    return %c0_i32, %c0_i32_0 : i32, i32
  }
  func.func @transform_25(%arg0: i32) -> (i32, i32) {
    %c0_i32 = arith.constant 0 : i32
    %c0_i32_0 = arith.constant 0 : i32
    %c0_i32_1 = arith.constant 0 : i32
    return %c0_i32, %c0_i32_0 : i32, i32
  }
  func.func @transform_26(%arg0: i32) -> (i32, i32) {
    %c0_i32 = arith.constant 0 : i32
    %c0_i32_0 = arith.constant 0 : i32
    %c0_i32_1 = arith.constant 0 : i32
    return %c0_i32, %c0_i32_0 : i32, i32
  }
  func.func @transform_27(%arg0: i32) -> (i32, i32) {
    %c0_i32 = arith.constant 0 : i32
    %c0_i32_0 = arith.constant 0 : i32
    %c0_i32_1 = arith.constant 0 : i32
    return %c0_i32, %c0_i32_0 : i32, i32
  }
  func.func @transform_28(%arg0: i32) -> (i32, i32) {
    %c0_i32 = arith.constant 0 : i32
    %c0_i32_0 = arith.constant 0 : i32
    %c0_i32_1 = arith.constant 0 : i32
    return %c0_i32, %c0_i32_0 : i32, i32
  }
  func.func @transform_29(%arg0: i32) -> (i32, i32) {
    %c0_i32 = arith.constant 0 : i32
    %c0_i32_0 = arith.constant 0 : i32
    %c0_i32_1 = arith.constant 0 : i32
    return %c0_i32, %c0_i32_0 : i32, i32
  }
  func.func @transform_30(%arg0: i32) -> (i32, i32, i32) {
    %c0_i32 = arith.constant 0 : i32
    %c0_i32_0 = arith.constant 0 : i32
    %c0_i32_1 = arith.constant 0 : i32
    return %arg0, %c0_i32, %c0_i32_0 : i32, i32, i32
  }
}

</mosaic_0001>

<bundles_post_ra>
// kernel: custom_transformer_pallas.1
= control target key start
LH: loop header
LB: loop body
LE: loop exit
PB: predicated region body
PF: predicated region fallthrough
CT: control target
= control target key end

     0   :  { %s7143_s6 = smov 1   ;;  %s7144_s10 = smov 2   ;;  %s8133_s0 = inlined_call_operand.smem [shape: u32[31], index: -1, kind: input, shape index: {}] }
   0x1   :  { %s7201_s5 = sld [smem:[%s8133_s0]]   ;;  %s7145_s14 = smov 3  }
   0x2   :  { %s7206_s9 = sld [smem:[%s8133_s0 + %s7143_s6]]   ;;  %s7146_s18 = smov 4  }
   0x3   :  { %s7211_s13 = sld [smem:[%s8133_s0 + %s7144_s10]]   ;;  %s7147_s22 = smov 5  }
   0x4   :  { %s7216_s17 = sld [smem:[%s8133_s0 + %s7145_s14]]   ;;  %s7148_s26 = smov 6  }
   0x5   :  { %s7221_s21 = sld [smem:[%s8133_s0 + %s7146_s18]]   ;;  %s7149_s30 = smov 7  }
   0x6   :  { %s7226_s25 = sld [smem:[%s8133_s0 + %s7147_s22]]   ;;  %s7150_s4 = smov 8  }
   0x7   :  { %8182 = sst [smem:[#allocation5_spill]] %s7201_s5  ;;  %s7151_s10 = smov 9  }
   0x8   :  { %s7231_s29 = sld [smem:[%s8133_s0 + %s7148_s26]]   ;;  %s7152_s15 = smov 10  }
   0x9   :  { %8183 = sst [smem:[#allocation6_spill]] %s7211_s13  ;;  %s7153_s20 = smov 11  }
   0xa   :  { %8184 = sst [smem:[#allocation7_spill]] %s7216_s17  ;;  %s7154_s26 = smov 12  }
   0xb   :  { %8185 = sst [smem:[#allocation8_spill]] %s7221_s21  ;;  %s7155_s1 = smov 13  }
   0xc   :  { %8186 = sst [smem:[#allocation9_spill]] %s7226_s25  ;;  %s7156_s7 = smov 14  }
   0xd   :  { %s7236_s3 = sld [smem:[%s8133_s0 + %s7149_s30]]   ;;  %s7158_s22 = smov 16  }
   0xe   :  { %s7241_s8 = sld [smem:[%s8133_s0 + %s7150_s4]]   ;;  %s7159_s28 = smov 17  }
   0xf   :  { %s7246_s14 = sld [smem:[%s8133_s0 + %s7151_s10]]  }
  0x10   :  { %s7251_s19 = sld [smem:[%s8133_s0 + %s7152_s15]]   ;;  %s7157_s15 = smov 15  }
  0x11   :  { %s7256_s24 = sld [smem:[%s8133_s0 + %s7153_s20]]  }
  0x12   :  { %s7261_s30 = sld [smem:[%s8133_s0 + %s7154_s26]]  }
  0x13   :  { %8187 = sst [smem:[#allocation10_spill]] %s7236_s3 }
  0x14   :  { %8188 = sst [smem:[#allocation11_spill]] %s7241_s8 }
  0x15   :  { %s7266_s6 = sld [smem:[%s8133_s0 + %s7155_s1]]  }
  0x16   :  { %s7271_s12 = sld [smem:[%s8133_s0 + %s7156_s7]]   ;;  %s7160_s7 = smov 18  }
  0x17   :  { %s7276_s20 = sld [smem:[%s8133_s0 + %s7157_s15]]   ;;  %s7161_s15 = smov 19  }
  0x18   :  { %s7281_s27 = sld [smem:[%s8133_s0 + %s7158_s22]]   ;;  %s7162_s22 = smov 20  }
  0x19   :  { %s7286_s4 = sld [smem:[%s8133_s0 + %s7159_s28]]   ;;  %s7163_s28 = smov 21  }
  0x1a   :  { %s7291_s17 = sld [smem:[%s8133_s0 + %s7160_s7]]   ;;  %s7164_s7 = smov 22  }
  0x1b   :  { %8189 = sst [smem:[#allocation12_spill]] %s7266_s6 }
  0x1d   :  { %8190 = sst [smem:[#allocation13_spill]] %s7276_s20 }
  0x1e   :  { %8191 = sst [smem:[#allocation14_spill]] %s7281_s27 }
  0x1f   :  { %8192 = sst [smem:[#allocation15_spill]] %s7286_s4 }
  0x20   :  { %8193 = sst [smem:[#allocation16_spill]] %s7291_s17 }
  0x21   :  { %s7296_s20 = sld [smem:[%s8133_s0 + %s7161_s15]]   ;;  %s7165_s15 = smov 23  }
  0x22   :  { %s7301_s27 = sld [smem:[%s8133_s0 + %s7162_s22]]   ;;  %s7166_s22 = smov 24  }
  0x23   :  { %s7306_s4 = sld [smem:[%s8133_s0 + %s7163_s28]]   ;;  %s7167_s28 = smov 25  }
  0x24   :  { %s7311_s17 = sld [smem:[%s8133_s0 + %s7164_s7]]   ;;  %s7168_s7 = smov 26  }
  0x27   :  { %8194 = sst [smem:[#allocation17_spill]] %s7296_s20 }
  0x28   :  { %8195 = sst [smem:[#allocation18_spill]] %s7301_s27 }
  0x29   :  { %8196 = sst [smem:[#allocation19_spill]] %s7306_s4 }
  0x2a   :  { %8197 = sst [smem:[#allocation20_spill]] %s7311_s17 }
  0x2b   :  { %s7316_s20 = sld [smem:[%s8133_s0 + %s7165_s15]]   ;;  %s7169_s15 = smov 27  }
  0x2c   :  { %s7321_s27 = sld [smem:[%s8133_s0 + %s7166_s22]]   ;;  %s7170_s22 = smov 28  }
  0x2d   :  { %s7326_s4 = sld [smem:[%s8133_s0 + %s7167_s28]]   ;;  %s7171_s28 = smov 29  }
  0x2e   :  { %s7331_s17 = sld [smem:[%s8133_s0 + %s7168_s7]]   ;;  %s7172_s7 = smov 30  }
  0x31   :  { %8198 = sst [smem:[#allocation21_spill]] %s7316_s20 }
  0x32   :  { %8199 = sst [smem:[#allocation22_spill]] %s7321_s27 }
  0x33   :  { %8200 = sst [smem:[#allocation23_spill]] %s7326_s4 }
  0x34   :  { %8201 = sst [smem:[#allocation24_spill]] %s7331_s17 }
  0x35   :  { %s7336_s20 = sld [smem:[%s8133_s0 + %s7169_s15]]  }
  0x36   :  { %s7341_s27 = sld [smem:[%s8133_s0 + %s7170_s22]]  }
  0x37   :  { %s7346_s4 = sld [smem:[%s8133_s0 + %s7171_s28]]  }
  0x38   :  { %s7351_s17 = sld [smem:[%s8133_s0 + %s7172_s7]]  }
  0x3e   :  { %8202 = sst [smem:[#allocation25_spill]] %s7351_s17 }
  0x3f   :  { %66 = vsyncpa [#allocation3], 0 }
  0x40   :  { %68 = vsyncpa [#allocation3 + $0x1], 0  ;;  %s7353_s15 = smov 0   ;;  %s7355_s16 = smov 0  }
  0x41   :  { %s7357_s18 = smov 0   ;;  %s7359_s22 = smov 0  }
  0x42 LB: > { %s8203_s8 = sld [smem:[#allocation11_spill]]  ;;  %s8204_s6 = sld [smem:[#allocation12_spill]]  ;;  %s7129_s15 = sphi %s7353_s15, %s8260_s15   ;;  %s7141_s22 = sphi %s7359_s22, %s8257_s22   ;;  %s7137_s18 = sphi %s7357_s18, %s8259_s18   ;;  %s7133_s16 = sphi %s7355_s16, %s8261_s16  }
  0x43   : > { %s8205_s3 = sld [smem:[#allocation10_spill]]  ;;  %s8206_s25 = sld [smem:[#allocation9_spill]] }
  0x44   : > { %s8207_s21 = sld [smem:[#allocation8_spill]]  ;;  %8208 = sst [smem:[#allocation26_spill]] %s7129_s15 }
  0x45   : > { %8209 = sst [smem:[#allocation27_spill]] %s7137_s18  ;;  %s7374_s0 = sadd.s32 4294967295, %s7141_s22  }
  0x46   : > { %8210 = sst [smem:[#allocation28_spill]] %s7141_s22  ;;  %s5733_s23 = sadd.s32 4294967294, %s7141_s22  }
  0x47   : > { %s7378_s26 = sadd.s32 1, %s7141_s22   ;;  %s731_s28 = sadd.s32 1, %s7137_s18 }
  0x48   : > { %8211 = sst [smem:[#allocation29_spill]] %s7378_s26  ;;  %s728_s1 = ssub.s32 %s7141_s22, %s7378_s26 }
  0x49   : > { %p741_p0 = scmp.ne.s32.totalorder %s7137_s18, %s7133_s16  ;;  %p729_p1 = scmp.eq.s32.totalorder %s728_s1, 0 }
  0x4a   : > { %p742_p2 = scmp.eq.s32.totalorder %s7374_s0, 1  ;;  %p747_p3 = scmp.ne.s32.totalorder %s7133_s16, %s7129_s15 }
  0x4b   : > { %p748_p4 = scmp.eq.s32.totalorder %s5733_s23, 1  ;;  %p5736_p7 = scmp.ge.s32.totalorder %s7141_s22, 1 }
  0x4c   : > { %s7389_s2 = scalar_select %p729_p1, %s7137_s18, %s731_s28  }
  0x4d   : > { %p7391_p5 = por %p742_p2, %p741_p0  ;;  %p7395_p6 = por %p748_p4, %p747_p3 }
  0x4e   : > { %8212 = sst [smem:[#allocation30_spill]] %s7389_s2  ;;  %p871_p8 = scmp.lt.s32.totalorder %s7141_s22, 3 }
  0x4f   : > { %s8213_s7 = scalar_select %p7391_p5, 1, 0 }
  0x50   : > { %s8215_s10 = scalar_select %p7395_p6, 1, 0 }
  0x51   : > { %8214 = sst [smem:[#allocation31_spill]] %s8213_s7  ;;  %p872_p9 = pnand %p5736_p7, %p871_p8 }
  0x52   : > { %8216 = sst [smem:[#allocation32_spill]] %s8215_s10  ;;  %s8217_s5 = sld [smem:[#allocation5_spill]] (!%p872_p9)  ;;  %v992_v0 = vld [vmem:[%s8207_s21] sm:$0xff] (!%p872_p9)  ;;  %v993_v1 = vld [vmem:[%s8207_s21 + $0x8] sm:$0xff] (!%p872_p9)  ;;  %v994_v2 = vld [vmem:[%s8207_s21 + $0x10] sm:$0xff] (!%p872_p9)  ;;  %vm1003_vm0 = vcmask (!%p872_p9), 261120  }
  0x53   : > { %875 = sbr.rel (%p872_p9) target bundleno = 10360 (0x2878), region = 140  ;;  %p959_p10 = scmp.lt.s32.totalorder (!%p872_p9), %s7374_s0, 1  ;;  %v6498_v3 = vpack.c.bf16 (!%p872_p9), %v993_v1, %v992_v0  ;;  %v995_v4 = vld [vmem:[%s8207_s21 + $0x18] sm:$0xff] (!%p872_p9)  ;;  %v5742_v8 = vld [vmem:[%s8206_s25] ss:$0 sm:$0xff] (!%p872_p9)  ;;  %vm1096_vm1 = vcmask (!%p872_p9), 64512  }
  0x54   : > { %v6502_v5 = vpack.c.bf16 (!%p872_p9), %v995_v4, %v994_v2  ;;  %s8142_s1 = smov (!%p872_p9), 120   ;;  %vm7442_vm2 = vmpackc.low (!%p872_p9), %vm1096_vm1, %vm1096_vm1  ;;  %vm1217_vm3 = vcmask (!%p872_p9), 1041408   ;;  %s8220_s13 = sld [smem:[#allocation6_spill]] (!%p872_p9)  ;;  %vm7177_vm4 = vmmov (!%p872_p9), 1   ;;  %vm1198_vm6 = vcmask (!%p872_p9), 74752  }
  0x55   : > { %6499 = vmatprep.subr.bf16.mxu1 (!%p872_p9), %v6498_v3  ;;  %vm7450_vm5 = vmpackc.low (!%p872_p9), %vm1217_vm3, %vm7177_vm4  ;;  %vm1194_vm7 = vcmask (!%p872_p9), 80896   ;;  %vm1912_vm8 = vcmask (!%p872_p9), 130048   ;;  %vm1915_vm9 = vcmask (!%p872_p9), 195584   ;;  %vm2012_vm10 = vcmask (!%p872_p9), 254976   ;;  %s8229_s2 = smov (!%p872_p9), 72   ;;  %s8230_s18 = smov (!%p872_p9), 56  }
  0x56   : > { %6501 = vmatpush3.bf16.msra.mxu1 (!%p872_p9), %v6498_v3  ;;  %vm2158_vm11 = vcmask (!%p872_p9), 523264   ;;  %s8231_s26 = smov (!%p872_p9), 104   ;;  %s8232_s10 = smov (!%p872_p9), 48   ;;  %vm7189_vm12 = vmmov (!%p872_p9), 0  }
  0x57   : > { %6503 = vmatprep.subr.bf16.mxu1 (!%p872_p9), %v6502_v5  ;;  %s8233_s15 = smov (!%p872_p9), 8   ;;  %s8234_s22 = smov (!%p872_p9), 40  }
  0x58   : > { %s8235_s7 = smov (!%p872_p9), 16   ;;  %s8236_s17 = smov (!%p872_p9), 24  }
  0x5a   : > { %s7407_s11 = scalar_select %p959_p10, %s7374_s0, 1  ;;  %6505 = vmatpush3.bf16.msra.mxu1 %v6502_v5 }
  0x5c   : > { %s5900_s23 = sshll.u32 %s7407_s11, 4 }
  0x5d   : > { %s963_s28 = scalar_lea.vmem %s8217_s5, %s5900_s23  ;;  %s8144_s23 = smov 96  }
  0x5e   : > { %v7411_v6 = vld [vmem:[%s963_s28] sm:$0xff]  ;;  %v7415_v7 = vld [vmem:[%s963_s28 + $0x8] sm:$0x3]  ;;  %s8146_s28 = smov 88   ;;  %s8140_s5 = smov 64  }
  0x5f   : > { %6109 = vmatprep.mubr.msk.f32.mxu1 %vm1003_vm0, %v7411_v6 }
  0x60   : > { %6110 = vmatmul.mubr.msk.f32.vlgmr.msra.gmra.mrb[0].mxu1 %vm1003_vm0, %v7415_v7 }
 0x133   : > { %v6111_v9 = vpop.f32.mrb[0].mxu1 }
 0x134   : > { %v7420_v10 = vadd.f32 %v6111_v9, %v5742_v8  ;;  %v1076_v11 = vpop.f32.mrb[1].mxu1 }
 0x135   : > { %v7422_v12 = vadd.f32 %v5742_v8, %v1076_v11 }
 0x137   : > { %1295 = vrot.lane.b32.xlu1 %v7422_v12, %s8142_s1  ;;  %6116 = vmatprep.mubr.msk.f32.mxu1 %vm1096_vm1, %v7422_v12  ;;  %v7430_v13 = vpack.i.bf16 %v7420_v10, %v7422_v12 }
 0x139   : > { %6845 = vrot.lane.b32.xlu0 %v7430_v13, %s8144_s23  ;;  %s8156_s23 = smov 112  }
 0x13b   : > { %1297 = vrot.lane.b32.xlu1 %v7420_v10, %s8142_s1  ;;  %s8166_s1 = smov 80  }
 0x13d   : > { %6850 = vrot.lane.b32.xlu0 %v7430_v13, %s8146_s28  ;;  %s8150_s28 = smov 72  }
 0x13f   : > { %6855 = vrot.lane.b32.xlu1 %v7430_v13, %s8140_s5  ;;  %s7468_s5 = scalar_lea.vmem %s8220_s13, %s7407_s11  ;;  %s8148_s13 = smov 56  }
 0x140   : > { %v7471_v30 = vld [vmem:[%s7468_s5] ss:$0 sm:$0xff] }
 0x1a9   : > { %v1296_v14 = vpop.permute.xlu1 %1295 }
 0x1ab   : > { %v6846_v15 = vpop.permute.xlu0 %6845 }
 0x1ac   : > { %v6848_v16 = vunpack.i.h.bf16 %v6846_v15  ;;  %v6847_v17 = vunpack.i.l.bf16 %v6846_v15 }
 0x1ad   : > { %v1298_v18 = vpop.permute.xlu1 %1297 }
 0x1ae   : > { %v6506_v20 = vpack.c.bf16 %v6848_v16, %v6847_v17 }
 0x1af   : > { %v6851_v21 = vpop.permute.xlu0 %6850 }
 0x1b0   : > { %v6853_v22 = vunpack.i.h.bf16 %v6851_v21  ;;  %v6852_v23 = vunpack.i.l.bf16 %v6851_v21  ;;  %6508 = vmatprep.subr.msk.bf16.mxu1 %vm7442_vm2, %v6506_v20 }
 0x1b1   : > { %v6856_v24 = vpop.permute.xlu1 %6855  ;;  %6511 = vmatpush3.bf16.xpose.msk.msra.mxu1 %vm7442_vm2, %v6506_v20 }
 0x1b2   : > { %v6518_v25 = vpack.c.bf16 %v6853_v22, %v6852_v23  ;;  %v6858_v26 = vunpack.i.h.bf16 %v6856_v24  ;;  %v6857_v27 = vunpack.i.l.bf16 %v6856_v24 }
 0x1b4   : > { %6520 = vmatprep.subr.msk.bf16.mxu1 %vm7442_vm2, %v6518_v25  ;;  %v6512_v29 = vpack.c.bf16 %v6858_v26, %v6857_v27 }
 0x1b6   : > { %6514 = vmatprep.subr.msk.bf16.mxu0 %vm7450_vm5, %v6512_v29 }
 0x1b7   : > { %6517 = vmatpush3.bf16.msk.msra.mxu0 %vm7450_vm5, %v6512_v29 }
 0x1b8   : > { %6117 = vmatmul.mubr.msk.f32.vlgmr.msra.gmra.mrb[2].mxu1 %vm1096_vm1, %v7420_v10 }
 0x1b9   : > { %6523 = vmatpush3.bf16.xpose.msk.msra.mxu1 %vm7442_vm2, %v6518_v25  ;;  %6130 = vmatprep.mubr.msk.f32.mxu1 %vm1096_vm1, %v1296_v14 }
 0x1c0   : > { %6131 = vmatmul.mubr.msk.f32.vlgmr.msra.gmra.mrb[4].mxu1 %vm1096_vm1, %v1298_v18 }
 0x28b   : > { %v6118_v31 = vpop.f32.mrb[2].mxu1 }
 0x28c   : > { %v1181_v32 = vmul.f32 0.17677669, %v6118_v31  ;;  %v1171_v33 = vpop.f32.mrb[3].mxu1 }
 0x28d   : > { %v1180_v34 = vmul.f32 0.17677669, %v1171_v33 }
 0x28e   : > { %v1189_v35 = vadd.f32 %v7471_v30, %v1181_v32 }
 0x28f   : > { %v1188_v36 = vadd.f32 %v7471_v30, %v1180_v34 }
 0x290   : > { %v1192_v37 = vmul.f32 1.442695, %v1189_v35 }
 0x291   : > { %v1190_v38 = vmul.f32 1.442695, %v1188_v36 }
 0x292   : > { %6959 = vpow2.f32 %v1192_v37 }
 0x293   : > { %6961 = vpow2.f32 %v1190_v38  ;;  %v6132_v39 = vpop.f32.mrb[4].mxu1 }
 0x294   : > { %v1387_v40 = vmul.f32 0.17677669, %v6132_v39  ;;  %v1377_v41 = vpop.f32.mrb[5].mxu1 }
 0x295   : > { %v1386_v42 = vmul.f32 0.17677669, %v1377_v41 }
 0x296   : > { %v1389_v43 = vadd.f32 %v7471_v30, %v1387_v40 }
 0x297   : > { %v1388_v44 = vadd.f32 %v7471_v30, %v1386_v42 }
 0x298   : > { %v1392_v45 = vmul.f32 1.442695, %v1389_v43 }
 0x299   : > { %v1390_v46 = vmul.f32 1.442695, %v1388_v44 }
 0x29a   : > { %6963 = vpow2.f32 %v1392_v45 }
 0x29b   : > { %6965 = vpow2.f32 %v1390_v46 }
 0x29c   : > { %v6960_v47 = vpop.eup %6959 }
 0x29d   : > { %v6962_v48 = vpop.eup %6961  ;;  %v1199_v49 = vsel %vm1198_vm6, %v6960_v47, 0.0 }
 0x29e   : > { %1200 = vadd.xlane.f32.xlu1 %v1199_v49  ;;  %v1195_v50 = vsel %vm1194_vm7, %v6962_v48, 0.0 }
 0x29f   : > { %1196 = vadd.xlane.f32.xlu0 %v1195_v50 }
 0x2a4   : > { %v6964_v51 = vpop.eup %6963 }
 0x2a5   : > { %v1397_v52 = vsel %vm1198_vm6, %v6964_v51, 0.0  ;;  %v6966_v53 = vpop.eup %6965 }
 0x2a6   : > { %1398 = vadd.xlane.f32.xlu0 %v1397_v52  ;;  %v1394_v54 = vsel %vm1194_vm7, %v6966_v53, 0.0 }
 0x2aa   : > { %1395 = vadd.xlane.f32.xlu0 %v1394_v54 }
 0x2af   : > { %6865 = vrot.lane.b32.xlu1 %v7430_v13, %s8166_s1  ;;  %s8226_s1 = smov 64  }
 0x2b3   : > { %1492 = vrot.lane.b32.xlu1 %v7422_v12, %s8156_s23 }
 0x2b7   : > { %6875 = vrot.lane.b32.xlu1 %v7430_v13, %s8150_s28  ;;  %s8152_s28 = smov 48  }
 0x2c0   : > { %6860 = vrot.lane.b32.xlu0 %v7430_v13, %s8148_s13  ;;  %s8154_s13 = smov 104  }
 0x2c4   : > { %1494 = vrot.lane.b32.xlu0 %v7420_v10, %s8156_s23  ;;  %s8158_s23 = smov 16  }
 0x32b   : > { %v1201_v55 = vpop.xlane.xlu1 %1200 }
 0x32c   : > { %6967 = vrcp.f32 %v1201_v55  ;;  %v1197_v56 = vpop.xlane.xlu0 %1196 }
 0x32d   : > { %6969 = vrcp.f32 %v1197_v56 }
 0x32f   : > { %v6866_v62 = vpop.permute.xlu1 %6865 }
 0x330   : > { %v6868_v1 = vunpack.i.h.bf16 %v6866_v62  ;;  %v6867_v2 = vunpack.i.l.bf16 %v6866_v62 }
 0x332   : > { %v6530_v8 = vpack.c.bf16 %v6868_v1, %v6867_v2 }
 0x333   : > { %v1399_v57 = vpop.xlane.xlu0 %1398  ;;  %v1493_v16 = vpop.permute.xlu1 %1492 }
 0x334   : > { %6971 = vrcp.f32 %v1399_v57 }
 0x336   : > { %v6968_v58 = vpop.eup %6967 }
 0x337   : > { %v6970_v59 = vpop.eup %6969  ;;  %v1396_v60 = vpop.xlane.xlu0 %1395  ;;  %v1205_v63 = vmul.f32 %v6968_v58, %v6960_v47 }
 0x338   : > { %6973 = vrcp.f32 %v1396_v60  ;;  %v1204_v61 = vmul.f32 %v6970_v59, %v6962_v48  ;;  %v6876_v37 = vpop.permute.xlu1 %6875 }
 0x339   : > { %v6878_v41 = vunpack.i.h.bf16 %v6876_v37  ;;  %v6877_v42 = vunpack.i.l.bf16 %v6876_v37 }
 0x33a   : > { %6123 = vmatprep.mubr.msk.f32.mxu0 %vm1194_vm7, %v1204_v61 }
 0x33b   : > { %6124 = vmatmul.mubr.msk.f32.vlgmr.msra.gmra.mrb[0].mxu0 %vm1194_vm7, %v1205_v63  ;;  %v6861_v0 = vpop.permute.xlu0 %6860  ;;  %v6542_v46 = vpack.c.bf16 %v6878_v41, %v6877_v42 }
 0x33c   : > { %v6863_v3 = vunpack.i.h.bf16 %v6861_v0  ;;  %v6862_v4 = vunpack.i.l.bf16 %v6861_v0 }
 0x33e   : > { %v6524_v5 = vpack.c.bf16 %v6863_v3, %v6862_v4  ;;  %v6972_v9 = vpop.eup %6971 }
 0x33f   : > { %v1403_v15 = vmul.f32 %v6972_v9, %v6964_v51  ;;  %v1495_v17 = vpop.permute.xlu0 %1494 }
 0x340   : > { %6526 = vmatprep.subr.msk.bf16.mxu0 %vm7450_vm5, %v6524_v5 }
 0x341   : > { %6529 = vmatpush3.bf16.msk.msra.mxu0 %vm7450_vm5, %v6524_v5 }
 0x342   : > { %v6974_v11 = vpop.eup %6973  ;;  %6532 = vmatprep.subr.msk.bf16.mxu0 %vm7442_vm2, %v6530_v8 }
 0x343   : > { %v1402_v14 = vmul.f32 %v6974_v11, %v6966_v53 }
 0x345   : > { %6137 = vmatprep.mubr.msk.f32.mxu0 %vm1194_vm7, %v1402_v14 }
 0x346   : > { %6138 = vmatmul.mubr.msk.f32.vlgmr.msra.gmra.mrb[2].mxu0 %vm1194_vm7, %v1403_v15  ;;  %v1085_v15 = vld [vmem:[%s7231_s29] sm:$0xff] }
 0x347   : > { %6144 = vmatprep.mubr.msk.f32.mxu0 %vm1096_vm1, %v1493_v16  ;;  %v1086_v16 = vld [vmem:[%s7231_s29 + $0x8] sm:$0xff] }
 0x34a   : > { %6535 = vmatpush3.bf16.xpose.msk.msra.mxu0 %vm7442_vm2, %v6530_v8 }
 0x351   : > { %6145 = vmatmul.mubr.msk.f32.vlgmr.msra.gmra.mrb[4].mxu0 %vm1096_vm1, %v1495_v17  ;;  %v1087_v17 = vld [vmem:[%s7231_s29 + $0x10] sm:$0xff] }
 0x40e   : > { %v7505_v18 = vpop.f32.mrb[0].mxu0 }
 0x40f   : > { %v7507_v20 = vpop.f32.mrb[1].mxu0 }
 0x419   : > { %v7509_v21 = vpop.f32.mrb[2].mxu0 }
 0x41a   : > { %v7511_v22 = vpop.f32.mrb[3].mxu0 }
 0x424   : > { %v6146_v23 = vpop.f32.mrb[4].mxu0 }
 0x425   : > { %v1584_v24 = vmul.f32 0.17677669, %v6146_v23  ;;  %v1574_v25 = vpop.f32.mrb[5].mxu0 }
 0x426   : > { %v1583_v26 = vmul.f32 0.17677669, %v1574_v25 }
 0x427   : > { %v1586_v27 = vadd.f32 %v7471_v30, %v1584_v24 }
 0x428   : > { %v1585_v29 = vadd.f32 %v7471_v30, %v1583_v26 }
 0x429   : > { %v1589_v31 = vmul.f32 1.442695, %v1586_v27 }
 0x42a   : > { %v1587_v32 = vmul.f32 1.442695, %v1585_v29 }
 0x42b   : > { %6975 = vpow2.f32 %v1589_v31 }
 0x42c   : > { %6977 = vpow2.f32 %v1587_v32 }
 0x435   : > { %v6976_v33 = vpop.eup %6975 }
 0x436   : > { %v6978_v34 = vpop.eup %6977  ;;  %v1594_v35 = vsel %vm1198_vm6, %v6976_v33, 0.0 }
 0x437   : > { %1595 = vadd.xlane.f32.xlu0 %v1594_v35  ;;  %v1591_v36 = vsel %vm1194_vm7, %v6978_v34, 0.0 }
 0x438   : > { %1592 = vadd.xlane.f32.xlu1 %v1591_v36 }
 0x449   : > { %1689 = vrot.lane.b32.xlu1 %v7422_v12, %s8154_s13 }
 0x44d   : > { %6870 = vrot.lane.b32.xlu0 %v7430_v13, %s8152_s28  ;;  %s8164_s28 = smov 8  }
 0x451   : > { %1691 = vrot.lane.b32.xlu0 %v7420_v10, %s8154_s13  ;;  %s8162_s13 = smov 40  }
 0x4c4   : > { %v1596_v38 = vpop.xlane.xlu0 %1595 }
 0x4c5   : > { %6979 = vrcp.f32 %v1596_v38  ;;  %v1593_v39 = vpop.xlane.xlu1 %1592 }
 0x4c6   : > { %6981 = vrcp.f32 %v1593_v39 }
 0x4c8   : > { %v6871_v40 = vpop.permute.xlu0 %6870 }
 0x4c9   : > { %v6873_v43 = vunpack.i.h.bf16 %v6871_v40  ;;  %v6872_v44 = vunpack.i.l.bf16 %v6871_v40  ;;  %v1690_v49 = vpop.permute.xlu1 %1689  ;;  %v5774_v40 = vld [vmem:[%s8205_s3] ss:$0 sm:$0xff] }
 0x4cb   : > { %v6536_v45 = vpack.c.bf16 %v6873_v43, %v6872_v44 }
 0x4cc   : > { %v1692_v50 = vpop.permute.xlu0 %1691 }
 0x4cd   : > { %6538 = vmatprep.subr.msk.bf16.mxu1 %vm7450_vm5, %v6536_v45 }
 0x4ce   : > { %6541 = vmatpush3.bf16.msk.msra.mxu1 %vm7450_vm5, %v6536_v45 }
 0x4cf   : > { %v6980_v12 = vpop.eup %6979  ;;  %6544 = vmatprep.subr.msk.bf16.mxu1 %vm7442_vm2, %v6542_v46 }
 0x4d0   : > { %v6982_v10 = vpop.eup %6981  ;;  %v1600_v48 = vmul.f32 %v6980_v12, %v6976_v33 }
 0x4d1   : > { %v1599_v47 = vmul.f32 %v6982_v10, %v6978_v34 }
 0x4d3   : > { %6151 = vmatprep.mubr.msk.f32.mxu1 %vm1194_vm7, %v1599_v47 }
 0x4d4   : > { %6152 = vmatmul.mubr.msk.f32.vlgmr.msra.gmra.mrb[6].mxu1 %vm1194_vm7, %v1600_v48 }
 0x4d5   : > { %6158 = vmatprep.mubr.msk.f32.mxu1 %vm1096_vm1, %v1690_v49 }
 0x4d7   : > { %6547 = vmatpush3.bf16.xpose.msk.msra.mxu1 %vm7442_vm2, %v6542_v46 }
 0x4de   : > { %6159 = vmatmul.mubr.msk.f32.vlgmr.msra.gmra.mrb[8].mxu1 %vm1096_vm1, %v1692_v50 }
 0x5a7   : > { %v6153_v51 = vpop.f32.mrb[6].mxu1 }
 0x5a8   : > { %v1680_v52 = vpop.f32.mrb[7].mxu1 }
 0x5b1   : > { %v6160_v53 = vpop.f32.mrb[8].mxu1 }
 0x5b2   : > { %v1781_v54 = vmul.f32 0.17677669, %v6160_v53  ;;  %v1771_v55 = vpop.f32.mrb[9].mxu1  ;;  %v2049_v53 = vld [vmem:[%s8203_s8] sm:$0xff] }
 0x5b3   : > { %v1780_v56 = vmul.f32 0.17677669, %v1771_v55 }
 0x5b4   : > { %v1783_v57 = vadd.f32 %v7471_v30, %v1781_v54  ;;  %v2050_v54 = vld [vmem:[%s8203_s8 + $0x8] sm:$0xff] }
 0x5b5   : > { %v1782_v58 = vadd.f32 %v7471_v30, %v1780_v56  ;;  %v6562_v55 = vpack.c.bf16 %v2050_v54, %v2049_v53  ;;  %v2051_v56 = vld [vmem:[%s8203_s8 + $0x10] sm:$0xff] }
 0x5b6   : > { %v1786_v59 = vmul.f32 1.442695, %v1783_v57  ;;  %v2052_v57 = vld [vmem:[%s8203_s8 + $0x18] sm:$0xff] }
 0x5b7   : > { %v1784_v60 = vmul.f32 1.442695, %v1782_v58  ;;  %6563 = vmatprep.subr.bf16.mxu1 %v6562_v55  ;;  %v6566_v58 = vpack.c.bf16 %v2052_v57, %v2051_v56  ;;  %v5783_v57 = vld [vmem:[%s8207_s21 + $0x20] sm:$0xff] }
 0x5b8   : > { %6983 = vpow2.f32 %v1786_v59  ;;  %6565 = vmatpush3.bf16.msra.mxu1 %v6562_v55  ;;  %v2143_v59 = vld [vmem:[%s7251_s19] sm:$0xff] }
 0x5b9   : > { %6985 = vpow2.f32 %v1784_v60  ;;  %6567 = vmatprep.subr.bf16.mxu1 %v6566_v58  ;;  %v2144_v60 = vld [vmem:[%s7251_s19 + $0x8] sm:$0xff] }
 0x5bc   : > { %6569 = vmatpush3.bf16.msra.mxu1 %v6566_v58  ;;  %v5784_v58 = vld [vmem:[%s8207_s21 + $0x28] sm:$0xff] }
 0x5c2   : > { %v6984_v61 = vpop.eup %6983 }
 0x5c3   : > { %v6986_v62 = vpop.eup %6985  ;;  %v1791_v63 = vsel %vm1198_vm6, %v6984_v61, 0.0 }
 0x5c4   : > { %1792 = vadd.xlane.f32.xlu0 %v1791_v63  ;;  %v1788_v0 = vsel %vm1194_vm7, %v6986_v62, 0.0  ;;  %v2146_v63 = vld [vmem:[%s7251_s19 + $0x18] sm:$0xff] }
 0x5c5   : > { %1789 = vadd.xlane.f32.xlu1 %v1788_v0 }
 0x5d6   : > { %1888 = vrot.lane.b32.xlu1 %v7511_v22, %s8164_s28  ;;  %v1088_v22 = vld [vmem:[%s7231_s29 + $0x18] sm:$0xff] }
 0x5d7   : > { %v6558_v23 = vpack.c.bf16 %v1088_v22, %v1087_v17  ;;  %v7593_v17 = vld [vmem:[%s7261_s30] sm:$0x3] }
 0x5da   : > { %6880 = vrot.lane.b32.xlu0 %v7430_v13, %s8162_s13  ;;  %1890 = vrot.lane.b32.xlu1 %v7509_v21, %s8164_s28  ;;  %v6554_v21 = vpack.c.bf16 %v1086_v16, %v1085_v15  ;;  %s8224_s13 = smov 96   ;;  %s8225_s28 = smov 120  }
 0x5de   : > { %1896 = vrot.lane.b32.xlu0 %v1680_v52, %s8158_s23  ;;  %1898 = vrot.lane.b32.xlu1 %v6153_v51, %s8158_s23  ;;  %s8160_s23 = smov 24  }
 0x651   : > { %v1793_v1 = vpop.xlane.xlu0 %1792 }
 0x652   : > { %6987 = vrcp.f32 %v1793_v1  ;;  %v1790_v2 = vpop.xlane.xlu1 %1789  ;;  %v2147_v1 = vld [vmem:[%s7251_s19 + $0x20] sm:$0xff] }
 0x653   : > { %6989 = vrcp.f32 %v1790_v2  ;;  %v2148_v2 = vld [vmem:[%s7251_s19 + $0x28] sm:$0xff] }
 0x655   : > { %v6881_v3 = vpop.permute.xlu0 %6880 }
 0x656   : > { %v6883_v4 = vunpack.i.h.bf16 %v6881_v3  ;;  %v6882_v5 = vunpack.i.l.bf16 %v6881_v3  ;;  %v1889_v26 = vpop.permute.xlu1 %1888  ;;  %v6578_v3 = vpack.c.bf16 %v2148_v2, %v2147_v1 }
 0x657   : > { %v1910_v32 = vsel %vm1096_vm1, %v7507_v20, %v1889_v26 }
 0x658   : > { %v6548_v13 = vpack.c.bf16 %v6883_v4, %v6882_v5 }
 0x659   : > { %v1897_v31 = vpop.permute.xlu0 %1896 }
 0x65a   : > { %6550 = vmatprep.subr.msk.bf16.mxu0 %vm7450_vm5, %v6548_v13  ;;  %v1891_v27 = vpop.permute.xlu1 %1890  ;;  %v1913_v34 = vsel %vm1912_vm8, %v1910_v32, %v1897_v31 }
 0x65b   : > { %6553 = vmatpush3.bf16.msk.msra.mxu0 %vm7450_vm5, %v6548_v13  ;;  %v1911_v35 = vsel %vm1096_vm1, %v7505_v18, %v1891_v27  ;;  %v979_v13 = vlaneseq }
 0x65c   : > { %v6988_v8 = vpop.eup %6987  ;;  %6555 = vmatprep.subr.bf16.mxu0 %v6554_v21 }
 0x65d   : > { %v6990_v9 = vpop.eup %6989  ;;  %v1797_v14 = vmul.f32 %v6988_v8, %v6984_v61  ;;  %v2145_v61 = vld [vmem:[%s7251_s19 + $0x10] sm:$0xff] }
 0x65e   : > { %v1796_v11 = vmul.f32 %v6990_v9, %v6986_v62  ;;  %v1899_v29 = vpop.permute.xlu1 %1898  ;;  %v6570_v62 = vpack.c.bf16 %v2144_v60, %v2143_v59  ;;  %v6574_v0 = vpack.c.bf16 %v2146_v63, %v2145_v61  ;;  %v6586_v59 = vpack.c.bf16 %v5784_v58, %v5783_v57  ;;  %v5785_v60 = vld [vmem:[%s8207_s21 + $0x30] sm:$0xff]  ;;  %v5786_v61 = vld [vmem:[%s8207_s21 + $0x38] sm:$0xff]  ;;  %s8227_s21 = smov 80  }
 0x65f   : > { %v1914_v37 = vsel %vm1912_vm8, %v1911_v35, %v1899_v29  ;;  %v2150_v35 = vld [vmem:[%s7251_s19 + $0x38] sm:$0xff] }
 0x660   : > { %6165 = vmatprep.mubr.msk.f32.mxu0 %vm1194_vm7, %v1796_v11  ;;  %6587 = vmatprep.subr.bf16.mxu1 %v6586_v59 }
 0x661   : > { %6166 = vmatmul.mubr.msk.f32.vlgmr.msra.gmra.mrb[6].mxu0 %vm1194_vm7, %v1797_v14  ;;  %v7587_v14 = vshrl.u32 %v979_v13, 7 }
 0x662   : > { %6557 = vmatpush3.bf16.msra.mxu0 %v6554_v21  ;;  %v7596_v21 = vld [vmem:[%s8204_s6] sm:$0x3] }
 0x663   : > { %6559 = vmatprep.subr.bf16.mxu0 %v6558_v23  ;;  %v7590_v16 = vsub.s32 0, %v7587_v14 }
 0x665   : > { %v2040_v22 = vrot.slane %v7593_v17, %v7590_v16 }
 0x666   : > { %6561 = vmatpush3.bf16.msra.mxu0 %v6558_v23 }
 0x667   : > { %6571 = vmatprep.subr.bf16.mxu0 %v6570_v62 }
 0x734   : > { %v6167_v24 = vpop.f32.mrb[6].mxu0 }
 0x735   : > { %1906 = vrot.lane.b32.xlu1 %v6167_v24, %s8160_s23  ;;  %v1877_v25 = vpop.f32.mrb[7].mxu0 }
 0x736   : > { %1904 = vrot.lane.b32.xlu0 %v1877_v25, %s8160_s23  ;;  %v2046_v25 = vrot.slane %v7596_v21, %v7590_v16  ;;  %s8223_s23 = smov 88  }
 0x7a7   : > { %v1907_v33 = vpop.permute.xlu1 %1906 }
 0x7a8   : > { %v1905_v36 = vpop.permute.xlu0 %1904  ;;  %v1917_v39 = vsel %vm1915_vm9, %v1914_v37, %v1907_v33  ;;  %v5777_v37 = vld [vmem:[%s7246_s14] ss:$0 sm:$0xff] }
 0x7a9   : > { %v1916_v38 = vsel %vm1915_vm9, %v1913_v34, %v1905_v36  ;;  %v2149_v34 = vld [vmem:[%s7251_s19 + $0x30] sm:$0xff] }
 0x7aa   : > { %6176 = vmatprep.mubr.msk.f32.mxu0 %vm1003_vm0, %v1916_v38  ;;  %v6582_v36 = vpack.c.bf16 %v2150_v35, %v2149_v34 }
 0x7ab   : > { %6177 = vmatmul.mubr.msk.f32.vlgmr.msra.gmra.mrb[8].mxu0 %vm1003_vm0, %v1917_v39 }
 0x7ac   : > { %6573 = vmatpush3.bf16.msra.mxu0 %v6570_v62  ;;  %v6590_v62 = vpack.c.bf16 %v5786_v61, %v5785_v60 }
 0x7ad   : > { %6575 = vmatprep.subr.bf16.mxu0 %v6574_v0 }
 0x7b0   : > { %6577 = vmatpush3.bf16.msra.mxu0 %v6574_v0 }
 0x7b1   : > { %6579 = vmatprep.subr.bf16.mxu0 %v6578_v3 }
 0x7b4   : > { %6581 = vmatpush3.bf16.msra.mxu0 %v6578_v3 }
 0x7b5   : > { %6583 = vmatprep.subr.bf16.mxu0 %v6582_v36 }
 0x7b8   : > { %6585 = vmatpush3.bf16.msra.mxu0 %v6582_v36 }
 0x87e   : > { %v6178_v41 = vpop.f32.mrb[8].mxu0 }
 0x87f   : > { %v2002_v20 = vadd.f32 %v6178_v41, %v5774_v40  ;;  %v1996_v42 = vpop.f32.mrb[9].mxu0 }
 0x880   : > { %v1997_v43 = vadd.f32 %v5774_v40, %v1996_v42 }
 0x881   : > { %v2008_v44 = vadd.f32 %v2002_v20, %v7415_v7 }
 0x882   : > { %v2007_v18 = vadd.f32 %v1997_v43, %v7411_v6  ;;  %v5780_v43 = vld [vmem:[%s7256_s24] ss:$0 sm:$0xff] }
 0x883   : > { %v2013_v45 = vsel %vm2012_vm10, %v2008_v44, 0.0 }
 0x884   : > { %2014 = vadd.xlane.f32.xlu1 %v2013_v45  ;;  %v2009_v46 = vsel %vm1003_vm0, %v2007_v18, 0.0 }
 0x885   : > { %2010 = vadd.xlane.f32.xlu0 %v2009_v46 }
 0x911   : > { %v2015_v12 = vpop.xlane.xlu1 %2014 }
 0x912   : > { %v2018_v10 = vmul.f32 0.03125, %v2015_v12  ;;  %v2011_v47 = vpop.xlane.xlu0 %2010 }
 0x913   : > { %v2017_v48 = vmul.f32 0.03125, %v2011_v47 }
 0x914   : > { %v2020_v49 = vsub.f32 %v2008_v44, %v2018_v10 }
 0x915   : > { %v2019_v50 = vsub.f32 %v2007_v18, %v2017_v48 }
 0x916   : > { %v2022_v7 = vmul.f32 %v2020_v49, %v2020_v49 }
 0x917   : > { %v2021_v51 = vmul.f32 %v2019_v50, %v2019_v50 }
 0x918   : > { %v2026_v52 = vsel %vm2012_vm10, %v2022_v7, 0.0 }
 0x919   : > { %v2023_v6 = vsel %vm1003_vm0, %v2021_v51, 0.0 }
 0x91a   : > { %2024 = vadd.xlane.f32.xlu0 %v2023_v6 }
 0x91e   : > { %2027 = vadd.xlane.f32.xlu0 %v2026_v52 }
 0x9a7   : > { %v2025_v4 = vpop.xlane.xlu0 %2024 }
 0x9a8   : > { %v2029_v5 = vmul.f32 0.03125, %v2025_v4 }
 0x9aa   : > { %v2031_v8 = vadd.f32 1e-05, %v2029_v5  ;;  %v7619_v5 = vsub.s32 1, %v7587_v14 }
 0x9ab   : > { %v2028_v9 = vpop.xlane.xlu0 %2027 }
 0x9ac   : > { %6991 = vrsqrt.f32 %v2031_v8  ;;  %v2030_v11 = vmul.f32 0.03125, %v2028_v9  ;;  %v2271_v8 = vrot.slane %v7593_v17, %v7619_v5  ;;  %v5788_v17 = vld [vmem:[%s8206_s25 + $0x1] ss:$0 sm:$0xff]  ;;  %s8228_s25 = smov 112  }
 0x9ae   : > { %v2032_v15 = vadd.f32 1e-05, %v2030_v11 }
 0x9b0   : > { %6993 = vrsqrt.f32 %v2032_v15 }
 0x9b6   : > { %v6992_v23 = vpop.eup %6991 }
 0x9b7   : > { %v2035_v24 = vmul.f32 %v6992_v23, %v2019_v50  ;;  %v2277_v23 = vrot.slane %v7596_v21, %v7619_v5 }
 0x9b9   : > { %v2041_v26 = vmul.f32 %v2040_v22, %v2035_v24 }
 0x9ba   : > { %v6994_v27 = vpop.eup %6993 }
 0x9bb   : > { %v2036_v29 = vmul.f32 %v6994_v27, %v2020_v49  ;;  %v2047_v31 = vadd.f32 %v2046_v25, %v2041_v26 }
 0x9bd   : > { %v2042_v32 = vmul.f32 %v2040_v22, %v2036_v29  ;;  %6187 = vmatprep.mubr.msk.f32.mxu1 %vm1003_vm0, %v2047_v31 }
 0x9bf   : > { %v2048_v33 = vadd.f32 %v2046_v25, %v2042_v32 }
 0x9c1   : > { %6188 = vmatmul.mubr.msk.f32.vlgmr.msra.gmra.mrb[10].mxu1 %vm1003_vm0, %v2048_v33 }
 0x9c2   : > { %6589 = vmatpush3.bf16.msra.mxu1 %v6586_v59 }
 0x9c3   : > { %6591 = vmatprep.subr.bf16.mxu1 %v6590_v62 }
 0x9c6   : > { %6593 = vmatpush3.bf16.msra.mxu1 %v6590_v62 }
 0xa94   : > { %v6189_v38 = vpop.f32.mrb[10].mxu1 }
 0xa95   : > { %v2138_v39 = vadd.f32 %v6189_v38, %v5777_v37  ;;  %v2132_v40 = vpop.f32.mrb[11].mxu1 }
 0xa96   : > { %v2133_v41 = vadd.f32 %v5777_v37, %v2132_v40 }
 0xa97   : > { %v2142_v42 = vmax.f32 %v2138_v39, 0.0 }
 0xa98   : > { %v2141_v20 = vmax.f32 %v2133_v41, 0.0 }
 0xa9a   : > { %6206 = vmatprep.mubr.msk.f32.mxu0 %vm2158_vm11, %v2141_v20 }
 0xa9b   : > { %6207 = vmatmul.mubr.msk.f32.vlgmr.msra.gmra.mrb[10].mxu0 %vm2158_vm11, %v2142_v42 }
 0xb6e   : > { %v6208_v44 = vpop.f32.mrb[10].mxu0 }
 0xb6f   : > { %v2237_v18 = vadd.f32 %v6208_v44, %v5780_v43  ;;  %v2231_v45 = vpop.f32.mrb[11].mxu0 }
 0xb70   : > { %v2232_v46 = vadd.f32 %v5780_v43, %v2231_v45 }
 0xb71   : > { %v2241_v12 = vadd.f32 %v2237_v18, %v2048_v33 }
 0xb72   : > { %v2240_v10 = vadd.f32 %v2232_v46, %v2047_v31 }
 0xb73   : > { %v2245_v47 = vsel %vm2012_vm10, %v2241_v12, 0.0 }
 0xb74   : > { %2246 = vadd.xlane.f32.xlu0 %v2245_v47  ;;  %v2242_v48 = vsel %vm1003_vm0, %v2240_v10, 0.0 }
 0xb75   : > { %2243 = vadd.xlane.f32.xlu1 %v2242_v48 }
 0xc01   : > { %v2247_v49 = vpop.xlane.xlu0 %2246 }
 0xc02   : > { %v2249_v50 = vmul.f32 0.03125, %v2247_v49  ;;  %v2244_v51 = vpop.xlane.xlu1 %2243 }
 0xc03   : > { %v2248_v6 = vmul.f32 0.03125, %v2244_v51 }
 0xc04   : > { %v2251_v7 = vsub.f32 %v2241_v12, %v2249_v50 }
 0xc05   : > { %v2250_v52 = vsub.f32 %v2240_v10, %v2248_v6 }
 0xc06   : > { %v2253_v53 = vmul.f32 %v2251_v7, %v2251_v7 }
 0xc07   : > { %v2252_v54 = vmul.f32 %v2250_v52, %v2250_v52 }
 0xc08   : > { %v2257_v55 = vsel %vm2012_vm10, %v2253_v53, 0.0 }
 0xc09   : > { %2258 = vadd.xlane.f32.xlu0 %v2257_v55  ;;  %v2254_v56 = vsel %vm1003_vm0, %v2252_v54, 0.0 }
 0xc0a   : > { %2255 = vadd.xlane.f32.xlu1 %v2254_v56 }
 0xc96   : > { %v2259_v63 = vpop.xlane.xlu0 %2258 }
 0xc97   : > { %v2261_v0 = vmul.f32 0.03125, %v2259_v63  ;;  %v2256_v1 = vpop.xlane.xlu1 %2255 }
 0xc98   : > { %v2260_v2 = vmul.f32 0.03125, %v2256_v1 }
 0xc99   : > { %v2263_v3 = vadd.f32 1e-05, %v2261_v0 }
 0xc9a   : > { %v2262_v4 = vadd.f32 1e-05, %v2260_v2 }
 0xc9b   : > { %6995 = vrsqrt.f32 %v2263_v3 }
 0xc9c   : > { %6997 = vrsqrt.f32 %v2262_v4 }
 0xca5   : > { %v6996_v9 = vpop.eup %6995 }
 0xca6   : > { %v6998_v11 = vpop.eup %6997  ;;  %v2267_v15 = vmul.f32 %v6996_v9, %v2251_v7 }
 0xca7   : > { %v2266_v22 = vmul.f32 %v6998_v11, %v2250_v52 }
 0xca8   : > { %v2273_v24 = vmul.f32 %v2271_v8, %v2267_v15 }
 0xca9   : > { %v2272_v25 = vmul.f32 %v2271_v8, %v2266_v22 }
 0xcaa   : > { %v7627_v27 = vadd.f32 %v2277_v23, %v2273_v24 }
 0xcab   : > { %v7625_v26 = vadd.f32 %v2277_v23, %v2272_v25 }
 0xcad   : > { %6217 = vmatprep.mubr.msk.f32.mxu1 %vm1003_vm0, %v7625_v26 }
 0xcae   : > { %6218 = vmatmul.mubr.msk.f32.vlgmr.msra.gmra.mrb[12].mxu1 %vm1003_vm0, %v7627_v27 }
 0xd81   : > { %v6219_v29 = vpop.f32.mrb[12].mxu1 }
 0xd82   : > { %v7634_v31 = vadd.f32 %v6219_v29, %v5788_v17  ;;  %v2365_v32 = vpop.f32.mrb[13].mxu1 }
 0xd83   : > { %v7636_v33 = vadd.f32 %v5788_v17, %v2365_v32 }
 0xd85   : > { %6224 = vmatprep.mubr.msk.f32.mxu1 %vm1096_vm1, %v7636_v33  ;;  %v7642_v21 = vpack.i.bf16 %v7634_v31, %v7636_v33 }
 0xd87   : > { %6890 = vrot.lane.b32.xlu0 %v7642_v21, %s8223_s23  ;;  %6885 = vrot.lane.b32.xlu1 %v7642_v21, %s8224_s13 }
 0xd8b   : > { %2576 = vrot.lane.b32.xlu1 %v7636_v33, %s8225_s28 }
 0xd8f   : > { %2578 = vrot.lane.b32.xlu1 %v7634_v31, %s8225_s28 }
 0xd93   : > { %6895 = vrot.lane.b32.xlu1 %v7642_v21, %s8226_s1 }
 0xdf9   : > { %v6891_v34 = vpop.permute.xlu0 %6890  ;;  %v6886_v35 = vpop.permute.xlu1 %6885 }
 0xdfa   : > { %v6893_v36 = vunpack.i.h.bf16 %v6891_v34  ;;  %v6892_v37 = vunpack.i.l.bf16 %v6891_v34  ;;  %v6888_v38 = vunpack.i.h.bf16 %v6886_v35  ;;  %v6887_v39 = vunpack.i.l.bf16 %v6886_v35 }
 0xdfc   : > { %v6594_v40 = vpack.c.bf16 %v6888_v38, %v6887_v39  ;;  %v6606_v20 = vpack.c.bf16 %v6893_v36, %v6892_v37 }
 0xdfd   : > { %v2577_v41 = vpop.permute.xlu1 %2576 }
 0xdfe   : > { %6596 = vmatprep.subr.msk.bf16.mxu1 %vm7442_vm2, %v6594_v40 }
 0xdff   : > { %6599 = vmatpush3.bf16.xpose.msk.msra.mxu1 %vm7442_vm2, %v6594_v40 }
 0xe00   : > { %6608 = vmatprep.subr.msk.bf16.mxu1 %vm7442_vm2, %v6606_v20 }
 0xe01   : > { %v2579_v42 = vpop.permute.xlu1 %2578 }
 0xe05   : > { %v6896_v43 = vpop.permute.xlu1 %6895 }
 0xe06   : > { %v6898_v44 = vunpack.i.h.bf16 %v6896_v43  ;;  %v6897_v18 = vunpack.i.l.bf16 %v6896_v43  ;;  %6225 = vmatmul.mubr.msk.f32.vlgmr.msra.gmra.mrb[14].mxu1 %vm1096_vm1, %v7634_v31 }
 0xe07   : > { %6611 = vmatpush3.bf16.xpose.msk.msra.mxu1 %vm7442_vm2, %v6606_v20  ;;  %6238 = vmatprep.mubr.msk.f32.mxu1 %vm1096_vm1, %v2577_v41 }
 0xe08   : > { %v6600_v45 = vpack.c.bf16 %v6898_v44, %v6897_v18 }
 0xe0a   : > { %6602 = vmatprep.subr.msk.bf16.mxu0 %vm7450_vm5, %v6600_v45 }
 0xe0b   : > { %6605 = vmatpush3.bf16.msk.msra.mxu0 %vm7450_vm5, %v6600_v45 }
 0xe0e   : > { %6239 = vmatmul.mubr.msk.f32.vlgmr.msra.gmra.mrb[16].mxu1 %vm1096_vm1, %v2579_v42 }
 0xed9   : > { %v6226_v46 = vpop.f32.mrb[14].mxu1 }
 0xeda   : > { %v2471_v12 = vmul.f32 0.17677669, %v6226_v46  ;;  %v2461_v10 = vpop.f32.mrb[15].mxu1 }
 0xedb   : > { %v2470_v47 = vmul.f32 0.17677669, %v2461_v10 }
 0xedc   : > { %v2473_v48 = vadd.f32 %v7471_v30, %v2471_v12 }
 0xedd   : > { %v2472_v49 = vadd.f32 %v7471_v30, %v2470_v47 }
 0xede   : > { %v2476_v50 = vmul.f32 1.442695, %v2473_v48 }
 0xedf   : > { %v2474_v51 = vmul.f32 1.442695, %v2472_v49 }
 0xee0   : > { %6999 = vpow2.f32 %v2476_v50 }
 0xee1   : > { %7001 = vpow2.f32 %v2474_v51  ;;  %v6240_v6 = vpop.f32.mrb[16].mxu1 }
 0xee2   : > { %v2668_v7 = vmul.f32 0.17677669, %v6240_v6  ;;  %v2658_v52 = vpop.f32.mrb[17].mxu1 }
 0xee3   : > { %v2667_v53 = vmul.f32 0.17677669, %v2658_v52 }
 0xee4   : > { %v2670_v54 = vadd.f32 %v7471_v30, %v2668_v7 }
 0xee5   : > { %v2669_v55 = vadd.f32 %v7471_v30, %v2667_v53 }
 0xee6   : > { %v2673_v56 = vmul.f32 1.442695, %v2670_v54 }
 0xee7   : > { %v2671_v57 = vmul.f32 1.442695, %v2669_v55 }
 0xee8   : > { %7003 = vpow2.f32 %v2673_v56 }
 0xee9   : > { %7005 = vpow2.f32 %v2671_v57 }
 0xeea   : > { %v7000_v58 = vpop.eup %6999 }
 0xeeb   : > { %v7002_v59 = vpop.eup %7001  ;;  %v2481_v60 = vsel %vm1198_vm6, %v7000_v58, 0.0 }
 0xeec   : > { %2482 = vadd.xlane.f32.xlu1 %v2481_v60  ;;  %v2478_v61 = vsel %vm1194_vm7, %v7002_v59, 0.0 }
 0xeed   : > { %2479 = vadd.xlane.f32.xlu0 %v2478_v61 }
 0xef2   : > { %v7004_v62 = vpop.eup %7003 }
 0xef3   : > { %v2678_v63 = vsel %vm1198_vm6, %v7004_v62, 0.0  ;;  %v7006_v0 = vpop.eup %7005 }
 0xef4   : > { %2679 = vadd.xlane.f32.xlu0 %v2678_v63  ;;  %v2675_v1 = vsel %vm1194_vm7, %v7006_v0, 0.0 }
 0xef8   : > { %2676 = vadd.xlane.f32.xlu0 %v2675_v1 }
 0xefd   : > { %6905 = vrot.lane.b32.xlu1 %v7642_v21, %s8227_s21 }
 0xf01   : > { %2773 = vrot.lane.b32.xlu1 %v7636_v33, %s8228_s25 }
 0xf05   : > { %6915 = vrot.lane.b32.xlu1 %v7642_v21, %s8229_s2 }
 0xf0e   : > { %6900 = vrot.lane.b32.xlu0 %v7642_v21, %s8230_s18 }
 0xf12   : > { %2775 = vrot.lane.b32.xlu0 %v7634_v31, %s8228_s25 }
 0xf79   : > { %v2483_v2 = vpop.xlane.xlu1 %2482 }
 0xf7a   : > { %7007 = vrcp.f32 %v2483_v2  ;;  %v2480_v3 = vpop.xlane.xlu0 %2479 }
 0xf7b   : > { %7009 = vrcp.f32 %v2480_v3 }
 0xf7d   : > { %v6906_v23 = vpop.permute.xlu1 %6905 }
 0xf7e   : > { %v6908_v25 = vunpack.i.h.bf16 %v6906_v23  ;;  %v6907_v17 = vunpack.i.l.bf16 %v6906_v23 }
 0xf80   : > { %v6618_v35 = vpack.c.bf16 %v6908_v25, %v6907_v17 }
 0xf81   : > { %v2680_v4 = vpop.xlane.xlu0 %2679  ;;  %v2774_v40 = vpop.permute.xlu1 %2773 }
 0xf82   : > { %7011 = vrcp.f32 %v2680_v4 }
 0xf84   : > { %v7008_v8 = vpop.eup %7007 }
 0xf85   : > { %v7010_v9 = vpop.eup %7009  ;;  %v2677_v11 = vpop.xlane.xlu0 %2676  ;;  %v2487_v22 = vmul.f32 %v7008_v8, %v7000_v58 }
 0xf86   : > { %7013 = vrcp.f32 %v2677_v11  ;;  %v2486_v15 = vmul.f32 %v7010_v9, %v7002_v59  ;;  %v7733_v11 = vld [vmem:[%s7468_s5] ss:$0 sm:$0xff] }
 0xf88   : > { %6231 = vmatprep.mubr.msk.f32.mxu0 %vm1194_vm7, %v2486_v15 }
 0xf89   : > { %6232 = vmatmul.mubr.msk.f32.vlgmr.msra.gmra.mrb[12].mxu0 %vm1194_vm7, %v2487_v22  ;;  %v6901_v24 = vpop.permute.xlu0 %6900 }
 0xf8a   : > { %v6903_v29 = vunpack.i.h.bf16 %v6901_v24  ;;  %v6902_v32 = vunpack.i.l.bf16 %v6901_v24 }
 0xf8c   : > { %v6612_v34 = vpack.c.bf16 %v6903_v29, %v6902_v32  ;;  %v7012_v36 = vpop.eup %7011 }
 0xf8d   : > { %v2684_v39 = vmul.f32 %v7012_v36, %v7004_v62  ;;  %v2776_v41 = vpop.permute.xlu0 %2775 }
 0xf8e   : > { %6614 = vmatprep.subr.msk.bf16.mxu0 %vm7450_vm5, %v6612_v34 }
 0xf8f   : > { %6617 = vmatpush3.bf16.msk.msra.mxu0 %vm7450_vm5, %v6612_v34 }
 0xf90   : > { %v7014_v37 = vpop.eup %7013  ;;  %6620 = vmatprep.subr.msk.bf16.mxu0 %vm7442_vm2, %v6618_v35 }
 0xf91   : > { %v2683_v38 = vmul.f32 %v7014_v37, %v7006_v0 }
 0xf93   : > { %6245 = vmatprep.mubr.msk.f32.mxu0 %vm1194_vm7, %v2683_v38 }
 0xf94   : > { %6246 = vmatmul.mubr.msk.f32.vlgmr.msra.gmra.mrb[14].mxu0 %vm1194_vm7, %v2684_v39 }
 0xf95   : > { %6252 = vmatprep.mubr.msk.f32.mxu0 %vm1096_vm1, %v2774_v40 }
 0xf98   : > { %6623 = vmatpush3.bf16.xpose.msk.msra.mxu0 %vm7442_vm2, %v6618_v35 }
 0xf9f   : > { %6253 = vmatmul.mubr.msk.f32.vlgmr.msra.gmra.mrb[16].mxu0 %vm1096_vm1, %v2776_v41 }
0x105c   : > { %v7702_v20 = vpop.f32.mrb[12].mxu0 }
0x105d   : > { %v7704_v42 = vpop.f32.mrb[13].mxu0 }
0x1067   : > { %v7706_v43 = vpop.f32.mrb[14].mxu0 }
0x1068   : > { %v7708_v44 = vpop.f32.mrb[15].mxu0 }
0x1072   : > { %v6254_v18 = vpop.f32.mrb[16].mxu0 }
0x1073   : > { %v2865_v45 = vmul.f32 0.17677669, %v6254_v18  ;;  %v2855_v46 = vpop.f32.mrb[17].mxu0  ;;  %v5792_v18 = vld [vmem:[%s7231_s29 + $0x28] sm:$0xff] }
0x1074   : > { %v2864_v12 = vmul.f32 0.17677669, %v2855_v46 }
0x1075   : > { %v2867_v10 = vadd.f32 %v7471_v30, %v2865_v45  ;;  %v5793_v45 = vld [vmem:[%s7231_s29 + $0x30] sm:$0xff] }
0x1076   : > { %v2866_v47 = vadd.f32 %v7471_v30, %v2864_v12  ;;  %v6916_v30 = vpop.permute.xlu1 %6915  ;;  %v5794_v12 = vld [vmem:[%s7231_s29 + $0x38] sm:$0xff] }
0x1077   : > { %v2870_v48 = vmul.f32 1.442695, %v2867_v10  ;;  %v6918_v55 = vunpack.i.h.bf16 %v6916_v30  ;;  %v6917_v56 = vunpack.i.l.bf16 %v6916_v30  ;;  %v6646_v10 = vpack.c.bf16 %v5794_v12, %v5793_v45  ;;  %v7788_v12 = vld [vmem:[%s7261_s30 + $0x2] sm:$0x3] }
0x1078   : > { %v2868_v49 = vmul.f32 1.442695, %v2866_v47 }
0x1079   : > { %7015 = vpow2.f32 %v2870_v48  ;;  %v6630_v60 = vpack.c.bf16 %v6918_v55, %v6917_v56 }
0x107a   : > { %7017 = vpow2.f32 %v2868_v49 }
0x1083   : > { %v7016_v50 = vpop.eup %7015 }
0x1084   : > { %v7018_v51 = vpop.eup %7017  ;;  %v2875_v6 = vsel %vm1198_vm6, %v7016_v50, 0.0 }
0x1085   : > { %2876 = vadd.xlane.f32.xlu0 %v2875_v6  ;;  %v2872_v7 = vsel %vm1194_vm7, %v7018_v51, 0.0 }
0x1086   : > { %2873 = vadd.xlane.f32.xlu1 %v2872_v7 }
0x1097   : > { %2970 = vrot.lane.b32.xlu1 %v7636_v33, %s8231_s26 }
0x109b   : > { %6910 = vrot.lane.b32.xlu0 %v7642_v21, %s8232_s10 }
0x109f   : > { %2972 = vrot.lane.b32.xlu0 %v7634_v31, %s8231_s26 }
0x1112   : > { %v2877_v52 = vpop.xlane.xlu0 %2876 }
0x1113   : > { %7019 = vrcp.f32 %v2877_v52  ;;  %v2874_v53 = vpop.xlane.xlu1 %2873 }
0x1114   : > { %7021 = vrcp.f32 %v2874_v53 }
0x1116   : > { %v6911_v54 = vpop.permute.xlu0 %6910 }
0x1117   : > { %v6913_v57 = vunpack.i.h.bf16 %v6911_v54  ;;  %v6912_v58 = vunpack.i.l.bf16 %v6911_v54  ;;  %v2971_v63 = vpop.permute.xlu1 %2970 }
0x1119   : > { %v6624_v59 = vpack.c.bf16 %v6913_v57, %v6912_v58  ;;  %v5824_v58 = vld [vmem:[%s8205_s3 + $0x1] ss:$0 sm:$0xff]  ;;  %s5740_s3 = sshll.u32 %s7407_s11, 3 }
0x111a   : > { %v2973_v0 = vpop.permute.xlu0 %2972 }
0x111b   : > { %6626 = vmatprep.subr.msk.bf16.mxu1 %vm7450_vm5, %v6624_v59 }
0x111c   : > { %6629 = vmatpush3.bf16.msk.msra.mxu1 %vm7450_vm5, %v6624_v59 }
0x111d   : > { %v7020_v33 = vpop.eup %7019  ;;  %6632 = vmatprep.subr.msk.bf16.mxu1 %vm7442_vm2, %v6630_v60 }
0x111e   : > { %v7022_v31 = vpop.eup %7021  ;;  %v2881_v62 = vmul.f32 %v7020_v33, %v7016_v50 }
0x111f   : > { %v2880_v61 = vmul.f32 %v7022_v31, %v7018_v51 }
0x1121   : > { %6259 = vmatprep.mubr.msk.f32.mxu1 %vm1194_vm7, %v2880_v61 }
0x1122   : > { %6260 = vmatmul.mubr.msk.f32.vlgmr.msra.gmra.mrb[18].mxu1 %vm1194_vm7, %v2881_v62 }
0x1123   : > { %6266 = vmatprep.mubr.msk.f32.mxu1 %vm1096_vm1, %v2971_v63 }
0x1125   : > { %6635 = vmatpush3.bf16.xpose.msk.msra.mxu1 %vm7442_vm2, %v6630_v60 }
0x112c   : > { %6267 = vmatmul.mubr.msk.f32.vlgmr.msra.gmra.mrb[20].mxu1 %vm1096_vm1, %v2973_v0 }
0x11f5   : > { %v6261_v1 = vpop.f32.mrb[18].mxu1 }
0x11f6   : > { %v2961_v2 = vpop.f32.mrb[19].mxu1 }
0x11ff   : > { %v6268_v3 = vpop.f32.mrb[20].mxu1 }
0x1200   : > { %v3062_v4 = vmul.f32 0.17677669, %v6268_v3  ;;  %v3052_v8 = vpop.f32.mrb[21].mxu1 }
0x1201   : > { %v3061_v9 = vmul.f32 0.17677669, %v3052_v8 }
0x1202   : > { %v3064_v15 = vadd.f32 %v7733_v11, %v3062_v4 }
0x1203   : > { %v3063_v22 = vadd.f32 %v7733_v11, %v3061_v9 }
0x1204   : > { %v3067_v23 = vmul.f32 1.442695, %v3064_v15  ;;  %v5829_v15 = vld [vmem:[%s8203_s8 + $0x20] sm:$0xff] }
0x1205   : > { %v3065_v24 = vmul.f32 1.442695, %v3063_v22  ;;  %v5830_v22 = vld [vmem:[%s8203_s8 + $0x28] sm:$0xff] }
0x1206   : > { %7023 = vpow2.f32 %v3067_v23  ;;  %v6650_v23 = vpack.c.bf16 %v5830_v22, %v5829_v15 }
0x1207   : > { %7025 = vpow2.f32 %v3065_v24  ;;  %v5831_v24 = vld [vmem:[%s8203_s8 + $0x30] sm:$0xff] }
0x1208   : > { %6651 = vmatprep.subr.bf16.mxu1 %v6650_v23 }
0x1209   : > { %6653 = vmatpush3.bf16.msra.mxu1 %v6650_v23 }
0x1210   : > { %v7024_v25 = vpop.eup %7023 }
0x1211   : > { %v7026_v17 = vpop.eup %7025  ;;  %v3072_v29 = vsel %vm1198_vm6, %v7024_v25, 0.0 }
0x1212   : > { %3073 = vadd.xlane.f32.xlu0 %v3072_v29  ;;  %v3069_v32 = vsel %vm1194_vm7, %v7026_v17, 0.0  ;;  %v7188_v29 = vmov 0.0|0.0  }
0x1213   : > { %3070 = vadd.xlane.f32.xlu1 %v3069_v32  ;;  %v5837_v32 = vld [vmem:[%s7251_s19 + $0x40] sm:$0xff] }
0x1224   : > { %3169 = vrot.lane.b32.xlu1 %v7708_v44, %s8233_s15  ;;  %v5791_v44 = vld [vmem:[%s7231_s29 + $0x20] sm:$0xff] }
0x1225   : > { %v6642_v46 = vpack.c.bf16 %v5792_v18, %v5791_v44 }
0x1228   : > { %6920 = vrot.lane.b32.xlu0 %v7642_v21, %s8234_s22  ;;  %3171 = vrot.lane.b32.xlu1 %v7706_v43, %s8233_s15 }
0x122c   : > { %3177 = vrot.lane.b32.xlu0 %v2961_v2, %s8235_s7  ;;  %3179 = vrot.lane.b32.xlu1 %v6261_v1, %s8235_s7 }
0x129f   : > { %v3074_v34 = vpop.xlane.xlu0 %3073 }
0x12a0   : > { %7027 = vrcp.f32 %v3074_v34  ;;  %v3071_v35 = vpop.xlane.xlu1 %3070  ;;  %v5838_v34 = vld [vmem:[%s7251_s19 + $0x48] sm:$0xff] }
0x12a1   : > { %7029 = vrcp.f32 %v3071_v35  ;;  %v5839_v35 = vld [vmem:[%s7251_s19 + $0x50] sm:$0xff] }
0x12a3   : > { %v6921_v36 = vpop.permute.xlu0 %6920 }
0x12a4   : > { %v6923_v37 = vunpack.i.h.bf16 %v6921_v36  ;;  %v6922_v38 = vunpack.i.l.bf16 %v6921_v36  ;;  %v3170_v49 = vpop.permute.xlu1 %3169  ;;  %v6658_v36 = vpack.c.bf16 %v5838_v34, %v5837_v32 }
0x12a5   : > { %v3191_v7 = vsel %vm1096_vm1, %v7704_v42, %v3170_v49 }
0x12a6   : > { %v6636_v39 = vpack.c.bf16 %v6923_v37, %v6922_v38  ;;  %v5840_v37 = vld [vmem:[%s7251_s19 + $0x58] sm:$0xff] }
0x12a7   : > { %v3178_v6 = vpop.permute.xlu0 %3177  ;;  %v6662_v38 = vpack.c.bf16 %v5840_v37, %v5839_v35 }
0x12a8   : > { %6638 = vmatprep.subr.msk.bf16.mxu0 %vm7450_vm5, %v6636_v39  ;;  %v3172_v50 = vpop.permute.xlu1 %3171  ;;  %v3193_v52 = vsel %vm1912_vm8, %v3191_v7, %v3178_v6 }
0x12a9   : > { %6641 = vmatpush3.bf16.msk.msra.mxu0 %vm7450_vm5, %v6636_v39  ;;  %v3192_v53 = vsel %vm1096_vm1, %v7702_v20, %v3172_v50  ;;  %v5841_v39 = vld [vmem:[%s7251_s19 + $0x60] sm:$0xff] }
0x12aa   : > { %v7028_v21 = vpop.eup %7027  ;;  %6643 = vmatprep.subr.bf16.mxu0 %v6642_v46 }
0x12ab   : > { %v7030_v40 = vpop.eup %7029  ;;  %v3078_v43 = vmul.f32 %v7028_v21, %v7024_v25  ;;  %v5832_v25 = vld [vmem:[%s8203_s8 + $0x38] sm:$0xff]  ;;  %v5842_v21 = vld [vmem:[%s7251_s19 + $0x68] sm:$0xff]  ;;  %s8237_s8 = sld [smem:[#allocation13_spill]] }
0x12ac   : > { %v3077_v41 = vmul.f32 %v7030_v40, %v7026_v17  ;;  %v3180_v51 = vpop.permute.xlu1 %3179  ;;  %v6654_v17 = vpack.c.bf16 %v5832_v25, %v5831_v24  ;;  %v6666_v40 = vpack.c.bf16 %v5842_v21, %v5841_v39 }
0x12ad   : > { %v3194_v55 = vsel %vm1912_vm8, %v3192_v53, %v3180_v51  ;;  %v3565_v53 = vld [vmem:[%s7271_s12 + $0x8] sm:$0xff] }
0x12ae   : > { %6273 = vmatprep.mubr.msk.f32.mxu0 %vm1194_vm7, %v3077_v41  ;;  %6655 = vmatprep.subr.bf16.mxu1 %v6654_v17 }
0x12af   : > { %6274 = vmatmul.mubr.msk.f32.vlgmr.msra.gmra.mrb[18].mxu0 %vm1194_vm7, %v3078_v43  ;;  %6657 = vmatpush3.bf16.msra.mxu1 %v6654_v17 }
0x12b0   : > { %6645 = vmatpush3.bf16.msra.mxu0 %v6642_v46  ;;  %6674 = vmatprep.subr.bf16.mxu1 %v7188_v29 }
0x12b1   : > { %6647 = vmatprep.subr.bf16.mxu0 %v6646_v10 }
0x12b4   : > { %6649 = vmatpush3.bf16.msra.mxu0 %v6646_v10  ;;  %v7791_v10 = vld [vmem:[%s8204_s6 + $0x2] sm:$0x3]  ;;  %s967_s6 = scalar_lea.vmem %s7206_s9, %s5740_s3  ;;  %s8238_s3 = sld [smem:[#allocation7_spill]] }
0x12b5   : > { %6659 = vmatprep.subr.bf16.mxu0 %v6658_v36  ;;  %v3325_v50 = vrot.slane %v7791_v10, %v7590_v16 }
0x1382   : > { %v6275_v47 = vpop.f32.mrb[18].mxu0 }
0x1383   : > { %3187 = vrot.lane.b32.xlu1 %v6275_v47, %s8236_s17  ;;  %v3158_v48 = vpop.f32.mrb[19].mxu0  ;;  %v3319_v47 = vrot.slane %v7788_v12, %v7590_v16 }
0x1384   : > { %3185 = vrot.lane.b32.xlu0 %v3158_v48, %s8236_s17 }
0x13f5   : > { %v3188_v30 = vpop.permute.xlu1 %3187 }
0x13f6   : > { %v3186_v54 = vpop.permute.xlu0 %3185  ;;  %v3196_v57 = vsel %vm1915_vm9, %v3194_v55, %v3188_v30 }
0x13f7   : > { %v3195_v56 = vsel %vm1915_vm9, %v3193_v52, %v3186_v54  ;;  %v3564_v52 = vld [vmem:[%s7271_s12] sm:$0xff] }
0x13f8   : > { %6284 = vmatprep.mubr.msk.f32.mxu0 %vm1003_vm0, %v3195_v56  ;;  %v6675_v55 = vpack.c.bf16 %v3565_v53, %v3564_v52 }
0x13f9   : > { %6285 = vmatmul.mubr.msk.f32.vlgmr.msra.gmra.mrb[20].mxu0 %vm1003_vm0, %v3196_v57  ;;  %v3566_v57 = vld [vmem:[%s7271_s12 + $0x10] sm:$0xff] }
0x13fa   : > { %6661 = vmatpush3.bf16.msra.mxu0 %v6658_v36  ;;  %v982_v36 = vand.u32 127, %v979_v13 }
0x13fb   : > { %6663 = vmatprep.subr.bf16.mxu0 %v6662_v38 }
0x13fc   : > { %vm983_vm13 = vcmp.le.s32.totalorder %v982_v36, %v7587_v14 }
0x13fe   : > { %6665 = vmatpush3.bf16.msra.mxu0 %v6662_v38  ;;  %v7191_v38 = vmov -1e+09  }
0x13ff   : > { %6667 = vmatprep.subr.bf16.mxu0 %v6666_v40  ;;  %v984_v39 = vsel %vm983_vm13, 0.0, %v7191_v38 }
0x1402   : > { %6669 = vmatpush3.bf16.msra.mxu0 %v6666_v40 }
0x14cc   : > { %v6286_v59 = vpop.f32.mrb[20].mxu0 }
0x14cd   : > { %v3281_v42 = vadd.f32 %v6286_v59, %v5824_v58  ;;  %v3275_v60 = vpop.f32.mrb[21].mxu0 }
0x14ce   : > { %v3276_v33 = vadd.f32 %v5824_v58, %v3275_v60  ;;  %v3567_v58 = vld [vmem:[%s7271_s12 + $0x18] sm:$0xff]  ;;  %v7814_v60 = vld [vmem:[%s967_s6] sm:$0xff]  ;;  %s8239_s6 = sld [smem:[#allocation14_spill]] }
0x14cf   : > { %v3289_v31 = vadd.f32 %v3281_v42, %v7627_v27  ;;  %v6678_v59 = vpack.c.bf16 %v3567_v58, %v3566_v57  ;;  %v7190_v42 = vmov 0.0  }
0x14d0   : > { %v3288_v20 = vadd.f32 %v3276_v33, %v7625_v26  ;;  %v5843_v33 = vld [vmem:[%s7251_s19 + $0x70] sm:$0xff] }
0x14d1   : > { %v3293_v61 = vsel %vm2012_vm10, %v3289_v31, 0.0 }
0x14d2   : > { %3294 = vadd.xlane.f32.xlu1 %v3293_v61  ;;  %v3290_v62 = vsel %vm1003_vm0, %v3288_v20, 0.0  ;;  %v5834_v61 = vld [vmem:[%s7246_s14 + $0x1] ss:$0 sm:$0xff] }
0x14d3   : > { %3291 = vadd.xlane.f32.xlu0 %v3290_v62 }
0x14d4   : > { %v3649_v36 = vld [vmem:[%s8239_s6 + $0x8] sm:$0xff]  ;;  %v3650_v38 = vld [vmem:[%s8239_s6 + $0x10] sm:$0xff] }
0x155f   : > { %v3295_v63 = vpop.xlane.xlu1 %3294 }
0x1560   : > { %v3297_v0 = vmul.f32 0.03125, %v3295_v63  ;;  %v3292_v1 = vpop.xlane.xlu0 %3291 }
0x1561   : > { %v3296_v2 = vmul.f32 0.03125, %v3292_v1 }
0x1562   : > { %v3299_v3 = vsub.f32 %v3289_v31, %v3297_v0  ;;  %v5844_v31 = vld [vmem:[%s7251_s19 + $0x78] sm:$0xff] }
0x1563   : > { %v3298_v4 = vsub.f32 %v3288_v20, %v3296_v2  ;;  %v6670_v20 = vpack.c.bf16 %v5844_v31, %v5843_v33 }
0x1564   : > { %v3301_v26 = vmul.f32 %v3299_v3, %v3299_v3 }
0x1565   : > { %v3300_v8 = vmul.f32 %v3298_v4, %v3298_v4  ;;  %6671 = vmatprep.subr.bf16.mxu0 %v6670_v20 }
0x1566   : > { %v3305_v9 = vsel %vm2012_vm10, %v3301_v26, 0.0  ;;  %6673 = vmatpush3.bf16.msra.mxu0 %v6670_v20 }
0x1567   : > { %v3302_v27 = vsel %vm1003_vm0, %v3300_v8, 0.0  ;;  %6338 = vmatprep.subr.mxu0 %v7190_v42 }
0x1568   : > { %3303 = vadd.xlane.f32.xlu0 %v3302_v27 }
0x156c   : > { %3306 = vadd.xlane.f32.xlu0 %v3305_v9 }
0x15f5   : > { %v3304_v41 = vpop.xlane.xlu0 %3303 }
0x15f6   : > { %v3308_v43 = vmul.f32 0.03125, %v3304_v41 }
0x15f8   : > { %v3310_v44 = vadd.f32 1e-05, %v3308_v43 }
0x15f9   : > { %v3307_v18 = vpop.xlane.xlu0 %3306 }
0x15fa   : > { %7031 = vrsqrt.f32 %v3310_v44  ;;  %v3309_v45 = vmul.f32 0.03125, %v3307_v18 }
0x15fc   : > { %v3311_v46 = vadd.f32 1e-05, %v3309_v45 }
0x15fe   : > { %7033 = vrsqrt.f32 %v3311_v46 }
0x1604   : > { %v7032_v48 = vpop.eup %7031 }
0x1605   : > { %v3314_v49 = vmul.f32 %v7032_v48, %v3298_v4  ;;  %v5849_v4 = vld [vmem:[%s8237_s8] ss:$0 sm:$0xff]  ;;  %s973_s8 = scalar_lea.vmem %s8238_s3, %s7407_s11  ;;  %s8243_s11 = sld [smem:[#allocation16_spill]] }
0x1606   : > { %v5741_v37 = vld [vmem:[%s973_s8] ss:$0 sm:$0xff]  ;;  %s8245_s3 = sld [smem:[#allocation17_spill]] }
0x1607   : > { %v3320_v51 = vmul.f32 %v3319_v47, %v3314_v49  ;;  %v991_v21 = vadd.f32 %v5741_v37, %v984_v39  ;;  %v3651_v39 = vld [vmem:[%s8239_s6 + $0x18] sm:$0xff] }
0x1608   : > { %v7034_v6 = vpop.eup %7033 }
0x1609   : > { %v3315_v7 = vmul.f32 %v7034_v6, %v3299_v3  ;;  %v7797_v30 = vadd.f32 %v3325_v50, %v3320_v51 }
0x160b   : > { %v3321_v54 = vmul.f32 %v3319_v47, %v3315_v7  ;;  %6295 = vmatprep.mubr.msk.f32.mxu1 %vm1003_vm0, %v7797_v30 }
0x160d   : > { %v7803_v56 = vadd.f32 %v3325_v50, %v3321_v54 }
0x160f   : > { %6296 = vmatmul.mubr.msk.f32.vlgmr.msra.gmra.mrb[22].mxu1 %vm1003_vm0, %v7803_v56 }
0x1610   : > { %6676 = vmatpush3.bf16.msra.mxu1 %v6675_v55  ;;  %6325 = vmatprep.mubr.msk.f32.mxu1 %vm7189_vm12, %v7190_v42 }
0x1611   : > { %6677 = vmatprep.subr.bf16.mxu1 %v7188_v29 }
0x1614   : > { %6679 = vmatpush3.bf16.msra.mxu1 %v6678_v59 }
0x1615   : > { %6328 = vmatprep.subr.mxu1 %v7190_v42 }
0x1617   : > { %6326 = vmatmul.mubr.msk.f32.vlgmr.msra.gmra.mrb[24].mxu1 %vm1003_vm0, %v7814_v60 }
0x1618   : > { %6330 = vmatprep.mubr.msk.f32.mxu1 %vm7189_vm12, %v7190_v42 }
0x16e2   : > { %v6297_v62 = vpop.f32.mrb[22].mxu1 }
0x16e3   : > { %v3419_v63 = vadd.f32 %v6297_v62, %v5834_v61  ;;  %v3413_v0 = vpop.f32.mrb[23].mxu1 }
0x16e4   : > { %v3414_v1 = vadd.f32 %v5834_v61, %v3413_v0 }
0x16e5   : > { %v3423_v3 = vmax.f32 %v3419_v63, 0.0 }
0x16e6   : > { %v3422_v2 = vmax.f32 %v3414_v1, 0.0 }
0x16e8   : > { %6314 = vmatprep.mubr.msk.f32.mxu0 %vm2158_vm11, %v3422_v2 }
0x16e9   : > { %6315 = vmatmul.mubr.msk.f32.vlgmr.msra.gmra.mrb[22].mxu0 %vm2158_vm11, %v3423_v3 }
0x16ea   : > { %v3644_v8 = vpop.f32.mrb[24].mxu1  ;;  %6340 = vmatprep.mubr.msk.f32.mxu0 %vm7189_vm12, %v7190_v42 }
0x16eb   : > { %v7830_v27 = vadd.f32 %v5849_v4, %v3644_v8  ;;  %v6327_v26 = vpop.f32.mrb[25].mxu1 }
0x16ed   : > { %3817 = vrot.lane.b32.xlu0 %v7830_v27, %s8223_s23  ;;  %3654 = vrot.lane.b32.xlu1 %v7830_v27, %s8224_s13 }
0x16f1   : > { %3978 = vrot.lane.b32.xlu0 %v7830_v27, %s8228_s25  ;;  %3815 = vrot.lane.b32.xlu1 %v7830_v27, %s8225_s28 }
0x16f5   : > { %4141 = vrot.lane.b32.xlu0 %v7830_v27, %s8231_s26  ;;  %3980 = vrot.lane.b32.xlu1 %v7830_v27, %s8227_s21 }
0x16f9   : > { %3739 = vrot.lane.b32.xlu0 %v7830_v27, %s8226_s1  ;;  %4143 = vrot.lane.b32.xlu1 %v7830_v27, %s8229_s2  ;;  %s8244_s1 = sld [smem:[#allocation19_spill]] }
0x16fd   : > { %3902 = vrot.lane.b32.xlu1 %v7830_v27, %s8230_s18  ;;  %s8240_s18 = sld [smem:[#allocation15_spill]] }
0x175f   : > { %v3818_v9 = vpop.permute.xlu0 %3817  ;;  %v3655_v15 = vpop.permute.xlu1 %3654 }
0x1760   : > { %6329 = vmatpush3.xpose.msk.msra.mxu1 %vm1096_vm1, %v3655_v15  ;;  %6339 = vmatpush3.xpose.msk.msra.mxu0 %vm1096_vm1, %v3818_v9 }
0x1761   : > { %6348 = vmatprep.subr.mxu0 %v7190_v42  ;;  %6333 = vmatprep.subr.mxu1 %v7190_v42 }
0x1763   : > { %v3979_v22 = vpop.permute.xlu0 %3978  ;;  %6331 = vmatmul.mubr.msk.f32.vlgmr.msra.gmra.mrb[26].mxu1 %vm1096_vm1, %v7830_v27  ;;  %v3816_v23 = vpop.permute.xlu1 %3815 }
0x1764   : > { %6341 = vmatmul.mubr.msk.f32.vlgmr.msra.gmra.mrb[24].mxu0 %vm1096_vm1, %v3816_v23  ;;  %6335 = vmatprep.mubr.msk.f32.mxu1 %vm7189_vm12, %v7190_v42 }
0x1765   : > { %6350 = vmatprep.mubr.msk.f32.mxu0 %vm7189_vm12, %v7190_v42 }
0x1767   : > { %v4142_v24 = vpop.permute.xlu0 %4141  ;;  %v3981_v25 = vpop.permute.xlu1 %3980 }
0x1768   : > { %6349 = vmatpush3.xpose.msk.msra.mxu0 %vm1096_vm1, %v3981_v25 }
0x1769   : > { %6358 = vmatprep.subr.mxu0 %v7190_v42 }
0x176b   : > { %v3740_v17 = vpop.permute.xlu0 %3739  ;;  %v4144_v32 = vpop.permute.xlu1 %4143  ;;  %6351 = vmatmul.mubr.msk.f32.vlgmr.msra.gmra.mrb[26].mxu0 %vm1096_vm1, %v3979_v22 }
0x176c   : > { %6334 = vmatpush3.msra.mxu1 %v3740_v17  ;;  %6359 = vmatpush3.xpose.msk.msra.mxu0 %vm1096_vm1, %v4144_v32  ;;  %v3648_v32 = vld [vmem:[%s8239_s6] sm:$0xff] }
0x176d   : > { %6360 = vmatprep.mubr.msk.f32.mxu0 %vm7189_vm12, %v7190_v42  ;;  %6343 = vmatprep.subr.mxu1 %v7190_v42  ;;  %v6681_v37 = vpack.c.bf16 %v3649_v36, %v3648_v32 }
0x176e   : > { %6680 = vmatprep.subr.bf16.mxu0 %v7188_v29 }
0x176f   : > { %6361 = vmatmul.mubr.msk.f32.vlgmr.msra.gmra.mrb[28].mxu0 %vm1096_vm1, %v4142_v24  ;;  %v3903_v0 = vpop.permute.xlu1 %3902 }
0x1770   : > { %6376 = vmatprep.mubr.msk.f32.mxu0 %vm7189_vm12, %v7190_v42  ;;  %6682 = vmatpush3.bf16.msra.mxu0 %v6681_v37 }
0x1771   : > { %6683 = vmatprep.subr.bf16.mxu0 %v7188_v29 }
0x17bc   : > { %v7872_v34 = vpop.f32.mrb[22].mxu0 }
0x17bd   : > { %v7874_v35 = vpop.f32.mrb[23].mxu0 }
0x1836   : > { %v3726_v40 = vpop.f32.mrb[26].mxu1 }
0x1837   : > { %v3730_v41 = vmul.f32 0.17677669, %v3726_v40  ;;  %v6332_v43 = vpop.f32.mrb[27].mxu1  ;;  %v3889_v44 = vpop.f32.mrb[24].mxu0 }
0x1838   : > { %v3893_v18 = vmul.f32 0.17677669, %v3889_v44  ;;  %v6342_v45 = vpop.f32.mrb[25].mxu0 }
0x1839   : > { %v3731_v46 = vadd.f32 %v3730_v41, %v991_v21 }
0x183a   : > { %v3894_v47 = vadd.f32 %v3893_v18, %v991_v21 }
0x183b   : > { %v3732_v48 = vmul.f32 1.442695, %v3731_v46 }
0x183c   : > { %v3895_v49 = vmul.f32 1.442695, %v3894_v47 }
0x183d   : > { %7035 = vpow2.f32 %v3732_v48  ;;  %v5846_v48 = vld [vmem:[%s7256_s24 + $0x1] ss:$0 sm:$0xff] }
0x183e   : > { %7037 = vpow2.f32 %v3895_v49  ;;  %v4052_v13 = vpop.f32.mrb[26].mxu0  ;;  %v3514_v49 = vadd.f32 %v5846_v48, %v7874_v35 }
0x183f   : > { %v4056_v50 = vmul.f32 0.17677669, %v4052_v13  ;;  %v6352_v51 = vpop.f32.mrb[27].mxu0 }
0x1840   : > { %v3522_v13 = vadd.f32 %v3514_v49, %v7797_v30  ;;  %v3519_v51 = vadd.f32 %v7872_v34, %v5846_v48 }
0x1841   : > { %v4057_v6 = vadd.f32 %v4056_v50, %v991_v21 }
0x1842   : > { %v4215_v7 = vpop.f32.mrb[28].mxu0  ;;  %v3524_v50 = vsel %vm1003_vm0, %v3522_v13, 0.0 }
0x1843   : > { %v4058_v52 = vmul.f32 1.442695, %v4057_v6  ;;  %v4219_v53 = vmul.f32 0.17677669, %v4215_v7  ;;  %v6362_v54 = vpop.f32.mrb[29].mxu0  ;;  %v3523_v6 = vadd.f32 %v3519_v51, %v7803_v56  ;;  %v4424_v51 = vld [vmem:[%s8243_s11 + $0x10] sm:$0xff] }
0x1845   : > { %7039 = vpow2.f32 %v4058_v52  ;;  %v4220_v55 = vadd.f32 %v4219_v53, %v991_v21  ;;  %v6684_v21 = vpack.c.bf16 %v3651_v39, %v3650_v38  ;;  %v3527_v7 = vsel %vm2012_vm10, %v3523_v6, 0.0 }
0x1847   : > { %v7036_v57 = vpop.eup %7035  ;;  %v4221_v58 = vmul.f32 1.442695, %v4220_v55  ;;  %6685 = vmatpush3.bf16.msra.mxu0 %v6684_v21 }
0x1848   : > { %v7038_v59 = vpop.eup %7037  ;;  %v3734_v33 = vsel %vm1096_vm1, %v7036_v57, 0.0 }
0x1849   : > { %7041 = vpow2.f32 %v4221_v58  ;;  %3735 = vadd.xlane.f32.xlu1 %v3734_v33  ;;  %v3897_v31 = vsel %vm1096_vm1, %v7038_v59, 0.0 }
0x184a   : > { %3898 = vadd.xlane.f32.xlu0 %v3897_v31 }
0x184f   : > { %v7040_v20 = vpop.eup %7039 }
0x1850   : > { %v4060_v61 = vsel %vm1096_vm1, %v7040_v20, 0.0 }
0x1851   : > { %4061 = vadd.xlane.f32.xlu0 %v4060_v61 }
0x1853   : > { %v7042_v62 = vpop.eup %7041 }
0x1854   : > { %v4223_v63 = vsel %vm1096_vm1, %v7042_v62, 0.0 }
0x1855   : > { %4224 = vadd.xlane.f32.xlu1 %v4223_v63 }
0x1866   : > { %4065 = vrot.lane.b32.xlu1 %v7830_v27, %s8232_s10 }
0x1867   : > { %4228 = vrot.lane.b32.xlu0 %v7830_v27, %s8234_s22  ;;  %s8241_s22 = sld [smem:[#allocation18_spill]] }
0x186d   : > { %s8242_s10 = smov %s8241_s22 }
0x18d6   : > { %v3736_v1 = vpop.xlane.xlu1 %3735 }
0x18d7   : > { %7043 = vrcp.f32 %v3736_v1  ;;  %v3899_v2 = vpop.xlane.xlu0 %3898 }
0x18d8   : > { %7045 = vrcp.f32 %v3899_v2 }
0x18de   : > { %v4062_v3 = vpop.xlane.xlu0 %4061 }
0x18df   : > { %7047 = vrcp.f32 %v4062_v3 }
0x18e1   : > { %v7044_v4 = vpop.eup %7043 }
0x18e2   : > { %v3738_v8 = vmul.f32 %v7044_v4, %v7036_v57  ;;  %v4225_v26 = vpop.xlane.xlu1 %4224  ;;  %v7046_v9 = vpop.eup %7045 }
0x18e3   : > { %7049 = vrcp.f32 %v4225_v26  ;;  %v3901_v15 = vmul.f32 %v7046_v9, %v7038_v59  ;;  %v4229_v24 = vpop.permute.xlu0 %4228  ;;  %v4507_v26 = vld [vmem:[%s8242_s10 + $0x8] sm:$0xff]  ;;  %v4508_v9 = vld [vmem:[%s8242_s10 + $0x10] sm:$0xff] }
0x18e4   : > { %6336 = vmatmul.mubr.msk.f32.vlgmr.msra.gmra.mrb[28].mxu1 %vm1096_vm1, %v3738_v8  ;;  %v4506_v8 = vld [vmem:[%s8241_s22] sm:$0xff] }
0x18e5   : > { %6344 = vmatpush3.msra.mxu1 %v3903_v0  ;;  %6345 = vmatprep.mubr.msk.f32.mxu1 %vm7189_vm12, %v7190_v42 }
0x18e6   : > { %v4066_v27 = vpop.permute.xlu1 %4065  ;;  %6353 = vmatprep.subr.mxu1 %v7190_v42 }
0x18e8   : > { %6346 = vmatmul.mubr.msk.f32.vlgmr.msra.gmra.mrb[30].mxu1 %vm1096_vm1, %v3901_v15  ;;  %v6692_v15 = vpack.c.bf16 %v4507_v26, %v4506_v8  ;;  %v5865_v26 = vld [vmem:[%s8245_s3] ss:$0 sm:$0xff] }
0x18e9   : > { %v7048_v22 = vpop.eup %7047  ;;  %6354 = vmatpush3.msra.mxu1 %v4066_v27  ;;  %6355 = vmatprep.mubr.msk.f32.mxu1 %vm7189_vm12, %v7190_v42  ;;  %v4509_v27 = vld [vmem:[%s8242_s10 + $0x18] sm:$0xff] }
0x18ea   : > { %v4064_v23 = vmul.f32 %v7048_v22, %v7040_v20  ;;  %6363 = vmatprep.subr.mxu1 %v7190_v42  ;;  %v5863_v20 = vld [vmem:[%s8240_s18] ss:$0 sm:$0xff]  ;;  %v6696_v22 = vpack.c.bf16 %v4509_v27, %v4508_v9  ;;  %6693 = vmatprep.subr.bf16.mxu0 %v6692_v15 }
0x18ec   : > { %6356 = vmatmul.mubr.msk.f32.vlgmr.msra.gmra.mrb[32].mxu1 %vm1096_vm1, %v4064_v23 }
0x18ed   : > { %v7050_v25 = vpop.eup %7049  ;;  %6364 = vmatpush3.msra.mxu1 %v4229_v24  ;;  %6365 = vmatprep.mubr.msk.f32.mxu1 %vm7189_vm12, %v7190_v42 }
0x18ee   : > { %v4227_v17 = vmul.f32 %v7050_v25, %v7042_v62  ;;  %6686 = vmatprep.subr.bf16.mxu1 %v7188_v29 }
0x18f0   : > { %6366 = vmatmul.mubr.msk.f32.vlgmr.msra.gmra.mrb[34].mxu1 %vm1096_vm1, %v4227_v17 }
0x18f1   : > { %6387 = vmatprep.mubr.msk.f32.mxu1 %vm7189_vm12, %v7190_v42 }
0x19b7   : > { %v3811_v40 = vpop.f32.mrb[28].mxu1 }
0x19b8   : > { %v6337_v41 = vpop.f32.mrb[29].mxu1 }
0x19bb   : > { %v3974_v43 = vpop.f32.mrb[30].mxu1 }
0x19bc   : > { %v6347_v44 = vpop.f32.mrb[31].mxu1  ;;  %4305 = vrot.lane.b32.xlu1 %v3974_v43, %s8233_s15  ;;  %v3553_v43 = vrot.slane %v7788_v12, %v7619_v5  ;;  %v4422_v12 = vld [vmem:[%s8243_s11] sm:$0xff] }
0x19bf   : > { %v4137_v18 = vpop.f32.mrb[32].mxu1 }
0x19c0   : > { %4309 = vrot.lane.b32.xlu0 %v4137_v18, %s8235_s7  ;;  %v6357_v45 = vpop.f32.mrb[33].mxu1 }
0x19c3   : > { %v4300_v46 = vpop.f32.mrb[34].mxu1 }
0x19c4   : > { %4313 = vrot.lane.b32.xlu1 %v4300_v46, %s8236_s17  ;;  %v6367_v47 = vpop.f32.mrb[35].mxu1  ;;  %v3559_v46 = vrot.slane %v7791_v10, %v7619_v5 }
0x19df   : > { %3525 = vadd.xlane.f32.xlu0 %v3524_v50 }
0x19e8   : > { %3528 = vadd.xlane.f32.xlu1 %v3527_v7 }
0x1a2e   : > { %v4306_v52 = vpop.permute.xlu1 %4305 }
0x1a2f   : > { %v4316_v54 = vsel %vm1096_vm1, %v3811_v40, %v4306_v52 }
0x1a32   : > { %v4310_v53 = vpop.permute.xlu0 %4309 }
0x1a33   : > { %v4317_v55 = vsel %vm1912_vm8, %v4316_v54, %v4310_v53  ;;  %v7948_v54 = vld [vmem:[%s7341_s27] sm:$0x7] }
0x1a36   : > { %v4314_v35 = vpop.permute.xlu1 %4313 }
0x1a37   : > { %v4318_v30 = vsel %vm1915_vm9, %v4317_v55, %v4314_v35  ;;  %v7951_v55 = vld [vmem:[%s7346_s4] sm:$0x7]  ;;  %v4415_v35 = vrot.slane %v7948_v54, %v7590_v16 }
0x1a38   : > { %6377 = vmatmul.mubr.msk.f32.vlgmr.msra.gmra.mrb[30].mxu0 %vm1003_vm0, %v4318_v30 }
0x1a39   : > { %6695 = vmatpush3.bf16.msra.mxu0 %v6692_v15 }
0x1a3a   : > { %6697 = vmatprep.subr.bf16.mxu0 %v6696_v22 }
0x1a3d   : > { %6699 = vmatpush3.bf16.msra.mxu0 %v6696_v22 }
0x1a3e   : > { %6704 = vmatprep.subr.bf16.mxu0 %v7188_v29 }
0x1a6c   : > { %v3526_v33 = vpop.xlane.xlu0 %3525 }
0x1a6d   : > { %v3530_v31 = vmul.f32 0.03125, %v3526_v33 }
0x1a6f   : > { %v3532_v62 = vsub.f32 %v3522_v13, %v3530_v31  ;;  %v4423_v13 = vld [vmem:[%s8243_s11 + $0x8] sm:$0xff] }
0x1a70   : > { %v6687_v50 = vpack.c.bf16 %v4423_v13, %v4422_v12 }
0x1a71   : > { %v3534_v3 = vmul.f32 %v3532_v62, %v3532_v62 }
0x1a72   : > { %6688 = vmatpush3.bf16.msra.mxu1 %v6687_v50 }
0x1a73   : > { %v3536_v4 = vsel %vm1003_vm0, %v3534_v3, 0.0  ;;  %6689 = vmatprep.subr.bf16.mxu1 %v7188_v29 }
0x1a75   : > { %v3529_v57 = vpop.xlane.xlu1 %3528 }
0x1a76   : > { %v3531_v34 = vmul.f32 0.03125, %v3529_v57 }
0x1a78   : > { %v3533_v58 = vsub.f32 %v3523_v6, %v3531_v34  ;;  %v4425_v6 = vld [vmem:[%s8243_s11 + $0x18] sm:$0xff]  ;;  %v4420_v34 = vrot.slane %v7951_v55, %v7590_v16 }
0x1a79   : > { %v6690_v10 = vpack.c.bf16 %v4425_v6, %v4424_v51 }
0x1a7a   : > { %v3535_v59 = vmul.f32 %v3533_v58, %v3533_v58 }
0x1a7b   : > { %6691 = vmatpush3.bf16.msra.mxu1 %v6690_v10 }
0x1a7c   : > { %v3539_v56 = vsel %vm2012_vm10, %v3535_v59, 0.0  ;;  %6700 = vmatprep.subr.bf16.mxu1 %v7188_v29 }
0x1a7d   : > { %3540 = vadd.xlane.f32.xlu1 %v3539_v56  ;;  %v5867_v56 = vld [vmem:[%s8244_s1] ss:$0 sm:$0xff] }
0x1b0b   : > { %v4394_v61 = vpop.f32.mrb[30].mxu0 }
0x1b0c   : > { %v4395_v63 = vadd.f32 %v5863_v20, %v4394_v61  ;;  %v6378_v0 = vpop.f32.mrb[31].mxu0 }
0x1b0e   : > { %v4398_v1 = vadd.f32 %v4395_v63, %v7814_v60  ;;  %v3541_v60 = vpop.xlane.xlu1 %3540 }
0x1b0f   : > { %v3543_v23 = vmul.f32 0.03125, %v3541_v60 }
0x1b10   : > { %v4399_v2 = vsel %vm1003_vm0, %v4398_v1, 0.0 }
0x1b11   : > { %4400 = vadd.xlane.f32.xlu0 %v4399_v2  ;;  %v3545_v24 = vadd.f32 1e-05, %v3543_v23 }
0x1b13   : > { %7051 = vrsqrt.f32 %v3545_v24 }
0x1b15   : > { %3537 = vadd.xlane.f32.xlu0 %v3536_v4 }
0x1b1d   : > { %v7052_v40 = vpop.eup %7051 }
0x1b1e   : > { %v3549_v41 = vmul.f32 %v7052_v40, %v3533_v58 }
0x1b20   : > { %v3555_v45 = vmul.f32 %v3553_v43, %v3549_v41 }
0x1b22   : > { %v3561_v49 = vadd.f32 %v3559_v46, %v3555_v45 }
0x1b9e   : > { %v4401_v25 = vpop.xlane.xlu0 %4400 }
0x1b9f   : > { %v4402_v17 = vmul.f32 0.03125, %v4401_v25 }
0x1ba1   : > { %v4403_v32 = vsub.f32 %v4398_v1, %v4402_v17 }
0x1ba2   : > { %v3538_v36 = vpop.xlane.xlu0 %3537 }
0x1ba3   : > { %v3542_v37 = vmul.f32 0.03125, %v3538_v36  ;;  %v4404_v38 = vmul.f32 %v4403_v32, %v4403_v32 }
0x1ba5   : > { %v3544_v39 = vadd.f32 1e-05, %v3542_v37  ;;  %v4405_v21 = vsel %vm1003_vm0, %v4404_v38, 0.0 }
0x1ba6   : > { %4406 = vadd.xlane.f32.xlu0 %v4405_v21 }
0x1ba7   : > { %7053 = vrsqrt.f32 %v3544_v39 }
0x1bb1   : > { %v7054_v44 = vpop.eup %7053 }
0x1bb2   : > { %v3548_v18 = vmul.f32 %v7054_v44, %v3532_v62 }
0x1bb4   : > { %v3554_v47 = vmul.f32 %v3553_v43, %v3548_v18 }
0x1bb6   : > { %v3560_v48 = vadd.f32 %v3559_v46, %v3554_v47 }
0x1bb8   : > { %6398 = vmatprep.mubr.msk.f32.mxu0 %vm1003_vm0, %v3560_v48 }
0x1bb9   : > { %6399 = vmatmul.mubr.msk.f32.vlgmr.msra.gmra.mrb[32].mxu0 %vm1003_vm0, %v3561_v49 }
0x1bba   : > { %6412 = vmatprep.mubr.msk.f32.mxu0 %vm7189_vm12, %v7190_v42 }
0x1c33   : > { %v4407_v7 = vpop.xlane.xlu0 %4406 }
0x1c34   : > { %v4408_v52 = vmul.f32 0.03125, %v4407_v7 }
0x1c36   : > { %v4409_v53 = vadd.f32 1e-05, %v4408_v52 }
0x1c38   : > { %7055 = vrsqrt.f32 %v4409_v53 }
0x1c42   : > { %v7056_v30 = vpop.eup %7055 }
0x1c43   : > { %v4411_v57 = vmul.f32 %v7056_v30, %v4403_v32 }
0x1c45   : > { %v4416_v58 = vmul.f32 %v4415_v35, %v4411_v57 }
0x1c47   : > { %v7957_v59 = vadd.f32 %v4420_v34, %v4416_v58 }
0x1c49   : > { %6388 = vmatmul.mubr.msk.f32.vlgmr.msra.gmra.mrb[36].mxu1 %vm1003_vm0, %v7957_v59 }
0x1c4a   : > { %6405 = vmatprep.mubr.msk.f32.mxu1 %vm7189_vm12, %v7190_v42 }
0x1c8c   : > { %v6400_v33 = vpop.f32.mrb[32].mxu0 }
0x1c8d   : > { %v4595_v31 = vadd.f32 %v6400_v33, %v5867_v56  ;;  %v4589_v20 = vpop.f32.mrb[33].mxu0 }
0x1c8e   : > { %v4590_v61 = vadd.f32 %v5867_v56, %v4589_v20 }
0x1c90   : > { %v7964_v62 = vpack.i.bf16 %v4595_v31, %v4590_v61  ;;  %v6701_v63 = vpack.c.bf16 %v4595_v31, %v4590_v61 }
0x1c92   : > { %6925 = vrot.lane.b32.xlu1 %v7964_v62, %s8225_s28  ;;  %6703 = vmatpush3.bf16.xpose.msk.msra.mxu1 %vm7442_vm2, %v6701_v63 }
0x1c93   : > { %6708 = vmatprep.subr.bf16.mxu1 %v7188_v29 }
0x1c96   : > { %6930 = vrot.lane.b32.xlu1 %v7964_v62, %s8224_s13  ;;  %s8246_s13 = sld [smem:[#allocation20_spill]] }
0x1d04   : > { %v6926_v16 = vpop.permute.xlu1 %6925 }
0x1d05   : > { %v6928_v4 = vunpack.i.h.bf16 %v6926_v16  ;;  %v6927_v8 = vunpack.i.l.bf16 %v6926_v16 }
0x1d07   : > { %v6709_v22 = vpack.c.bf16 %v6928_v4, %v6927_v8 }
0x1d08   : > { %v6931_v0 = vpop.permute.xlu1 %6930 }
0x1d09   : > { %v6933_v1 = vunpack.i.h.bf16 %v6931_v0  ;;  %v6932_v2 = vunpack.i.l.bf16 %v6931_v0 }
0x1d0b   : > { %v6705_v3 = vpack.c.bf16 %v6933_v1, %v6932_v2 }
0x1d0d   : > { %6707 = vmatpush3.bf16.msk.msra.mxu0 %vm7450_vm5, %v6705_v3 }
0x1d0e   : > { %6712 = vmatprep.subr.bf16.mxu0 %v7188_v29 }
0x1d1c   : > { %v4502_v9 = vpop.f32.mrb[36].mxu1 }
0x1d1d   : > { %v4503_v15 = vadd.f32 %v5865_v26, %v4502_v9  ;;  %v6389_v27 = vpop.f32.mrb[37].mxu1 }
0x1d1f   : > { %4771 = vrot.lane.b32.xlu0 %v4503_v15, %s8225_s28  ;;  %6406 = vmatmul.mubr.msk.f32.vlgmr.msra.gmra.mrb[38].mxu1 %vm1096_vm1, %v4503_v15  ;;  %s5897_s28 = sshll.u32 %s7374_s0, 7  ;;  %s7192_s0 = smov [#allocation2]  }
0x1d20   : > { %6711 = vmatpush3.bf16.xpose.msk.msra.mxu1 %vm7442_vm2, %v6709_v22  ;;  %6419 = vmatprep.mubr.msk.f32.mxu1 %vm7189_vm12, %v7190_v42 }
0x1d21   : > { %6720 = vmatprep.subr.bf16.mxu1 %v7188_v29 }
0x1d91   : > { %v4772_v60 = vpop.permute.xlu0 %4771 }
0x1d92   : > { %6420 = vmatmul.mubr.msk.f32.vlgmr.msra.gmra.mrb[40].mxu1 %vm1096_vm1, %v4772_v60 }
0x1d93   : > { %6440 = vmatprep.mubr.msk.f32.mxu1 %vm7189_vm12, %v7190_v42 }
0x1df2   : > { %v4678_v23 = vpop.f32.mrb[38].mxu1 }
0x1df3   : > { %v4682_v24 = vmul.f32 0.17677669, %v4678_v23  ;;  %v6407_v25 = vpop.f32.mrb[39].mxu1 }
0x1df5   : > { %v4683_v17 = vadd.f32 %v7733_v11, %v4682_v24 }
0x1df7   : > { %v4684_v32 = vmul.f32 1.442695, %v4683_v17 }
0x1df9   : > { %7057 = vpow2.f32 %v4684_v32  ;;  %v7078_v32 = vld [vmem:[%s7468_s5] ss:$0 sm:$0xff]  ;;  %s8247_s5 = sld [smem:[#allocation21_spill]] }
0x1e03   : > { %v7058_v36 = vpop.eup %7057 }
0x1e04   : > { %v4686_v37 = vsel %vm1194_vm7, %v7058_v36, 0.0 }
0x1e05   : > { %4687 = vadd.xlane.f32.xlu1 %v4686_v37 }
0x1e16   : > { %6940 = vrot.lane.b32.xlu1 %v7964_v62, %s8228_s25 }
0x1e1a   : > { %4942 = vrot.lane.b32.xlu1 %v4503_v15, %s8228_s25  ;;  %s8250_s25 = sld [smem:[#allocation23_spill]] }
0x1e1e   : > { %6945 = vrot.lane.b32.xlu1 %v7964_v62, %s8227_s21  ;;  %s8248_s21 = sld [smem:[#allocation22_spill]] }
0x1e22   : > { %6950 = vrot.lane.b32.xlu1 %v7964_v62, %s8231_s26 }
0x1e26   : > { %5113 = vrot.lane.b32.xlu1 %v4503_v15, %s8231_s26 }
0x1e65   : > { %v4849_v38 = vpop.f32.mrb[40].mxu1 }
0x1e66   : > { %v4853_v39 = vmul.f32 0.17677669, %v4849_v38  ;;  %v6421_v21 = vpop.f32.mrb[41].mxu1 }
0x1e68   : > { %v4854_v40 = vadd.f32 %v7733_v11, %v4853_v39 }
0x1e6a   : > { %v4855_v41 = vmul.f32 1.442695, %v4854_v40 }
0x1e6c   : > { %7059 = vpow2.f32 %v4855_v41 }
0x1e76   : > { %v7060_v43 = vpop.eup %7059 }
0x1e77   : > { %v4857_v44 = vsel %vm1194_vm7, %v7060_v43, 0.0 }
0x1e78   : > { %4858 = vadd.xlane.f32.xlu0 %v4857_v44  ;;  %v4599_v44 = vld [vmem:[%s8246_s13 + $0x8] sm:$0xff] }
0x1e8e   : > { %6935 = vrot.lane.b32.xlu0 %v7964_v62, %s8223_s23 }
0x1e92   : > { %v4688_v18 = vpop.xlane.xlu1 %4687 }
0x1e93   : > { %7061 = vrcp.f32 %v4688_v18  ;;  %v4600_v18 = vld [vmem:[%s8246_s13 + $0x10] sm:$0xff] }
0x1e96   : > { %v6941_v45 = vpop.permute.xlu1 %6940 }
0x1e97   : > { %v6943_v35 = vunpack.i.h.bf16 %v6941_v45  ;;  %v6942_v30 = vunpack.i.l.bf16 %v6941_v45 }
0x1e99   : > { %v6717_v34 = vpack.c.bf16 %v6943_v35, %v6942_v30 }
0x1e9a   : > { %v4943_v46 = vpop.permute.xlu1 %4942 }
0x1e9d   : > { %v7062_v47 = vpop.eup %7061 }
0x1e9e   : > { %v4690_v48 = vmul.f32 %v7062_v47, %v7058_v36  ;;  %v6946_v49 = vpop.permute.xlu1 %6945 }
0x1e9f   : > { %v6948_v12 = vunpack.i.h.bf16 %v6946_v49  ;;  %v6947_v13 = vunpack.i.l.bf16 %v6946_v49 }
0x1ea0   : > { %6413 = vmatmul.mubr.msk.f32.vlgmr.msra.gmra.mrb[34].mxu0 %vm1194_vm7, %v4690_v48 }
0x1ea1   : > { %v6721_v50 = vpack.c.bf16 %v6948_v12, %v6947_v13  ;;  %6426 = vmatprep.mubr.msk.f32.mxu0 %vm7189_vm12, %v7190_v42 }
0x1ea2   : > { %v6951_v9 = vpop.permute.xlu1 %6950 }
0x1ea3   : > { %6723 = vmatpush3.bf16.msk.msra.mxu1 %vm7450_vm5, %v6721_v50  ;;  %v6953_v27 = vunpack.i.h.bf16 %v6951_v9  ;;  %v6952_v22 = vunpack.i.l.bf16 %v6951_v9 }
0x1ea4   : > { %6724 = vmatprep.subr.bf16.mxu1 %v7188_v29 }
0x1ea5   : > { %v6725_v23 = vpack.c.bf16 %v6953_v27, %v6952_v22 }
0x1f05   : > { %v4859_v51 = vpop.xlane.xlu0 %4858 }
0x1f06   : > { %7063 = vrcp.f32 %v4859_v51 }
0x1f09   : > { %v6936_v6 = vpop.permute.xlu0 %6935 }
0x1f0a   : > { %v6938_v10 = vunpack.i.h.bf16 %v6936_v6  ;;  %v6937_v7 = vunpack.i.l.bf16 %v6936_v6 }
0x1f0c   : > { %v6713_v52 = vpack.c.bf16 %v6938_v10, %v6937_v7  ;;  %v5890_v7 = vld [vmem:[%s8247_s5] ss:$0 sm:$0xff]  ;;  %s7083_s5 = sshll.u32 %s7192_s0, 4  ;;  %s7084_s5 = int_to_ptr.vmem [resolvable:$false] %s7083_s5 }
0x1f0e   : > { %6715 = vmatpush3.bf16.msk.msra.mxu0 %vm7450_vm5, %v6713_v52 }
0x1f0f   : > { %6716 = vmatprep.subr.bf16.mxu0 %v7188_v29 }
0x1f10   : > { %v7064_v53 = vpop.eup %7063 }
0x1f11   : > { %v4861_v57 = vmul.f32 %v7064_v53, %v7060_v43  ;;  %v4598_v43 = vld [vmem:[%s8246_s13] sm:$0xff] }
0x1f12   : > { %v6733_v45 = vpack.c.bf16 %v4599_v44, %v4598_v43 }
0x1f13   : > { %6427 = vmatmul.mubr.msk.f32.vlgmr.msra.gmra.mrb[36].mxu0 %vm1194_vm7, %v4861_v57 }
0x1f14   : > { %6433 = vmatprep.mubr.msk.f32.mxu0 %vm7189_vm12, %v7190_v42 }
0x1f17   : > { %6719 = vmatpush3.bf16.xpose.msk.msra.mxu0 %vm7442_vm2, %v6717_v34 }
0x1f18   : > { %6728 = vmatprep.subr.bf16.mxu0 %v7188_v29 }
0x1f1e   : > { %6434 = vmatmul.mubr.msk.f32.vlgmr.msra.gmra.mrb[38].mxu0 %vm1096_vm1, %v4943_v46  ;;  %v4601_v46 = vld [vmem:[%s8246_s13 + $0x18] sm:$0xff] }
0x1f1f   : > { %6454 = vmatprep.mubr.msk.f32.mxu0 %vm7189_vm12, %v7190_v42  ;;  %v6736_v47 = vpack.c.bf16 %v4601_v46, %v4600_v18 }
0x1f73   : > { %v8019_v58 = vpop.f32.mrb[34].mxu0 }
0x1f74   : > { %v6414_v56 = vpop.f32.mrb[35].mxu0 }
0x1fe6   : > { %v4938_v33 = vpop.f32.mrb[36].mxu0 }
0x1fe7   : > { %v6428_v31 = vpop.f32.mrb[37].mxu0 }
0x1fe8   : > { %v5402_v31 = vld [vmem:[%s8248_s21] sm:$0xff] }
0x1ff1   : > { %v5020_v20 = vpop.f32.mrb[38].mxu0 }
0x1ff2   : > { %v5024_v61 = vmul.f32 0.17677669, %v5020_v20  ;;  %v6435_v63 = vpop.f32.mrb[39].mxu0  ;;  %v5403_v20 = vld [vmem:[%s8248_s21 + $0x8] sm:$0xff] }
0x1ff3   : > { %v5405_v63 = vld [vmem:[%s8248_s21 + $0x18] sm:$0xff] }
0x1ff4   : > { %v5025_v16 = vadd.f32 %v7733_v11, %v5024_v61  ;;  %v6739_v61 = vpack.c.bf16 %v5403_v20, %v5402_v31 }
0x1ff6   : > { %v5026_v0 = vmul.f32 1.442695, %v5025_v16 }
0x1ff8   : > { %7065 = vpow2.f32 %v5026_v0 }
0x2002   : > { %v7066_v1 = vpop.eup %7065 }
0x2003   : > { %v5028_v2 = vsel %vm1194_vm7, %v7066_v1, 0.0 }
0x2004   : > { %5029 = vadd.xlane.f32.xlu0 %v5028_v2 }
0x201a   : > { %6955 = vrot.lane.b32.xlu0 %v7964_v62, %s8229_s2  ;;  %v5114_v62 = vpop.permute.xlu1 %5113  ;;  %s956_s2 = sand.u32 1, %s7133_s16  }
0x201b   : > { %s5601_s1 = scalar_lea.sflag [#allocation3], %s956_s2 }
0x2091   : > { %v5030_v3 = vpop.xlane.xlu0 %5029 }
0x2092   : > { %7067 = vrcp.f32 %v5030_v3 }
0x2095   : > { %v6956_v4 = vpop.permute.xlu0 %6955 }
0x2096   : > { %v6958_v8 = vunpack.i.h.bf16 %v6956_v4  ;;  %v6957_v26 = vunpack.i.l.bf16 %v6956_v4 }
0x2098   : > { %v6729_v15 = vpack.c.bf16 %v6958_v8, %v6957_v26 }
0x209a   : > { %6731 = vmatpush3.bf16.msk.msra.mxu0 %vm7450_vm5, %v6729_v15 }
0x209b   : > { %6732 = vmatprep.subr.bf16.mxu0 %v7188_v29 }
0x209c   : > { %v7068_v11 = vpop.eup %7067 }
0x209d   : > { %v5032_v60 = vmul.f32 %v7068_v11, %v7066_v1 }
0x209f   : > { %6441 = vmatmul.mubr.msk.f32.vlgmr.msra.gmra.mrb[42].mxu1 %vm1194_vm7, %v5032_v60  ;;  %v5395_v60 = vrot.slane %v7948_v54, %v7619_v5 }
0x20a0   : > { %6727 = vmatpush3.bf16.xpose.msk.msra.mxu1 %vm7442_vm2, %v6725_v23  ;;  %6447 = vmatprep.mubr.msk.f32.mxu1 %vm7189_vm12, %v7190_v42 }
0x20a1   : > { %6738 = vmatprep.subr.bf16.mxu1 %v7188_v29 }
0x20a7   : > { %6448 = vmatmul.mubr.msk.f32.vlgmr.msra.gmra.mrb[44].mxu1 %vm1096_vm1, %v5114_v62 }
0x20a8   : > { %6476 = vmatprep.mubr.msk.f32.mxu1 %vm7189_vm12, %v7190_v42  ;;  %6740 = vmatpush3.bf16.msra.mxu1 %v6739_v61 }
0x20a9   : > { %6741 = vmatprep.subr.bf16.mxu1 %v7188_v29 }
0x2172   : > { %v5109_v28 = vpop.f32.mrb[42].mxu1 }
0x2173   : > { %5289 = vrot.lane.b32.xlu0 %v5109_v28, %s8235_s7  ;;  %v6442_v24 = vpop.f32.mrb[43].mxu1  ;;  %v5400_v28 = vrot.slane %v7951_v55, %v7619_v5  ;;  %s5737_s7 = sshll.u32 %s956_s2, 3 }
0x2174   : > { %s958_s8 = scalar_lea.vmem [#allocation2], %s5737_s7 }
0x2175   : > { %s5614_s18 = sshll.u32 %s958_s8, 4  ;;  %s8096_s18 = int_to_ptr.vmem [resolvable:$true] %s5614_s18 }
0x2176   : > { %s7079_s3 = scalar_lea.vmem %s8096_s18, 128  ;;  %p7086_p0 = scmp.lt.s32.totalorder %s8096_s18, %s7084_s5 }
0x2177   : > { %p7080_p11 = scmp.ne.s32.totalorder %s8096_s18, %s7079_s3 }
0x2179   : > { %p7081_p12 = pnand %p7080_p11, %p7391_p5 }
0x217a   : > { %v5191_v25 = vpop.f32.mrb[44].mxu1 }
0x217b   : > { %v5195_v17 = vmul.f32 0.17677669, %v5191_v25  ;;  %v6449_v19 = vpop.f32.mrb[45].mxu1  ;;  %p7082_p13 = pneg %p7081_p12 }
0x217d   : > { %v5196_v36 = vadd.f32 %v7078_v32, %v5195_v17  ;;  %v5892_v32 = vld [vmem:[%s8250_s25] ss:$0 sm:$0xff]  ;;  %s7085_s25 = scalar_lea.vmem %s7084_s5, 256 }
0x217e   : > { %p7087_p1 = scmp.lt.s32.totalorder %s7085_s25, %s7079_s3 }
0x217f   : > { %v5197_v37 = vmul.f32 1.442695, %v5196_v36 }
0x2180   : > { %p7088_p2 = por %p7087_p1, %p7086_p0 }
0x2181   : > { %7069 = vpow2.f32 %v5197_v37 }
0x2182   : > { %p7089_p3 = pnand %p7088_p2, %p7082_p13 }
0x218b   : > { %v7070_v38 = vpop.eup %7069 }
0x218c   : > { %v5199_v39 = vsel %vm1194_vm7, %v7070_v38, 0.0 }
0x218d   : > { %5200 = vadd.xlane.f32.xlu1 %v5199_v39 }
0x219e   : > { %5285 = vrot.lane.b32.xlu1 %v4938_v33, %s8233_s15  ;;  %s8251_s15 = sld [smem:[#allocation25_spill]] }
0x21a4   : > { %s8252_s26 = smov %s8251_s15  ;;  %s8094_s22 = scalar_lea.hbm %s8251_s15, %s5897_s28 }
0x21e5   : > { %v5290_v13 = vpop.permute.xlu0 %5289 }
0x221a   : > { %v5201_v21 = vpop.xlane.xlu1 %5200 }
0x221b   : > { %7071 = vrcp.f32 %v5201_v21  ;;  %v5894_v21 = vld [vmem:[%s7336_s20] ss:$0 sm:$0xff] }
0x221e   : > { %v5286_v12 = vpop.permute.xlu1 %5285 }
0x221f   : > { %v5296_v50 = vsel %vm1096_vm1, %v8019_v58, %v5286_v12 }
0x2220   : > { %v5297_v6 = vsel %vm1912_vm8, %v5296_v50, %v5290_v13  ;;  %v5591_v50 = vsub.s32 2, %v7587_v14 }
0x2225   : > { %v7072_v40 = vpop.eup %7071 }
0x2226   : > { %v5203_v41 = vmul.f32 %v7072_v40, %v7070_v38 }
0x2228   : > { %6455 = vmatmul.mubr.msk.f32.vlgmr.msra.gmra.mrb[40].mxu0 %vm1194_vm7, %v5203_v41 }
0x2229   : > { %6465 = vmatprep.mubr.msk.f32.mxu0 %vm7189_vm12, %v7190_v42  ;;  %6734 = vmatpush3.bf16.msra.mxu0 %v6733_v45 }
0x222a   : > { %6735 = vmatprep.subr.bf16.mxu0 %v7188_v29 }
0x222d   : > { %6737 = vmatpush3.bf16.msra.mxu0 %v6736_v47 }
0x222e   : > { %6744 = vmatprep.subr.bf16.mxu0 %v7188_v29 }
0x22fb   : > { %v5280_v48 = vpop.f32.mrb[40].mxu0 }
0x22fc   : > { %5293 = vrot.lane.b32.xlu0 %v5280_v48, %s8236_s17  ;;  %v6456_v49 = vpop.f32.mrb[41].mxu0  ;;  %s8249_s17 = sld [smem:[#allocation24_spill]] }
0x2302   : > { %v5487_v0 = vld [vmem:[%s8249_s17] sm:$0xff]  ;;  %v5488_v1 = vld [vmem:[%s8249_s17 + $0x8] sm:$0xff]  ;;  %v5489_v2 = vld [vmem:[%s8249_s17 + $0x10] sm:$0xff] }
0x2303   : > { %v6745_v3 = vpack.c.bf16 %v5488_v1, %v5487_v0  ;;  %v5490_v4 = vld [vmem:[%s8249_s17 + $0x18] sm:$0xff]  ;;  %v5491_v26 = vld [vmem:[%s8249_s17 + $0x20] sm:$0xff]  ;;  %v5492_v9 = vld [vmem:[%s8249_s17 + $0x28] sm:$0xff] }
0x2304   : > { %v6748_v8 = vpack.c.bf16 %v5490_v4, %v5489_v2  ;;  %v6751_v15 = vpack.c.bf16 %v5492_v9, %v5491_v26  ;;  %v5493_v17 = vld [vmem:[%s8249_s17 + $0x30] sm:$0xff] }
0x236e   : > { %v5294_v51 = vpop.permute.xlu0 %5293 }
0x236f   : > { %v5298_v10 = vsel %vm1915_vm9, %v5297_v6, %v5294_v51  ;;  %v5592_v51 = vrot.slane %v7948_v54, %v5591_v50 }
0x2370   : > { %6466 = vmatmul.mubr.msk.f32.vlgmr.msra.gmra.mrb[42].mxu0 %vm1003_vm0, %v5298_v10 }
0x2371   : > { %6495 = vmatprep.mubr.msk.f32.mxu0 %vm7189_vm12, %v7190_v42  ;;  %6746 = vmatpush3.bf16.msra.mxu0 %v6745_v3 }
0x2372   : > { %6747 = vmatprep.subr.bf16.mxu0 %v7188_v29 }
0x2375   : > { %6749 = vmatpush3.bf16.msra.mxu0 %v6748_v8 }
0x2376   : > { %6750 = vmatprep.subr.bf16.mxu0 %v7188_v29 }
0x2379   : > { %6752 = vmatpush3.bf16.msra.mxu0 %v6751_v15 }
0x237a   : > { %6753 = vmatprep.subr.bf16.mxu0 %v7188_v29  ;;  %v5494_v29 = vld [vmem:[%s8249_s17 + $0x38] sm:$0xff] }
0x237b   : > { %v6754_v19 = vpack.c.bf16 %v5494_v29, %v5493_v17 }
0x237d   : > { %6755 = vmatpush3.bf16.msra.mxu0 %v6754_v19 }
0x2443   : > { %v5374_v52 = vpop.f32.mrb[42].mxu0 }
0x2444   : > { %v5375_v53 = vadd.f32 %v5890_v7, %v5374_v52  ;;  %v6467_v35 = vpop.f32.mrb[43].mxu0  ;;  %v5597_v7 = vrot.slane %v7951_v55, %v5591_v50 }
0x2446   : > { %v5378_v30 = vadd.f32 %v5375_v53, %v7957_v59  ;;  %v5404_v59 = vld [vmem:[%s8248_s21 + $0x10] sm:$0xff] }
0x2447   : > { %v6742_v16 = vpack.c.bf16 %v5405_v63, %v5404_v59 }
0x2448   : > { %v5379_v57 = vsel %vm1003_vm0, %v5378_v30, 0.0 }
0x2449   : > { %5380 = vadd.xlane.f32.xlu0 %v5379_v57  ;;  %6743 = vmatpush3.bf16.msra.mxu1 %v6742_v16 }
0x24d6   : > { %v5381_v34 = vpop.xlane.xlu0 %5380 }
0x24d7   : > { %v5382_v58 = vmul.f32 0.03125, %v5381_v34 }
0x24d9   : > { %v5383_v56 = vsub.f32 %v5378_v30, %v5382_v58 }
0x24db   : > { %v5384_v33 = vmul.f32 %v5383_v56, %v5383_v56 }
0x24dd   : > { %v5385_v42 = vsel %vm1003_vm0, %v5384_v33, 0.0 }
0x24de   : > { %5386 = vadd.xlane.f32.xlu1 %v5385_v42 }
0x256b   : > { %v5387_v27 = vpop.xlane.xlu1 %5386 }
0x256c   : > { %v5388_v22 = vmul.f32 0.03125, %v5387_v27 }
0x256e   : > { %v5389_v11 = vadd.f32 1e-05, %v5388_v22 }
0x2570   : > { %7073 = vrsqrt.f32 %v5389_v11 }
0x257a   : > { %v7074_v23 = vpop.eup %7073 }
0x257b   : > { %v5391_v62 = vmul.f32 %v7074_v23, %v5383_v56 }
0x257d   : > { %v5396_v24 = vmul.f32 %v5395_v60, %v5391_v62 }
0x257f   : > { %v5401_v25 = vadd.f32 %v5400_v28, %v5396_v24 }
0x2581   : > { %6477 = vmatmul.mubr.msk.f32.vlgmr.msra.gmra.mrb[46].mxu1 %vm1003_vm0, %v5401_v25 }
0x2654   : > { %v5482_v36 = vpop.f32.mrb[46].mxu1 }
0x2655   : > { %v5483_v37 = vadd.f32 %v5892_v32, %v5482_v36  ;;  %v6478_v38 = vpop.f32.mrb[47].mxu1 }
0x2657   : > { %v5486_v39 = vmax.f32 %v5483_v37, 0.0 }
0x2659   : > { %6496 = vmatmul.mubr.msk.f32.vlgmr.msra.gmra.mrb[44].mxu0 %vm2158_vm11, %v5486_v39 }
0x272c   : > { %v5571_v40 = vpop.f32.mrb[44].mxu0 }
0x272d   : > { %v5572_v41 = vadd.f32 %v5894_v21, %v5571_v40  ;;  %v6497_v5 = vpop.f32.mrb[45].mxu0 }
0x272f   : > { %v5575_v43 = vadd.f32 %v5572_v41, %v5401_v25 }
0x2731   : > { %v5576_v44 = vsel %vm1003_vm0, %v5575_v43, 0.0 }
0x2732   : > { %5577 = vadd.xlane.f32.xlu0 %v5576_v44 }
0x27bf   : > { %v5578_v18 = vpop.xlane.xlu0 %5577 }
0x27c0   : > { %v5579_v45 = vmul.f32 0.03125, %v5578_v18 }
0x27c2   : > { %v5580_v46 = vsub.f32 %v5575_v43, %v5579_v45 }
0x27c4   : > { %v5581_v47 = vmul.f32 %v5580_v46, %v5580_v46 }
0x27c6   : > { %v5582_v48 = vsel %vm1003_vm0, %v5581_v47, 0.0 }
0x27c7   : > { %5583 = vadd.xlane.f32.xlu0 %v5582_v48 }
0x2854   : > { %v5584_v49 = vpop.xlane.xlu0 %5583 }
0x2855   : > { %v5585_v12 = vmul.f32 0.03125, %v5584_v49 }
0x2857   : > { %v5586_v13 = vadd.f32 1e-05, %v5585_v12 }
0x2859   : > { %7075 = vrsqrt.f32 %v5586_v13 }
0x2863   : > { %v7076_v6 = vpop.eup %7075 }
0x2864   : > { %v5588_v10 = vmul.f32 %v7076_v6, %v5580_v46 }
0x2866   : > { %v5593_v52 = vmul.f32 %v5592_v51, %v5588_v10 }
0x2868   : > { %v5598_v53 = vadd.f32 %v5597_v7, %v5593_v52 }
0x286a   : > { %5599 = vst.msk [vmem:[%s958_s8] sm:$0xff] %vm1003_vm0, %v5598_v53 }
0x286b   : > { %7092 = shalt.err (!%p7089_p3)
}
0x286c   : > { %s7093_s15 = scalar_lea.hbm %s8094_s22, 128  ;;  %s7097_s2 = scalar_lea.hbm %s8252_s26, 256 }
0x286d   : > { %p7094_p4 = scmp.ne.s32.totalorder %s8094_s22, %s7093_s15  ;;  %p7098_p9 = scmp.lt.u32.totalorder %s8094_s22, %s8252_s26 }
0x286e   : > { %p7099_p10 = scmp.lt.u32.totalorder %s7097_s2, %s7093_s15  ;;  %p7101_p12 = scmp.lt.u32.totalorder %s7093_s15, %s8094_s22 }
0x286f   : > { %p7095_p7 = pnand %p7094_p4, %p7391_p5 }
0x2870   : > { %p7100_p11 = por %p7099_p10, %p7098_p9 }
0x2871   : > { %p7096_p8 = pneg %p7095_p7 }
0x2872   : > { %p7102_p0 = por %p7101_p12, %p7100_p11 }
0x2874   : > { %p7103_p13 = pnand %p7102_p0, %p7096_p8 }
0x2876   : > { %7106 = shalt.err (!%p7103_p13)
}
0x2877   : > { %6756 = dma.vmem_to_hbm [thread:$0]  (%p7391_p5), %s8096_s18, 128, %s8094_s22, %s5601_s1  }
0x2878 PF: > { %s8254_s7 = sld [smem:[#allocation28_spill]]  ;;  %s8255_s28 = sld [smem:[#allocation26_spill]] }
0x287e   : > { %p6762_p1 = scmp.ge.s32.totalorder %s8254_s7, 2  ;;  %s5626_s3 = sand.u32 1, %s8255_s28  }
0x287f   : > { %s5627_s0 = scalar_lea.sflag [#allocation3], %s5626_s3 }
0x2880   : > { %p6759_p2 = pnand %p6762_p1, %p7395_p6 }
0x2882   : > { %7124 = dma.done.wait (!%p6759_p2), %s5627_s0, 128  }
0x2883   : > { %7126 = vsyncadd (!%p6759_p2), %s5627_s0, 4294967168  ;;  %s8257_s22 = sld [smem:[#allocation29_spill]]  ;;  %s8258_s5 = sld [smem:[#allocation27_spill]] }
0x2884   : > { %s8259_s18 = sld [smem:[#allocation30_spill]]  ;;  %s8260_s15 = smov %s7133_s16 }
0x2889   : > { %p71_p3 = scmp.ge.s32.totalorder %s8257_s22, 4   ;;  %s8261_s16 = smov %s8258_s5 }
0x288b   :  { %73 = sbr.rel (!%p71_p3) target bundleno = 66 (0x42), region = 224 }
0x2892   :  { %5632 = vsyncpa [#allocation3], 1 }
0x2893   :  { %5634 = vsyncpa [#allocation3 + $0x1], 1 }

</bundles_post_ra>
